<compile_context>
chip_gen: v5e
topology: v5e:2x2
jax: 0.10.0
libtpu: 0.0.40
codegen_flags: <defaults>
</compile_context>

<pallas_src>
import jax
import jax.numpy as jnp
from jax.experimental import pallas as pl
from jax.experimental.pallas import tpu as pltpu

EMB = 50              # args.embedding_dim
E_PAD = 128           # channels zero-padded to one full vreg lane width
K1, K2, K3 = 9, 9, 7
N_CLS = 2
BN_EPS = 1e-5


# ----------------------------- kernel helpers --------------------------------

def _conv1d_relu(x3, wf_ref, b_ref, ksize):
    """Valid Conv1d (stride 1) + bias + ReLU via im2col.

    x3:     (B, L, E_PAD) f32 activations, channels last.
    wf_ref: (K*E_PAD, E_PAD) bf16 host-pre-reshaped weight.
    b_ref:  (1, E_PAD) f32 bias.
    Returns ((B*l_out, E_PAD) f32, l_out): one 2D bf16 MXU matmul, f32 accum.
    """
    bsz, l, ep = x3.shape
    lo = l - ksize + 1
    xb = x3.astype(jnp.bfloat16)                     # bf16 matmul operands
    # im2col: K lane-concat pieces, each E_PAD == 128 wide -> vreg-aligned.
    patches = jnp.concatenate([xb[:, k:k + lo, :] for k in range(ksize)],
                              axis=-1)               # (B, lo, K*E_PAD)
    p2d = patches.reshape(bsz * lo, ksize * ep)      # single 2D matmul, M=B*lo
    h = jnp.dot(p2d, wf_ref[...], preferred_element_type=jnp.float32)
    return jnp.maximum(h + b_ref[...], 0.0), lo


def _batchnorm1d(h2d, g_ref, be_ref):
    """Training-mode BatchNorm1d over the (batch*length) rows of (N, E_PAD).

    Two-pass stats (mean, then E[(x-mean)^2]); both reductions ride the idle
    MXU as ones-row matmuls instead of chained XLU reduce passes."""
    n = h2d.shape[0]
    ones = jnp.ones((1, n), jnp.float32)
    inv_n = 1.0 / n
    mean = jnp.dot(ones, h2d, preferred_element_type=jnp.float32) * inv_n
    d = h2d - mean
    var = jnp.dot(ones, d * d, preferred_element_type=jnp.float32) * inv_n
    scale = g_ref[...] * jax.lax.rsqrt(var + BN_EPS)  # gamma==0 on padded lanes
    return d * scale + be_ref[...]


def _maxpool1d_2(h2d, bsz, lo):
    """MaxPool1d(kernel=2, stride=2) along length, fully in-register:
    (B*lo, E_PAD) -> (B, lo//2, E_PAD) via pair-split reshape + max reduce."""
    ep = h2d.shape[1]
    ph = lo // 2
    h3 = h2d.reshape(bsz, lo, ep)
    return jnp.max(h3[:, :2 * ph, :].reshape(bsz, ph, 2, ep), axis=2)


# -------------------------------- kernel --------------------------------------

def _cnn_fused_kernel(x_ref,
                      w1_ref, b1_ref, g1_ref, be1_ref,
                      w2_ref, b2_ref, g2_ref, be2_ref,
                      w3_ref, b3_ref,
                      wt_ref, bt_ref,
                      out_ref):
    x = x_ref[...]                                            # (B, L, E_PAD)
    bsz = x.shape[0]

    h2d, l1 = _conv1d_relu(x, w1_ref, b1_ref, K1)             # (B*L1, E_PAD)
    h = _maxpool1d_2(_batchnorm1d(h2d, g1_ref, be1_ref), bsz, l1)

    h2d, l2 = _conv1d_relu(h, w2_ref, b2_ref, K2)             # (B*L2, E_PAD)
    h = _maxpool1d_2(_batchnorm1d(h2d, g2_ref, be2_ref), bsz, l2)

    h2d, l3 = _conv1d_relu(h, w3_ref, b3_ref, K3)             # (B*L3, E_PAD)

    # Fused "PyTorch NCL .reshape(-1, E) + Linear": the per-batch lane layout
    # [h[b,0,:], ..., h[b,L3-1,:]] is exactly a row-major reshape, multiplied
    # by the host-prepared scrambled (L3*E_PAD, L3*N_CLS) matrix.
    hflat = h2d.reshape(bsz, l3 * h2d.shape[1])               # (B, L3*E_PAD)
    out_ref[...] = (jnp.dot(hflat, wt_ref[...],
                            preferred_element_type=jnp.float32)
                    + bt_ref[...])                            # (B, L3*N_CLS)


# ------------------------------ host-side prep --------------------------------

def _vmem_spec():
    return pl.BlockSpec(memory_space=pltpu.MemorySpace.VMEM)


def _pad_channels_2d(v):
    """(1, EMB) f32 -> (1, E_PAD), zero padded (gamma/beta/bias)."""
    return jnp.pad(v.astype(jnp.float32), ((0, 0), (0, E_PAD - EMB)))


def _conv_weight_im2col(w):
    """(K, EMB_in, EMB_out) -> (K*E_PAD, E_PAD) bf16, channels zero-padded."""
    k = w.shape[0]
    wp = jnp.pad(w.astype(jnp.float32),
                 ((0, 0), (0, E_PAD - EMB), (0, E_PAD - EMB)))
    return wp.reshape(k * E_PAD, E_PAD).astype(jnp.bfloat16)


def _scrambled_linear_weights(wl, bl, l3):
    """Fold PyTorch's NCL `.reshape(-1, EMB)` + Linear(EMB, 2) into a single
    (L3*E_PAD, L3*N_CLS) matrix acting on the channels-last row-major flatten
    (row index = l*E_PAD + c; padded-channel rows are zero)."""
    c = jnp.arange(EMB)[:, None]                 # (E, 1)   channel
    l = jnp.arange(l3)[None, :]                  # (1, L3)  position
    cl = c * l3 + l                              # NCL flat index within a batch
    q = cl // EMB                                # output row (within a batch)
    j = cl % EMB                                 # Linear input column
    onehot_q = (q[..., None] == jnp.arange(l3)[None, None, :]).astype(wl.dtype)
    t = wl[j][:, :, None, :] * onehot_q[..., None]           # (E, L3, L3, 2)
    t = jnp.transpose(t, (1, 0, 2, 3))                       # (L3, E, L3, 2)
    t = jnp.pad(t, ((0, 0), (0, E_PAD - EMB), (0, 0), (0, 0)))
    t = t.reshape(l3 * E_PAD, l3 * N_CLS).astype(jnp.float32)
    bt = jnp.tile(bl.reshape(1, N_CLS), (1, l3)).astype(jnp.float32)
    return t, bt


def cnn_forward(token_ids, p):
    b, l = token_ids.shape
    l1 = l - K1 + 1
    p1 = l1 // 2
    l2 = p1 - K2 + 1
    p2 = l2 // 2
    l3 = p2 - K3 + 1
    assert l3 > 0, "sequence too short for the conv/pool stack"

    # TODO(synk): the data-dependent embedding gather stays in plain-JAX glue;
    # fold it into the kernel (PrefetchScalarGridSpec + pl.Element row gather)
    # only once B*L is large enough for this HBM round trip to matter.
    emb_p = jnp.pad(p['emb'].astype(jnp.float32), ((0, 0), (0, E_PAD - EMB)))
    x = emb_p[token_ids]                                      # (B, L, E_PAD)

    w1f = _conv_weight_im2col(p['w1'])
    w2f = _conv_weight_im2col(p['w2'])
    w3f = _conv_weight_im2col(p['w3'])
    wt, bt = _scrambled_linear_weights(p['wl'], p['bl'], l3)

    out = pl.pallas_call(
        _cnn_fused_kernel,
        out_shape=jax.ShapeDtypeStruct((b, l3 * N_CLS), jnp.float32),
        in_specs=[_vmem_spec() for _ in range(13)],
        out_specs=_vmem_spec(),
        # TODO(synk): at training-size batches, add a "parallel" batch grid axis
        # (megacore / v7x 2nd TC) with a two-phase BN or CMEM cross-core
        # reduction, and set pltpu.CompilerParams(vmem_limit_bytes=...) for
        # v5e's 16 MiB default scoped VMEM.  At B=2 it is pure overhead.
    )(x,
      w1f, _pad_channels_2d(p['b1']), _pad_channels_2d(p['g1']),
      _pad_channels_2d(p['be1']),
      w2f, _pad_channels_2d(p['b2']), _pad_channels_2d(p['g2']),
      _pad_channels_2d(p['be2']),
      w3f, _pad_channels_2d(p['b3']),
      wt, bt)

    # Metadata-only reshape (B, L3*2) -> (B*L3, 2): matches PyTorch's row order.
    return out.reshape(b * l3, N_CLS)


# -------------------------- plain-JAX reference --------------------------------

def reference_forward(token_ids, p):
    x = p['emb'][token_ids].astype(jnp.float32)               # (B, L, E)
    x = jnp.transpose(x, (0, 2, 1))                           # (B, E, L)  NCL

    def conv1d(x, w, bias, k):                                # w: (K, Cin, Cout)
        lo = x.shape[2] - k + 1
        acc = jnp.zeros((x.shape[0], lo, w.shape[2]), jnp.float32)
        for i in range(k):
            acc = acc + jnp.einsum('bcl,cf->blf', x[:, :, i:i + lo], w[i])
        acc = acc + bias.reshape(1, 1, -1)
        return jnp.transpose(acc, (0, 2, 1))                  # (B, Cout, lo)

    def bn(x, g, be):
        mean = jnp.mean(x, axis=(0, 2), keepdims=True)
        var = jnp.mean(jnp.square(x - mean), axis=(0, 2), keepdims=True)
        return ((x - mean) / jnp.sqrt(var + BN_EPS)
                * g.reshape(1, -1, 1) + be.reshape(1, -1, 1))

    def pool(x):
        lh = x.shape[2] // 2
        return jnp.max(x[:, :, :2 * lh].reshape(x.shape[0], x.shape[1], lh, 2),
                       axis=-1)

    h = pool(bn(jnp.maximum(conv1d(x, p['w1'], p['b1'], K1), 0.0),
                p['g1'], p['be1']))
    h = pool(bn(jnp.maximum(conv1d(h, p['w2'], p['b2'], K2), 0.0),
                p['g2'], p['be2']))
    h = jnp.maximum(conv1d(h, p['w3'], p['b3'], K3), 0.0)     # (B, E, L3)
    return h.reshape(-1, EMB) @ p['wl'] + p['bl']


# ------------------------------ param init -------------------------------------

def init_params(key, vocab_size):
    ks = jax.random.split(key, 8)

    def nrm(k, shape, scale):
        return scale * jax.random.normal(k, shape, jnp.float32)

    return dict(
        emb=nrm(ks[0], (vocab_size + 2, EMB), 1.0),
        w1=nrm(ks[1], (K1, EMB, EMB), 0.05), b1=nrm(ks[2], (1, EMB), 0.05),
        g1=jnp.ones((1, EMB), jnp.float32), be1=jnp.zeros((1, EMB), jnp.float32),
        w2=nrm(ks[3], (K2, EMB, EMB), 0.05), b2=nrm(ks[4], (1, EMB), 0.05),
        g2=jnp.ones((1, EMB), jnp.float32), be2=jnp.zeros((1, EMB), jnp.float32),
        w3=nrm(ks[5], (K3, EMB, EMB), 0.05), b3=nrm(ks[6], (1, EMB), 0.05),
        wl=nrm(ks[7], (EMB, N_CLS), 0.1), bl=jnp.zeros((1, N_CLS), jnp.float32),
    )


if __name__ == "__main__":
    key = jax.random.PRNGKey(0)
    k_tok, k_par = jax.random.split(key)

    vocab_size = 30
    batch, seq_len = 2, 64                                    # L3 ends up = 4
    token_ids = jax.random.randint(k_tok, (batch, seq_len), 0, vocab_size + 2,
                                   dtype=jnp.int32)
    params = init_params(k_par, vocab_size)

    out = jax.jit(cnn_forward)(token_ids, params)
    out = jax.block_until_ready(out)

    ref = reference_forward(token_ids, params)
    assert out.shape == ref.shape == (batch * 4, N_CLS), (out.shape, ref.shape)
    if not bool(jnp.allclose(out, ref, rtol=5e-2, atol=5e-2)):
        raise AssertionError("Pallas CNN output mismatch vs JAX reference")
    print("KERNEL_OK")
</pallas_src>

<mosaic_0001>
module attributes {stable_mosaic.version = 11 : i64} {
  func.func @_cnn_fused_kernel(%arg0: memref<2x64x128xf32, #tpu.memory_space<vmem>>, %arg1: memref<1152x128xbf16, #tpu.memory_space<vmem>>, %arg2: memref<1x128xf32, #tpu.memory_space<vmem>>, %arg3: memref<1x128xf32, #tpu.memory_space<vmem>>, %arg4: memref<1x128xf32, #tpu.memory_space<vmem>>, %arg5: memref<1152x128xbf16, #tpu.memory_space<vmem>>, %arg6: memref<1x128xf32, #tpu.memory_space<vmem>>, %arg7: memref<1x128xf32, #tpu.memory_space<vmem>>, %arg8: memref<1x128xf32, #tpu.memory_space<vmem>>, %arg9: memref<896x128xbf16, #tpu.memory_space<vmem>>, %arg10: memref<1x128xf32, #tpu.memory_space<vmem>>, %arg11: memref<512x8xf32, #tpu.memory_space<vmem>>, %arg12: memref<1x8xf32, #tpu.memory_space<vmem>>, %arg13: memref<2x8xf32, #tpu.memory_space<vmem>>) attributes {dimension_semantics = [], scalar_prefetch = 0 : i64, scratch_operands = 0 : i64, tpu.core_type = #tpu.core_type<tc>} {
    %c0 = arith.constant 0 : index
    %c0_0 = arith.constant 0 : index
    %c0_1 = arith.constant 0 : index
    %0 = vector.load %arg0[%c0, %c0_0, %c0_1] : memref<2x64x128xf32, #tpu.memory_space<vmem>>, vector<2x64x128xf32>
    %1 = arith.truncf %0 : vector<2x64x128xf32> to vector<2x64x128xbf16>
    %2 = vector.extract_strided_slice %1 {offsets = [0, 0, 0], sizes = [2, 56, 128], strides = [1, 1, 1]} : vector<2x64x128xbf16> to vector<2x56x128xbf16>
    %3 = vector.extract_strided_slice %1 {offsets = [0, 1, 0], sizes = [2, 56, 128], strides = [1, 1, 1]} : vector<2x64x128xbf16> to vector<2x56x128xbf16>
    %4 = vector.extract_strided_slice %1 {offsets = [0, 2, 0], sizes = [2, 56, 128], strides = [1, 1, 1]} : vector<2x64x128xbf16> to vector<2x56x128xbf16>
    %5 = vector.extract_strided_slice %1 {offsets = [0, 3, 0], sizes = [2, 56, 128], strides = [1, 1, 1]} : vector<2x64x128xbf16> to vector<2x56x128xbf16>
    %6 = vector.extract_strided_slice %1 {offsets = [0, 4, 0], sizes = [2, 56, 128], strides = [1, 1, 1]} : vector<2x64x128xbf16> to vector<2x56x128xbf16>
    %7 = vector.extract_strided_slice %1 {offsets = [0, 5, 0], sizes = [2, 56, 128], strides = [1, 1, 1]} : vector<2x64x128xbf16> to vector<2x56x128xbf16>
    %8 = vector.extract_strided_slice %1 {offsets = [0, 6, 0], sizes = [2, 56, 128], strides = [1, 1, 1]} : vector<2x64x128xbf16> to vector<2x56x128xbf16>
    %9 = vector.extract_strided_slice %1 {offsets = [0, 7, 0], sizes = [2, 56, 128], strides = [1, 1, 1]} : vector<2x64x128xbf16> to vector<2x56x128xbf16>
    %10 = vector.extract_strided_slice %1 {offsets = [0, 8, 0], sizes = [2, 56, 128], strides = [1, 1, 1]} : vector<2x64x128xbf16> to vector<2x56x128xbf16>
    %11 = tpu.concatenate %2, %3, %4, %5, %6, %7, %8, %9, %10 in 2 : vector<2x56x128xbf16>, vector<2x56x128xbf16>, vector<2x56x128xbf16>, vector<2x56x128xbf16>, vector<2x56x128xbf16>, vector<2x56x128xbf16>, vector<2x56x128xbf16>, vector<2x56x128xbf16>, vector<2x56x128xbf16> -> vector<2x56x1152xbf16>
    %12 = vector.shape_cast %11 : vector<2x56x1152xbf16> to vector<112x1152xbf16>
    %c0_2 = arith.constant 0 : index
    %c0_3 = arith.constant 0 : index
    %13 = vector.load %arg1[%c0_2, %c0_3] : memref<1152x128xbf16, #tpu.memory_space<vmem>>, vector<1152x128xbf16>
    %cst = arith.constant dense<0.000000e+00> : vector<112x128xf32>
    %14 = tpu.matmul %12, %13, %cst {dimension_numbers = #tpu.dot_dimension_numbers<[1], [0], [0], [1], [0, 0, 1, 1], [], []>} : vector<112x1152xbf16>, vector<1152x128xbf16>, vector<112x128xf32> -> vector<112x128xf32>
    %c0_4 = arith.constant 0 : index
    %c0_5 = arith.constant 0 : index
    %15 = vector.load %arg2[%c0_4, %c0_5] : memref<1x128xf32, #tpu.memory_space<vmem>>, vector<1x128xf32>
    %16 = vector.broadcast %15 : vector<1x128xf32> to vector<112x128xf32>
    %17 = arith.addf %14, %16 : vector<112x128xf32>
    %cst_6 = arith.constant 0.000000e+00 : f32
    %18 = vector.broadcast %cst_6 : f32 to vector<112x128xf32>
    %19 = arith.maximumf %17, %18 : vector<112x128xf32>
    %cst_7 = arith.constant 1.000000e+00 : f32
    %20 = vector.broadcast %cst_7 : f32 to vector<1x112xf32>
    %cst_8 = arith.constant dense<0.000000e+00> : vector<1x128xf32>
    %21 = tpu.matmul %20, %19, %cst_8 {dimension_numbers = #tpu.dot_dimension_numbers<[1], [0], [0], [1], [0, 0, 1, 1], [], []>} : vector<1x112xf32>, vector<112x128xf32>, vector<1x128xf32> -> vector<1x128xf32>
    %cst_9 = arith.constant 0.00892857183 : f32
    %22 = vector.broadcast %cst_9 : f32 to vector<1x128xf32>
    %23 = arith.mulf %21, %22 : vector<1x128xf32>
    %24 = vector.broadcast %23 : vector<1x128xf32> to vector<112x128xf32>
    %25 = arith.subf %19, %24 : vector<112x128xf32>
    %26 = arith.mulf %25, %25 : vector<112x128xf32>
    %cst_10 = arith.constant dense<0.000000e+00> : vector<1x128xf32>
    %27 = tpu.matmul %20, %26, %cst_10 {dimension_numbers = #tpu.dot_dimension_numbers<[1], [0], [0], [1], [0, 0, 1, 1], [], []>} : vector<1x112xf32>, vector<112x128xf32>, vector<1x128xf32> -> vector<1x128xf32>
    %cst_11 = arith.constant 0.00892857183 : f32
    %28 = vector.broadcast %cst_11 : f32 to vector<1x128xf32>
    %29 = arith.mulf %27, %28 : vector<1x128xf32>
    %c0_12 = arith.constant 0 : index
    %c0_13 = arith.constant 0 : index
    %30 = vector.load %arg3[%c0_12, %c0_13] : memref<1x128xf32, #tpu.memory_space<vmem>>, vector<1x128xf32>
    %cst_14 = arith.constant 9.99999974E-6 : f32
    %31 = vector.broadcast %cst_14 : f32 to vector<1x128xf32>
    %32 = arith.addf %29, %31 : vector<1x128xf32>
    %33 = math.rsqrt %32 : vector<1x128xf32>
    %34 = arith.mulf %30, %33 : vector<1x128xf32>
    %35 = vector.broadcast %34 : vector<1x128xf32> to vector<112x128xf32>
    %36 = arith.mulf %25, %35 : vector<112x128xf32>
    %c0_15 = arith.constant 0 : index
    %c0_16 = arith.constant 0 : index
    %37 = vector.load %arg4[%c0_15, %c0_16] : memref<1x128xf32, #tpu.memory_space<vmem>>, vector<1x128xf32>
    %38 = vector.broadcast %37 : vector<1x128xf32> to vector<112x128xf32>
    %39 = arith.addf %36, %38 : vector<112x128xf32>
    %40 = vector.shape_cast %39 : vector<112x128xf32> to vector<2x56x128xf32>
    %41 = vector.shape_cast %40 : vector<2x56x128xf32> to vector<2x28x2x128xf32>
    %cst_17 = arith.constant dense<0xFF800000> : vector<2x28x128xf32>
    %42 = vector.multi_reduction <maximumf>, %41, %cst_17 [2] : vector<2x28x2x128xf32> to vector<2x28x128xf32>
    %43 = arith.truncf %42 : vector<2x28x128xf32> to vector<2x28x128xbf16>
    %44 = vector.extract_strided_slice %43 {offsets = [0, 0, 0], sizes = [2, 20, 128], strides = [1, 1, 1]} : vector<2x28x128xbf16> to vector<2x20x128xbf16>
    %45 = vector.extract_strided_slice %43 {offsets = [0, 1, 0], sizes = [2, 20, 128], strides = [1, 1, 1]} : vector<2x28x128xbf16> to vector<2x20x128xbf16>
    %46 = vector.extract_strided_slice %43 {offsets = [0, 2, 0], sizes = [2, 20, 128], strides = [1, 1, 1]} : vector<2x28x128xbf16> to vector<2x20x128xbf16>
    %47 = vector.extract_strided_slice %43 {offsets = [0, 3, 0], sizes = [2, 20, 128], strides = [1, 1, 1]} : vector<2x28x128xbf16> to vector<2x20x128xbf16>
    %48 = vector.extract_strided_slice %43 {offsets = [0, 4, 0], sizes = [2, 20, 128], strides = [1, 1, 1]} : vector<2x28x128xbf16> to vector<2x20x128xbf16>
    %49 = vector.extract_strided_slice %43 {offsets = [0, 5, 0], sizes = [2, 20, 128], strides = [1, 1, 1]} : vector<2x28x128xbf16> to vector<2x20x128xbf16>
    %50 = vector.extract_strided_slice %43 {offsets = [0, 6, 0], sizes = [2, 20, 128], strides = [1, 1, 1]} : vector<2x28x128xbf16> to vector<2x20x128xbf16>
    %51 = vector.extract_strided_slice %43 {offsets = [0, 7, 0], sizes = [2, 20, 128], strides = [1, 1, 1]} : vector<2x28x128xbf16> to vector<2x20x128xbf16>
    %52 = vector.extract_strided_slice %43 {offsets = [0, 8, 0], sizes = [2, 20, 128], strides = [1, 1, 1]} : vector<2x28x128xbf16> to vector<2x20x128xbf16>
    %53 = tpu.concatenate %44, %45, %46, %47, %48, %49, %50, %51, %52 in 2 : vector<2x20x128xbf16>, vector<2x20x128xbf16>, vector<2x20x128xbf16>, vector<2x20x128xbf16>, vector<2x20x128xbf16>, vector<2x20x128xbf16>, vector<2x20x128xbf16>, vector<2x20x128xbf16>, vector<2x20x128xbf16> -> vector<2x20x1152xbf16>
    %54 = vector.shape_cast %53 : vector<2x20x1152xbf16> to vector<40x1152xbf16>
    %c0_18 = arith.constant 0 : index
    %c0_19 = arith.constant 0 : index
    %55 = vector.load %arg5[%c0_18, %c0_19] : memref<1152x128xbf16, #tpu.memory_space<vmem>>, vector<1152x128xbf16>
    %cst_20 = arith.constant dense<0.000000e+00> : vector<40x128xf32>
    %56 = tpu.matmul %54, %55, %cst_20 {dimension_numbers = #tpu.dot_dimension_numbers<[1], [0], [0], [1], [0, 0, 1, 1], [], []>} : vector<40x1152xbf16>, vector<1152x128xbf16>, vector<40x128xf32> -> vector<40x128xf32>
    %c0_21 = arith.constant 0 : index
    %c0_22 = arith.constant 0 : index
    %57 = vector.load %arg6[%c0_21, %c0_22] : memref<1x128xf32, #tpu.memory_space<vmem>>, vector<1x128xf32>
    %58 = vector.broadcast %57 : vector<1x128xf32> to vector<40x128xf32>
    %59 = arith.addf %56, %58 : vector<40x128xf32>
    %cst_23 = arith.constant 0.000000e+00 : f32
    %60 = vector.broadcast %cst_23 : f32 to vector<40x128xf32>
    %61 = arith.maximumf %59, %60 : vector<40x128xf32>
    %cst_24 = arith.constant 1.000000e+00 : f32
    %62 = vector.broadcast %cst_24 : f32 to vector<1x40xf32>
    %cst_25 = arith.constant dense<0.000000e+00> : vector<1x128xf32>
    %63 = tpu.matmul %62, %61, %cst_25 {dimension_numbers = #tpu.dot_dimension_numbers<[1], [0], [0], [1], [0, 0, 1, 1], [], []>} : vector<1x40xf32>, vector<40x128xf32>, vector<1x128xf32> -> vector<1x128xf32>
    %cst_26 = arith.constant 2.500000e-02 : f32
    %64 = vector.broadcast %cst_26 : f32 to vector<1x128xf32>
    %65 = arith.mulf %63, %64 : vector<1x128xf32>
    %66 = vector.broadcast %65 : vector<1x128xf32> to vector<40x128xf32>
    %67 = arith.subf %61, %66 : vector<40x128xf32>
    %68 = arith.mulf %67, %67 : vector<40x128xf32>
    %cst_27 = arith.constant dense<0.000000e+00> : vector<1x128xf32>
    %69 = tpu.matmul %62, %68, %cst_27 {dimension_numbers = #tpu.dot_dimension_numbers<[1], [0], [0], [1], [0, 0, 1, 1], [], []>} : vector<1x40xf32>, vector<40x128xf32>, vector<1x128xf32> -> vector<1x128xf32>
    %cst_28 = arith.constant 2.500000e-02 : f32
    %70 = vector.broadcast %cst_28 : f32 to vector<1x128xf32>
    %71 = arith.mulf %69, %70 : vector<1x128xf32>
    %c0_29 = arith.constant 0 : index
    %c0_30 = arith.constant 0 : index
    %72 = vector.load %arg7[%c0_29, %c0_30] : memref<1x128xf32, #tpu.memory_space<vmem>>, vector<1x128xf32>
    %cst_31 = arith.constant 9.99999974E-6 : f32
    %73 = vector.broadcast %cst_31 : f32 to vector<1x128xf32>
    %74 = arith.addf %71, %73 : vector<1x128xf32>
    %75 = math.rsqrt %74 : vector<1x128xf32>
    %76 = arith.mulf %72, %75 : vector<1x128xf32>
    %77 = vector.broadcast %76 : vector<1x128xf32> to vector<40x128xf32>
    %78 = arith.mulf %67, %77 : vector<40x128xf32>
    %c0_32 = arith.constant 0 : index
    %c0_33 = arith.constant 0 : index
    %79 = vector.load %arg8[%c0_32, %c0_33] : memref<1x128xf32, #tpu.memory_space<vmem>>, vector<1x128xf32>
    %80 = vector.broadcast %79 : vector<1x128xf32> to vector<40x128xf32>
    %81 = arith.addf %78, %80 : vector<40x128xf32>
    %82 = vector.shape_cast %81 : vector<40x128xf32> to vector<2x20x128xf32>
    %83 = vector.shape_cast %82 : vector<2x20x128xf32> to vector<2x10x2x128xf32>
    %cst_34 = arith.constant dense<0xFF800000> : vector<2x10x128xf32>
    %84 = vector.multi_reduction <maximumf>, %83, %cst_34 [2] : vector<2x10x2x128xf32> to vector<2x10x128xf32>
    %85 = arith.truncf %84 : vector<2x10x128xf32> to vector<2x10x128xbf16>
    %86 = vector.extract_strided_slice %85 {offsets = [0, 0, 0], sizes = [2, 4, 128], strides = [1, 1, 1]} : vector<2x10x128xbf16> to vector<2x4x128xbf16>
    %87 = vector.extract_strided_slice %85 {offsets = [0, 1, 0], sizes = [2, 4, 128], strides = [1, 1, 1]} : vector<2x10x128xbf16> to vector<2x4x128xbf16>
    %88 = vector.extract_strided_slice %85 {offsets = [0, 2, 0], sizes = [2, 4, 128], strides = [1, 1, 1]} : vector<2x10x128xbf16> to vector<2x4x128xbf16>
    %89 = vector.extract_strided_slice %85 {offsets = [0, 3, 0], sizes = [2, 4, 128], strides = [1, 1, 1]} : vector<2x10x128xbf16> to vector<2x4x128xbf16>
    %90 = vector.extract_strided_slice %85 {offsets = [0, 4, 0], sizes = [2, 4, 128], strides = [1, 1, 1]} : vector<2x10x128xbf16> to vector<2x4x128xbf16>
    %91 = vector.extract_strided_slice %85 {offsets = [0, 5, 0], sizes = [2, 4, 128], strides = [1, 1, 1]} : vector<2x10x128xbf16> to vector<2x4x128xbf16>
    %92 = vector.extract_strided_slice %85 {offsets = [0, 6, 0], sizes = [2, 4, 128], strides = [1, 1, 1]} : vector<2x10x128xbf16> to vector<2x4x128xbf16>
    %93 = tpu.concatenate %86, %87, %88, %89, %90, %91, %92 in 2 : vector<2x4x128xbf16>, vector<2x4x128xbf16>, vector<2x4x128xbf16>, vector<2x4x128xbf16>, vector<2x4x128xbf16>, vector<2x4x128xbf16>, vector<2x4x128xbf16> -> vector<2x4x896xbf16>
    %94 = vector.shape_cast %93 : vector<2x4x896xbf16> to vector<8x896xbf16>
    %c0_35 = arith.constant 0 : index
    %c0_36 = arith.constant 0 : index
    %95 = vector.load %arg9[%c0_35, %c0_36] : memref<896x128xbf16, #tpu.memory_space<vmem>>, vector<896x128xbf16>
    %cst_37 = arith.constant dense<0.000000e+00> : vector<8x128xf32>
    %96 = tpu.matmul %94, %95, %cst_37 {dimension_numbers = #tpu.dot_dimension_numbers<[1], [0], [0], [1], [0, 0, 1, 1], [], []>} : vector<8x896xbf16>, vector<896x128xbf16>, vector<8x128xf32> -> vector<8x128xf32>
    %c0_38 = arith.constant 0 : index
    %c0_39 = arith.constant 0 : index
    %97 = vector.load %arg10[%c0_38, %c0_39] : memref<1x128xf32, #tpu.memory_space<vmem>>, vector<1x128xf32>
    %98 = vector.broadcast %97 : vector<1x128xf32> to vector<8x128xf32>
    %99 = arith.addf %96, %98 : vector<8x128xf32>
    %cst_40 = arith.constant 0.000000e+00 : f32
    %100 = vector.broadcast %cst_40 : f32 to vector<8x128xf32>
    %101 = arith.maximumf %99, %100 : vector<8x128xf32>
    %102 = vector.shape_cast %101 : vector<8x128xf32> to vector<2x512xf32>
    %c0_41 = arith.constant 0 : index
    %c0_42 = arith.constant 0 : index
    %103 = vector.load %arg11[%c0_41, %c0_42] : memref<512x8xf32, #tpu.memory_space<vmem>>, vector<512x8xf32>
    %cst_43 = arith.constant dense<0.000000e+00> : vector<2x8xf32>
    %104 = tpu.matmul %102, %103, %cst_43 {dimension_numbers = #tpu.dot_dimension_numbers<[1], [0], [0], [1], [0, 0, 1, 1], [], []>} : vector<2x512xf32>, vector<512x8xf32>, vector<2x8xf32> -> vector<2x8xf32>
    %c0_44 = arith.constant 0 : index
    %c0_45 = arith.constant 0 : index
    %105 = vector.load %arg12[%c0_44, %c0_45] : memref<1x8xf32, #tpu.memory_space<vmem>>, vector<1x8xf32>
    %106 = vector.broadcast %105 : vector<1x8xf32> to vector<2x8xf32>
    %107 = arith.addf %104, %106 : vector<2x8xf32>
    %c0_46 = arith.constant 0 : index
    %c0_47 = arith.constant 0 : index
    %108 = vector.load %arg13[%c0_46, %c0_47] : memref<2x8xf32, #tpu.memory_space<vmem>>, vector<2x8xf32>
    tpu.vector_store %arg13[%c0_46, %c0_47], %107 {strides = array<i32>} : memref<2x8xf32, #tpu.memory_space<vmem>>, vector<2x8xf32>,
    return
  }
}

</mosaic_0001>

<bundles_post_ra>
// kernel: cnn_forward.1
= control target key start
LH: loop header
LB: loop body
LE: loop exit
PB: predicated region body
PF: predicated region fallthrough
CT: control target
= control target key end

     0   :  { %vm179_vm0 = vcmask 1046528   ;;  %vm116_vm1 = vsmask.f32 7424  ;;  %vm194_vm2 = vsmask.f32 6400  ;;  %vm225_vm3 = vcmask 1045504   ;;  %s8843_s1 = inlined_call_operand.vmem [shape: bf16[1152,128], index: 1, kind: input, shape index: {}]   ;;  %s8844_s0 = inlined_call_operand.vmem [shape: f32[2,64,128], index: 0, kind: input, shape index: {}]   ;;  %s8845_s2 = inlined_call_operand.vmem [shape: f32[1,128], index: 2, kind: input, shape index: {}]   ;;  %s8846_s4 = inlined_call_operand.vmem [shape: f32[1,128], index: 4, kind: input, shape index: {}]   ;;  %s8847_s3 = inlined_call_operand.vmem [shape: f32[1,128], index: 3, kind: input, shape index: {}]   ;;  %s8848_s5 = inlined_call_operand.vmem [shape: bf16[1152,128], index: 5, kind: input, shape index: {}]   ;;  %s8849_s6 = inlined_call_operand.vmem [shape: f32[1,128], index: 6, kind: input, shape index: {}]   ;;  %s8850_s8 = inlined_call_operand.vmem [shape: f32[1,128], index: 8, kind: input, shape index: {}]   ;;  %s8851_s7 = inlined_call_operand.vmem [shape: f32[1,128], index: 7, kind: input, shape index: {}]   ;;  %s8852_s9 = inlined_call_operand.vmem [shape: bf16[896,128], index: 9, kind: input, shape index: {}]   ;;  %s8853_s10 = inlined_call_operand.vmem [shape: f32[1,128], index: 10, kind: input, shape index: {}]   ;;  %s8854_s12 = inlined_call_operand.vmem [shape: f32[1,8], index: 12, kind: input, shape index: {}]   ;;  %s8855_s11 = inlined_call_operand.vmem [shape: f32[512,8], index: 11, kind: input, shape index: {}]   ;;  %s8856_s13 = inlined_call_operand.vmem [shape: f32[2,8], index: 13, kind: output, shape index: {}]  }
   0x1   :  { %v5723_v0 = vld [vmem:[%s8843_s1 + $0x38] sm:$0xff]  ;;  %v5722_v4 = vld [vmem:[%s8843_s1 + $0x30] sm:$0xff]  ;;  %v5721_v8 = vld [vmem:[%s8843_s1 + $0x28] sm:$0xff]  ;;  %vm271_vm4 = vcmask 1044480   ;;  %vm240_vm5 = vsmask.f32 5376 }
   0x2   :  { %v5739_v1 = vld [vmem:[%s8843_s1 + $0xb8] sm:$0xff]  ;;  %1115 = vmatpush.bf16.msra.mxu0 %v5723_v0  ;;  %v5738_v5 = vld [vmem:[%s8843_s1 + $0xb0] sm:$0xff]  ;;  %v5737_v9 = vld [vmem:[%s8843_s1 + $0xa8] sm:$0xff]  ;;  %vm286_vm6 = vsmask.f32 4352  ;;  %vm1525_vm7 = vcmask 916480  }
   0x3   :  { %v5731_v2 = vld [vmem:[%s8843_s1 + $0x78] sm:$0xff]  ;;  %1203 = vmatpush.bf16.msra.mxu2 %v5739_v1  ;;  %v5730_v6 = vld [vmem:[%s8843_s1 + $0x70] sm:$0xff]  ;;  %v5729_v10 = vld [vmem:[%s8843_s1 + $0x68] sm:$0xff]  ;;  %vm1746_vm11 = vcmask 1041408   ;;  %vm2315_vm12 = vcmask 1041409   ;;  %vm2317_vm13 = vcmask 1042434  }
   0x4   :  { %v5747_v3 = vld [vmem:[%s8843_s1 + $0xf8] sm:$0xff]  ;;  %1159 = vmatpush.bf16.msra.mxu1 %v5731_v2  ;;  %v5746_v7 = vld [vmem:[%s8843_s1 + $0xf0] sm:$0xff]  ;;  %v5745_v11 = vld [vmem:[%s8843_s1 + $0xe8] sm:$0xff]  ;;  %vm2319_vm14 = vcmask 1043459   ;;  %vm2321_vm15 = vcmask 1044484  }
   0x5   :  { %1247 = vmatpush.bf16.msra.mxu3 %v5747_v3  ;;  %v5720_v12 = vld [vmem:[%s8843_s1 + $0x20] sm:$0xff]  ;;  %v45_v17 = vld [vmem:[%s8844_s0 + $0x8] sm:$0xff]  ;;  %v46_v19 = vld [vmem:[%s8844_s0 + $0x10] sm:$0xff] }
   0x6   :  { %1116 = vmatpush.bf16.msra.mxu0 %v5722_v4  ;;  %v5736_v13 = vld [vmem:[%s8843_s1 + $0xa0] sm:$0xff]  ;;  %v47_v20 = vld [vmem:[%s8844_s0 + $0x18] sm:$0xff]  ;;  %v61_v21 = vpack.c.bf16 %v45_v17, %v45_v17  ;;  %v62_v22 = vpack.c.bf16 %v46_v19, %v46_v19  ;;  %v5718_v34 = vld [vmem:[%s8843_s1 + $0x10] sm:$0xff] }
   0x7   :  { %1204 = vmatpush.bf16.msra.mxu2 %v5738_v5  ;;  %v5728_v14 = vld [vmem:[%s8843_s1 + $0x60] sm:$0xff]  ;;  %v63_v23 = vpack.c.bf16 %v47_v20, %v47_v20  ;;  %v5719_v25 = vld [vmem:[%s8843_s1 + $0x18] sm:$0xff]  ;;  %v5734_v35 = vld [vmem:[%s8843_s1 + $0x90] sm:$0xff] }
   0x8   :  { %1160 = vmatpush.bf16.msra.mxu1 %v5730_v6  ;;  %v5744_v15 = vld [vmem:[%s8843_s1 + $0xe0] sm:$0xff]  ;;  %v5735_v26 = vld [vmem:[%s8843_s1 + $0x98] sm:$0xff]  ;;  %v6068_v27 = vunpack.c.l.b16 %v61_v21  ;;  %v6070_v28 = vunpack.c.l.b16 %v62_v22  ;;  %v5726_v36 = vld [vmem:[%s8843_s1 + $0x50] sm:$0xff] }
   0x9   :  { %1248 = vmatpush.bf16.msra.mxu3 %v5746_v7  ;;  %v44_v16 = vld [vmem:[%s8844_s0] sm:$0xff]  ;;  %v6072_v29 = vunpack.c.l.b16 %v63_v23  ;;  %v5727_v30 = vld [vmem:[%s8843_s1 + $0x58] sm:$0xff]  ;;  %v5742_v37 = vld [vmem:[%s8843_s1 + $0xd0] sm:$0xff] }
   0xa   :  { %1117 = vmatpush.bf16.msra.mxu0 %v5721_v8  ;;  %v60_v18 = vpack.c.bf16 %v44_v16, %v44_v16  ;;  %v5743_v31 = vld [vmem:[%s8843_s1 + $0xd8] sm:$0xff]  ;;  %v48_v39 = vld [vmem:[%s8844_s0 + $0x20] sm:$0xff]  ;;  %v49_v43 = vld [vmem:[%s8844_s0 + $0x28] sm:$0xff] }
   0xb   :  { %1205 = vmatpush.bf16.msra.mxu2 %v5737_v9  ;;  %v6085_v33 = vpack.c.b16 %v6072_v29, %v6070_v28  ;;  %v5717_v44 = vld [vmem:[%s8843_s1 + $0x8] sm:$0xff]  ;;  %v64_v47 = vpack.c.bf16 %v48_v39, %v48_v39  ;;  %v65_v48 = vpack.c.bf16 %v49_v43, %v49_v43  ;;  %v5716_v55 = vld [vmem:[%s8843_s1] sm:$0xff]  ;;  %v50_v9 = vld [vmem:[%s8844_s0 + $0x30] sm:$0xff] }
   0xc   :  { %1161 = vmatpush.bf16.msra.mxu1 %v5729_v10  ;;  %v90_v24 = vunpack.c.l.b16 %v60_v18  ;;  %v5733_v45 = vld [vmem:[%s8843_s1 + $0x88] sm:$0xff]  ;;  %v5732_v56 = vld [vmem:[%s8843_s1 + $0x80] sm:$0xff]  ;;  %v51_v10 = vld [vmem:[%s8844_s0 + $0x38] sm:$0xff] }
   0xd   :  { %1249 = vmatpush.bf16.msra.mxu3 %v5745_v11  ;;  %v6109_v41 = vshll.u32 %v6085_v33, 16  ;;  %v6112_v42 = vshrl.u32 %v6085_v33, 16  ;;  %v5725_v49 = vld [vmem:[%s8843_s1 + $0x48] sm:$0xff]  ;;  %v181_v58 = vrot.slane %v6085_v33, 1  ;;  %v6142_v59 = vunpack.c.l.b16 %v64_v47  ;;  %v5724_v61 = vld [vmem:[%s8843_s1 + $0x40] sm:$0xff]  ;;  %v54_v23 = vld [vmem:[%s8844_s0 + $0x50] sm:$0xff] }
   0xe   :  { %1118 = vmatpush.bf16.msra.mxu0 %v5720_v12  ;;  %v6081_v32 = vpack.c.b16 %v6068_v27, %v90_v24  ;;  %v5741_v50 = vld [vmem:[%s8843_s1 + $0xc8] sm:$0xff]  ;;  %v6144_v60 = vunpack.c.l.b16 %v65_v48  ;;  %v5740_v62 = vld [vmem:[%s8843_s1 + $0xc0] sm:$0xff]  ;;  %v66_v11 = vpack.c.bf16 %v50_v9, %v50_v9  ;;  %v67_v12 = vpack.c.bf16 %v51_v10, %v51_v10  ;;  %v55_v24 = vld [vmem:[%s8844_s0 + $0x58] sm:$0xff] }
   0xf   :  { %1206 = vmatpush.bf16.msra.mxu2 %v5736_v13  ;;  %v198_v53 = vrot.slane %v6112_v42, 1  ;;  %v199_v54 = vrot.slane %v6109_v41, 2  ;;  %v127_v0 = vrot.slane %v6109_v41, 1  ;;  %v52_v21 = vld [vmem:[%s8844_s0 + $0x40] sm:$0xff]  ;;  %v53_v22 = vld [vmem:[%s8844_s0 + $0x48] sm:$0xff] }
  0x10   :  { %1162 = vmatpush.bf16.msra.mxu1 %v5728_v14  ;;  %v6100_v38 = vshll.u32 %v6081_v32, 16  ;;  %v6106_v40 = vshrl.u32 %v6081_v32, 16  ;;  %v180_v57 = vrot.slane %v6081_v32, 1  ;;  %v6159_v6 = vpack.c.b16 %v6144_v60, %v6142_v59 }
  0x11   :  { %1250 = vmatpush.bf16.msra.mxu3 %v5744_v15  ;;  %v200_v2 = vor.u32 %v199_v54, %v198_v53  ;;  %v6177_v16 = vunpack.c.l.b16 %v66_v11  ;;  %v6179_v17 = vunpack.c.l.b16 %v67_v12  ;;  %v131_v18 = vor.u32 %v6112_v42, %v127_v0 }
  0x12   :  { %1119 = vmatpush.bf16.msra.mxu0 %v5719_v25  ;;  %v122_v46 = vrot.slane %v6100_v38, 1  ;;  %v195_v51 = vrot.slane %v6106_v40, 1  ;;  %v196_v52 = vrot.slane %v6100_v38, 2  ;;  %v182_v3 = vsel %vm179_vm0, %v180_v57, %v181_v58 }
  0x13   :  { %1207 = vmatpush.bf16.msra.mxu2 %v5735_v26  ;;  %v6163_v7 = vshll.u32 %v6159_v6, 16  ;;  %v6166_v8 = vshrl.u32 %v6159_v6, 16  ;;  %v183_v15 = vrot.slane %v6159_v6, 1  ;;  %v6198_v26 = vpack.c.b16 %v6179_v17, %v6177_v16 }
  0x14   :  { %1163 = vmatpush.bf16.msra.mxu1 %v5727_v30  ;;  %v123_v63 = vor.u32 %v122_v46, %v6106_v40  ;;  %v197_v1 = vor.u32 %v196_v52, %v195_v51  ;;  %v68_v30 = vpack.c.bf16 %v52_v21, %v52_v21 }
  0x15   :  { %1251 = vmatpush.bf16.msra.mxu3 %v5743_v31  ;;  %v202_v13 = vrot.slane %v6166_v8, 1  ;;  %v203_v14 = vrot.slane %v6163_v7, 2  ;;  %v135_v19 = vrot.slane %v6163_v7, 1  ;;  %v184_v25 = vsel %vm179_vm0, %v181_v58, %v183_v15 }
  0x16   :  { %1120 = vmatpush.bf16.msra.mxu0 %v5718_v34  ;;  %v128_v4 = vsel %vm116_vm1, %v123_v63, %v127_v0  ;;  %v201_v5 = vsel %vm194_vm2, %v197_v1, %v200_v2  ;;  %v69_v31 = vpack.c.bf16 %v53_v22, %v53_v22  ;;  %v6204_v39 = vshll.u32 %v6198_v26, 16  ;;  %v57_v63 = vld [vmem:[%s8844_s0 + $0x68] sm:$0xff] }
  0x17   :  { %1208 = vmatpush.bf16.msra.mxu2 %v5734_v35  ;;  %v204_v20 = vor.u32 %v203_v14, %v202_v13  ;;  %v136_v34 = vsel %vm116_vm1, %v131_v18, %v135_v19  ;;  %v6207_v43 = vshrl.u32 %v6198_v26, 16  ;;  %v185_v52 = vrot.slane %v6198_v26, 1 }
  0x18   :  { %1164 = vmatpush.bf16.msra.mxu1 %v5726_v36  ;;  %v70_v36 = vpack.c.bf16 %v54_v23, %v54_v23  ;;  %v139_v53 = vor.u32 %v6166_v8, %v135_v19  ;;  %v143_v54 = vrot.slane %v6204_v39, 1  ;;  %v73_v12 = vpack.c.bf16 %v57_v63, %v57_v63 }
  0x19   :  { %1252 = vmatpush.bf16.msra.mxu3 %v5742_v37  ;;  %v205_v35 = vsel %vm194_vm2, %v200_v2, %v204_v20  ;;  %v71_v37 = vpack.c.bf16 %v55_v24, %v55_v24  ;;  %v206_v48 = vrot.slane %v6207_v43, 1  ;;  %v186_v0 = vsel %vm179_vm0, %v183_v15, %v185_v52 }
  0x1a   :  { %1121 = vmatpush.bf16.msra.mxu0 %v5717_v44  ;;  %v6209_v44 = vunpack.c.l.b16 %v68_v30  ;;  %v6213_v46 = vunpack.c.l.b16 %v70_v36  ;;  %v144_v1 = vsel %vm116_vm1, %v139_v53, %v143_v54  ;;  %v6263_v22 = vunpack.c.l.b16 %v73_v12  ;;  %v5763_v12 = vld [vmem:[%s8843_s1 + $0x178] sm:$0xff] }
  0x1b   :  { %1209 = vmatpush.bf16.msra.mxu2 %v5733_v45  ;;  %v6211_v45 = vunpack.c.l.b16 %v69_v31  ;;  %v6215_v47 = vunpack.c.l.b16 %v71_v37  ;;  %v147_v24 = vor.u32 %v6207_v43, %v143_v54 }
  0x1c   :  { %1165 = vmatpush.bf16.msra.mxu1 %v5725_v49  ;;  %v207_v49 = vrot.slane %v6204_v39, 2  ;;  %v587_v63 = vpack.c.b16 %v6209_v44, %v6177_v16 }
  0x1d   :  { %1253 = vmatpush.bf16.msra.mxu3 %v5741_v50  ;;  %v6221_v50 = vpack.c.b16 %v6211_v45, %v6209_v44  ;;  %v6225_v51 = vpack.c.b16 %v6215_v47, %v6213_v46  ;;  %v359_v36 = vunpack.c.l.b16 %v147_v24 }
  0x1e   :  { %1122 = vmatpush.bf16.msra.mxu0 %v5716_v55  ;;  %v208_v55 = vor.u32 %v207_v49, %v206_v48 }
  0x1f   :  { %1210 = vmatpush.bf16.msra.mxu2 %v5732_v56  ;;  %v6231_v56 = vshll.u32 %v6221_v50, 16  ;;  %v6234_v57 = vshrl.u32 %v6221_v50, 16  ;;  %v6237_v58 = vshll.u32 %v6225_v51, 16  ;;  %v187_v13 = vrot.slane %v6221_v50, 1 }
  0x20   :  { %1166 = vmatpush.bf16.msra.mxu1 %v5724_v61  ;;  %v6240_v61 = vshrl.u32 %v6225_v51, 16  ;;  %v209_v2 = vsel %vm194_vm2, %v204_v20, %v208_v55  ;;  %v188_v14 = vrot.slane %v6225_v51, 1  ;;  %v361_v48 = vunpack.c.l.b16 %v208_v55 }
  0x21   :  { %1254 = vmatpush.bf16.msra.mxu3 %v5740_v62  ;;  %1123 = vmatmul.bf16.vlgmr.msra.gmra.mxu0 %v6081_v32  ;;  %v56_v62 = vld [vmem:[%s8844_s0 + $0x60] sm:$0xff]  ;;  %v214_v10 = vrot.slane %v6237_v58, 2  ;;  %v158_v18 = vrot.slane %v6237_v58, 1 }
  0x22   :  { %1211 = vmatmul.bf16.vlgmr.msra.gmra.mxu2 %v182_v3  ;;  %v153_v3 = vrot.slane %v6231_v56, 1  ;;  %v213_v9 = vrot.slane %v6240_v61, 1  ;;  %v72_v11 = vpack.c.bf16 %v56_v62, %v56_v62  ;;  %v6266_v23 = vsel %vm179_vm0, %v187_v13, %v188_v14  ;;  %v58_v62 = vld [vmem:[%s8844_s0 + $0x70] sm:$0xff]  ;;  %v5779_v13 = vld [vmem:[%s8843_s1 + $0x1f8] sm:$0xff] }
  0x23   :  { %1167 = vmatmul.bf16.vlgmr.msra.gmra.mxu1 %v128_v4  ;;  %v210_v4 = vrot.slane %v6234_v57, 1 }
  0x24   :  { %1255 = vmatmul.bf16.vlgmr.msra.gmra.mxu3 %v201_v5  ;;  %v211_v5 = vrot.slane %v6231_v56, 2  ;;  %v154_v15 = vor.u32 %v153_v3, %v6234_v57  ;;  %v215_v20 = vor.u32 %v214_v10, %v213_v9  ;;  %v6261_v21 = vunpack.c.l.b16 %v72_v11  ;;  %v5755_v9 = vld [vmem:[%s8843_s1 + $0x138] sm:$0xff]  ;;  %1335 = vmatpush.bf16.msrb.mxu1 %v5763_v12 }
  0x25   :  { %v5771_v10 = vld [vmem:[%s8843_s1 + $0x1b8] sm:$0xff]  ;;  %v162_v11 = vor.u32 %v6240_v61, %v158_v18  ;;  %1291 = vmatpush.bf16.msrb.mxu0 %v5755_v9  ;;  %1423 = vmatpush.bf16.msrb.mxu3 %v5779_v13  ;;  %v596_v12 = vpack.c.b16 %v6213_v46, %v6211_v45 }
  0x26   :  { %v212_v19 = vor.u32 %v211_v5, %v210_v4  ;;  %v6277_v31 = vpack.c.b16 %v6263_v22, %v6261_v21  ;;  %v74_v4 = vpack.c.bf16 %v58_v62, %v58_v62  ;;  %1379 = vmatpush.bf16.msrb.mxu2 %v5771_v10 }
  0x28   :  { %v6273_v30 = vsel %vm194_vm2, %v212_v19, %v215_v20  ;;  %v6283_v53 = vshll.u32 %v6277_v31, 16  ;;  %v6286_v54 = vshrl.u32 %v6277_v31, 16  ;;  %v190_v44 = vrot.slane %v6277_v31, 1 }
  0x29   :  { %v368_v49 = vunpack.c.l.b16 %v6273_v30  ;;  %v6315_v24 = vunpack.c.l.b16 %v74_v4  ;;  %v375_v4 = vunpack.c.h.b16 %v6273_v30  ;;  %v5760_v30 = vld [vmem:[%s8843_s1 + $0x160] sm:$0xff] }
  0x2a   :  { %v218_v3 = vrot.slane %v6283_v53, 2 }
  0x31   :  { %1128 = vmatmul.bf16.gmra.mxu0 %v6085_v33 }
  0x32   :  { %1216 = vmatmul.bf16.gmra.mxu2 %v184_v25  ;;  %v6270_v25 = vsel %vm116_vm1, %v154_v15, %v158_v18  ;;  %v166_v15 = vrot.slane %v6283_v53, 1  ;;  %v5754_v18 = vld [vmem:[%s8843_s1 + $0x130] sm:$0xff] }
  0x33   :  { %1172 = vmatmul.bf16.gmra.mxu1 %v136_v34  ;;  %v360_v34 = vunpack.c.l.b16 %v185_v52  ;;  %v366_v37 = vunpack.c.l.b16 %v6270_v25  ;;  %v59_v52 = vld [vmem:[%s8844_s0 + $0x78] sm:$0xff]  ;;  %1292 = vmatpush.bf16.msrb.mxu0 %v5754_v18 }
  0x34   :  { %1260 = vmatmul.bf16.gmra.mxu3 %v205_v35  ;;  %v367_v35 = vunpack.c.l.b16 %v6266_v23  ;;  %v75_v5 = vpack.c.bf16 %v59_v52, %v59_v52 }
  0x36   :  { %v589_v55 = vpack.c.b16 %v367_v35, %v360_v34  ;;  %v107_v34 = vunpack.c.l.b16 %v75_v5  ;;  %v5770_v35 = vld [vmem:[%s8843_s1 + $0x1b0] sm:$0xff] }
  0x37   :  { %1380 = vmatpush.bf16.msrb.mxu2 %v5770_v35 }
  0x38   :  { %v6342_v52 = vpack.c.b16 %v107_v34, %v6315_v24 }
  0x3a   :  { %v6363_v9 = vshll.u32 %v6342_v52, 16  ;;  %v6366_v10 = vshrl.u32 %v6342_v52, 16  ;;  %v192_v46 = vrot.slane %v6342_v52, 1 }
  0x3c   :  { %v221_v35 = vrot.slane %v6366_v10, 1 }
  0x41   :  { %1133 = vmatmul.bf16.gmra.mxu0 %v6159_v6 }
  0x42   :  { %1221 = vmatmul.bf16.gmra.mxu2 %v186_v0  ;;  %v588_v0 = vpack.c.b16 %v366_v37, %v359_v36  ;;  %v5762_v36 = vld [vmem:[%s8843_s1 + $0x170] sm:$0xff] }
  0x43   :  { %1177 = vmatmul.bf16.gmra.mxu1 %v144_v1  ;;  %v590_v1 = vpack.c.b16 %v368_v49, %v361_v48  ;;  %v5778_v37 = vld [vmem:[%s8843_s1 + $0x1f0] sm:$0xff]  ;;  %v6332_v48 = vsel %vm179_vm0, %v188_v14, %v190_v44  ;;  %v6335_v49 = vsel %vm116_vm1, %v162_v11, %v166_v15  ;;  %v5769_v14 = vld [vmem:[%s8843_s1 + $0x1a8] sm:$0xff]  ;;  %v5776_v11 = vld [vmem:[%s8843_s1 + $0x1e0] sm:$0xff] }
  0x44   :  { %1265 = vmatmul.bf16.gmra.mxu3 %v209_v2  ;;  %v217_v2 = vrot.slane %v6286_v54, 1  ;;  %1336 = vmatpush.bf16.msrb.mxu1 %v5762_v36  ;;  %v222_v36 = vrot.slane %v6363_v9, 2 }
  0x45   :  { %1424 = vmatpush.bf16.msrb.mxu3 %v5778_v37  ;;  %1381 = vmatpush.bf16.msrb.mxu2 %v5769_v14  ;;  %v5751_v37 = vld [vmem:[%s8843_s1 + $0x118] sm:$0xff] }
  0x46   :  { %v6313_v19 = vor.u32 %v218_v3, %v217_v2  ;;  %v373_v2 = vunpack.c.h.b16 %v6270_v25  ;;  %v380_v3 = vunpack.c.l.b16 %v6335_v49  ;;  %v5768_v25 = vld [vmem:[%s8843_s1 + $0x1a0] sm:$0xff]  ;;  %v5759_v14 = vld [vmem:[%s8843_s1 + $0x158] sm:$0xff] }
  0x48   :  { %v6339_v62 = vsel %vm194_vm2, %v215_v20, %v6313_v19  ;;  %v5761_v20 = vld [vmem:[%s8843_s1 + $0x168] sm:$0xff]  ;;  %v597_v34 = vpack.c.b16 %v380_v3, %v373_v2  ;;  %v5750_v2 = vld [vmem:[%s8843_s1 + $0x110] sm:$0xff] }
  0x49   :  { %v382_v5 = vunpack.c.l.b16 %v6339_v62  ;;  %1337 = vmatpush.bf16.msrb.mxu1 %v5761_v20  ;;  %1382 = vmatpush.bf16.msrb.mxu2 %v5768_v25  ;;  %v5775_v20 = vld [vmem:[%s8843_s1 + $0x1d8] sm:$0xff]  ;;  %v5766_v3 = vld [vmem:[%s8843_s1 + $0x190] sm:$0xff] }
  0x4b   :  { %v599_v18 = vpack.c.b16 %v382_v5, %v375_v4  ;;  %v5758_v4 = vld [vmem:[%s8843_s1 + $0x150] sm:$0xff]  ;;  %v193_v5 = vsel %vm179_vm0, %v190_v44, %v192_v46  ;;  %v5757_v44 = vld [vmem:[%s8843_s1 + $0x148] sm:$0xff]  ;;  %vm2323_vm0 = vcmask 1045509  }
  0x4d   :  { %1338 = vmatpush.bf16.msrb.mxu1 %v5760_v30  ;;  %v5749_v30 = vld [vmem:[%s8843_s1 + $0x108] sm:$0xff] }
  0x51   :  { %1138 = vmatmul.bf16.gmra.mxu0 %v587_v63  ;;  %v5753_v63 = vld [vmem:[%s8843_s1 + $0x128] sm:$0xff]  ;;  %1339 = vmatpush.bf16.msrb.mxu1 %v5759_v14 }
  0x52   :  { %1226 = vmatmul.bf16.gmra.mxu2 %v589_v55  ;;  %v5777_v55 = vld [vmem:[%s8843_s1 + $0x1e8] sm:$0xff]  ;;  %1293 = vmatpush.bf16.msrb.mxu0 %v5753_v63  ;;  %v5767_v63 = vld [vmem:[%s8843_s1 + $0x198] sm:$0xff] }
  0x53   :  { %1182 = vmatmul.bf16.gmra.mxu1 %v588_v0  ;;  %v374_v0 = vunpack.c.h.b16 %v6266_v23  ;;  %v5752_v23 = vld [vmem:[%s8843_s1 + $0x120] sm:$0xff]  ;;  %1425 = vmatpush.bf16.msrb.mxu3 %v5777_v55  ;;  %v170_v55 = vor.u32 %v6286_v54, %v166_v15  ;;  %v5774_v15 = vld [vmem:[%s8843_s1 + $0x1d0] sm:$0xff] }
  0x54   :  { %1270 = vmatmul.bf16.gmra.mxu3 %v590_v1  ;;  %v381_v1 = vunpack.c.l.b16 %v6332_v48  ;;  %1383 = vmatpush.bf16.msrb.mxu2 %v5767_v63  ;;  %v5764_v63 = vld [vmem:[%s8843_s1 + $0x180] sm:$0xff] }
  0x55   :  { %1340 = vmatpush.bf16.msrb.mxu1 %v5758_v4  ;;  %v409_v4 = vunpack.c.l.b16 %v192_v46  ;;  %v244_v46 = vrot.slane %v6112_v42, 2 }
  0x56   :  { %v598_v13 = vpack.c.b16 %v381_v1, %v374_v0  ;;  %1294 = vmatpush.bf16.msrb.mxu0 %v5752_v23  ;;  %v174_v0 = vrot.slane %v6363_v9, 1  ;;  %v223_v1 = vor.u32 %v222_v36, %v221_v35  ;;  %v389_v35 = vunpack.c.h.b16 %v6339_v62 }
  0x57   :  { %1426 = vmatpush.bf16.msrb.mxu3 %v5776_v11  ;;  %v5765_v11 = vld [vmem:[%s8843_s1 + $0x188] sm:$0xff]  ;;  %v604_v62 = vpack.c.b16 %v6261_v21, %v6215_v47  ;;  %v612_v47 = vpack.c.b16 %v6315_v24, %v6263_v22  ;;  %v290_v22 = vrot.slane %v6112_v42, 3  ;;  %v291_v24 = vrot.slane %v6109_v41, 4 }
  0x58   :  { %v175_v23 = vsel %vm116_vm1, %v170_v55, %v174_v0  ;;  %v224_v25 = vsel %vm194_vm2, %v6313_v19, %v223_v1  ;;  %1384 = vmatpush.bf16.msrb.mxu2 %v5766_v3  ;;  %v5773_v19 = vld [vmem:[%s8843_s1 + $0x1c8] sm:$0xff]  ;;  %v402_v3 = vunpack.c.h.b16 %v193_v5  ;;  %vm2325_vm1 = vcmask 1046534  }
  0x59   :  { %v396_v36 = vunpack.c.l.b16 %v224_v25  ;;  %1341 = vmatpush.bf16.msrb.mxu1 %v5757_v44  ;;  %v410_v44 = vunpack.c.l.b16 %v223_v1  ;;  %v287_v1 = vrot.slane %v6106_v40, 3  ;;  %vm2327_vm2 = vcmask 1047559  }
  0x5a   :  { %1295 = vmatpush.bf16.msrb.mxu0 %v5751_v37  ;;  %v5748_v37 = vld [vmem:[%s8843_s1 + $0x100] sm:$0xff]  ;;  %v614_v21 = vpack.c.b16 %v409_v4, %v402_v3 }
  0x5b   :  { %1427 = vmatpush.bf16.msrb.mxu3 %v5775_v20  ;;  %v607_v55 = vpack.c.b16 %v396_v36, %v389_v35  ;;  %v273_v35 = vrot.slane %v6085_v33, 3 }
  0x5c   :  { %1385 = vmatpush.bf16.msrb.mxu2 %v5765_v11  ;;  %v403_v11 = vunpack.c.h.b16 %v224_v25  ;;  %v226_v25 = vrot.slane %v6081_v32, 2 }
  0x5e   :  { %1296 = vmatpush.bf16.msrb.mxu0 %v5750_v2  ;;  %v178_v2 = vor.u32 %v6366_v10, %v174_v0  ;;  %v242_v0 = vrot.slane %v6100_v38, 3 }
  0x5f   :  { %1428 = vmatpush.bf16.msrb.mxu3 %v5774_v15  ;;  %v401_v15 = vunpack.c.h.b16 %v175_v23 }
  0x60   :  { %1386 = vmatpush.bf16.msrb.mxu2 %v5764_v63 }
  0x61   :  { %1143 = vmatmul.bf16.gmra.mxu0 %v596_v12  ;;  %v388_v12 = vunpack.c.h.b16 %v6332_v48  ;;  %v5756_v48 = vld [vmem:[%s8843_s1 + $0x140] sm:$0xff] }
  0x62   :  { %1231 = vmatmul.bf16.gmra.mxu2 %v598_v13  ;;  %v395_v13 = vunpack.c.l.b16 %v193_v5  ;;  %1297 = vmatpush.bf16.msrb.mxu0 %v5749_v30  ;;  %v408_v30 = vunpack.c.l.b16 %v178_v2  ;;  %v245_v5 = vrot.slane %v6109_v41, 3 }
  0x63   :  { %1187 = vmatmul.bf16.gmra.mxu1 %v597_v34  ;;  %v387_v34 = vunpack.c.h.b16 %v6335_v49  ;;  %1429 = vmatpush.bf16.msrb.mxu3 %v5773_v19  ;;  %v5772_v49 = vld [vmem:[%s8843_s1 + $0x1c0] sm:$0xff] }
  0x64   :  { %1275 = vmatmul.bf16.gmra.mxu3 %v599_v18  ;;  %v394_v18 = vunpack.c.l.b16 %v175_v23  ;;  %v606_v14 = vpack.c.b16 %v395_v13, %v388_v12  ;;  %1342 = vmatpush.bf16.msrb.mxu1 %v5756_v48  ;;  %v613_v19 = vpack.c.b16 %v408_v30, %v401_v15  ;;  %v615_v12 = vpack.c.b16 %v410_v44, %v403_v11 }
  0x65   :  { %v241_v13 = vrot.slane %v6106_v40, 2  ;;  %v288_v23 = vrot.slane %v6100_v38, 4  ;;  %v292_v40 = vor.u32 %v291_v24, %v290_v22  ;;  %v231_v24 = vrot.slane %v6198_v26, 2 }
  0x66   :  { %v605_v20 = vpack.c.b16 %v394_v18, %v387_v34  ;;  %1298 = vmatpush.bf16.msrb.mxu0 %v5748_v37  ;;  %v227_v34 = vrot.slane %v6085_v33, 2  ;;  %v272_v18 = vrot.slane %v6081_v32, 3  ;;  %v246_v37 = vor.u32 %v245_v5, %v244_v46 }
  0x67   :  { %1430 = vmatpush.bf16.msrb.mxu3 %v5772_v49  ;;  %v243_v36 = vor.u32 %v242_v0, %v241_v13  ;;  %v289_v63 = vor.u32 %v288_v23, %v287_v1  ;;  %v248_v32 = vrot.slane %v6166_v8, 2  ;;  %v249_v33 = vrot.slane %v6163_v7, 3 }
  0x68   :  { %v228_v38 = vsel %vm225_vm3, %v226_v25, %v227_v34  ;;  %v274_v41 = vsel %vm271_vm4, %v272_v18, %v273_v35  ;;  %v294_v49 = vrot.slane %v6166_v8, 3  ;;  %v298_v0 = vrot.slane %v6207_v43, 3 }
  0x69   :  { %v247_v42 = vsel %vm240_vm5, %v243_v36, %v246_v37  ;;  %v293_v48 = vsel %vm286_vm6, %v289_v63, %v292_v40  ;;  %v250_v2 = vor.u32 %v249_v33, %v248_v32  ;;  %v299_v46 = vrot.slane %v6204_v39, 4 }
  0x6a   :  { %v277_v25 = vrot.slane %v6198_v26, 3  ;;  %v259_v26 = vrot.slane %v6240_v61, 2  ;;  %v260_v32 = vrot.slane %v6237_v58, 3  ;;  %v302_v33 = vrot.slane %v6234_v57, 3 }
  0x71   :  { %1148 = vmatmul.bf16.gmra.mxu0 %v604_v62  ;;  %v295_v62 = vrot.slane %v6163_v7, 4  ;;  %v251_v7 = vsel %vm240_vm5, %v246_v37, %v250_v2 }
  0x72   :  { %1236 = vmatmul.bf16.gmra.mxu2 %v606_v14  ;;  %v229_v14 = vrot.slane %v6159_v6, 2 }
  0x73   :  { %1192 = vmatmul.bf16.gmra.mxu1 %v605_v20  ;;  %v275_v20 = vrot.slane %v6159_v6, 3  ;;  %v296_v3 = vor.u32 %v295_v62, %v294_v49  ;;  %v303_v49 = vrot.slane %v6231_v56, 4 }
  0x74   :  { %1280 = vmatmul.bf16.gmra.mxu3 %v607_v55  ;;  %v6474_v55 = vld [vmem:[%s8845_s2] ss:$0 sm:$0xff]  ;;  %v230_v15 = vsel %vm225_vm3, %v227_v34, %v229_v14  ;;  %v232_v37 = vsel %vm225_vm3, %v229_v14, %v231_v24 }
  0x75   :  { %v276_v30 = vsel %vm271_vm4, %v273_v35, %v275_v20  ;;  %v297_v44 = vsel %vm286_vm6, %v292_v40, %v296_v3  ;;  %v300_v35 = vor.u32 %v299_v46, %v298_v0 }
  0x81   :  { %1153 = vmatmul.bf16.gmra.mxu0 %v612_v47 }
  0x82   :  { %1241 = vmatmul.bf16.gmra.mxu2 %v614_v21  ;;  %v252_v21 = vrot.slane %v6207_v43, 2  ;;  %v278_v43 = vsel %vm271_vm4, %v275_v20, %v277_v25 }
  0x83   :  { %1197 = vmatmul.bf16.gmra.mxu1 %v613_v19  ;;  %v253_v19 = vrot.slane %v6204_v39, 3 }
  0x84   :  { %1285 = vmatmul.bf16.gmra.mxu3 %v615_v12 }
  0x85   :  { %v254_v34 = vor.u32 %v253_v19, %v252_v21 }
  0x87   :  { %v255_v39 = vsel %vm240_vm5, %v250_v2, %v254_v34  ;;  %v305_v2 = vrot.slane %v6240_v61, 3 }
  0x91   :  { %1299 = vmatmul.bf16.vlgmr.msrb.gmra.mxu0 %v228_v38  ;;  %v301_v38 = vsel %vm286_vm6, %v296_v3, %v300_v35  ;;  %v306_v3 = vrot.slane %v6237_v58, 4 }
  0x92   :  { %1387 = vmatmul.bf16.vlgmr.msrb.gmra.mxu2 %v274_v41  ;;  %v256_v41 = vrot.slane %v6234_v57, 2  ;;  %v234_v57 = vrot.slane %v6225_v51, 2 }
  0x93   :  { %1343 = vmatmul.bf16.vlgmr.msrb.gmra.mxu1 %v247_v42  ;;  %v257_v42 = vrot.slane %v6231_v56, 3  ;;  %v279_v56 = vrot.slane %v6221_v50, 3 }
  0x94   :  { %1431 = vmatmul.bf16.vlgmr.msrb.gmra.mxu3 %v293_v48 }
  0x9e   :  { %v1124_v4 = vpop.f32.mrf.mxu0 }
  0x9f   :  { %v1125_v8 = vadd.f32 %v6474_v55, %v1124_v4 }
  0xa0   :  { %v1168_v11 = vpop.f32.mrf.mxu1 }
  0xa1   :  { %v1169_v6 = vadd.f32 %v1168_v11, %v1125_v8  ;;  %1304 = vmatmul.bf16.gmra.mxu0 %v230_v15  ;;  %v233_v15 = vrot.slane %v6221_v50, 2  ;;  %v258_v8 = vor.u32 %v257_v42, %v256_v41  ;;  %v261_v11 = vor.u32 %v260_v32, %v259_v26 }
  0xa2   :  { %1392 = vmatmul.bf16.gmra.mxu2 %v276_v30  ;;  %v280_v30 = vrot.slane %v6225_v51, 3 }
  0xa3   :  { %1348 = vmatmul.bf16.gmra.mxu1 %v251_v7  ;;  %v304_v7 = vor.u32 %v303_v49, %v302_v33  ;;  %v6510_v21 = vsel %vm225_vm3, %v233_v15, %v234_v57  ;;  %v6519_v0 = vsel %vm240_vm5, %v258_v8, %v261_v11  ;;  %v263_v33 = vrot.slane %v6286_v54, 2 }
  0xa4   :  { %1436 = vmatmul.bf16.gmra.mxu3 %v297_v44  ;;  %v307_v44 = vor.u32 %v306_v3, %v305_v2  ;;  %v6513_v19 = vsel %vm271_vm4, %v279_v56, %v280_v30  ;;  %v5787_v2 = vld [vmem:[%s8843_s1 + $0x238] sm:$0xff]  ;;  %v236_v3 = vrot.slane %v6277_v31, 2 }
  0xa5   :  { %v1212_v47 = vpop.f32.mrf.mxu2  ;;  %1467 = vmatpush.bf16.msra.mxu0 %v5787_v2 }
  0xa6   :  { %v1213_v12 = vadd.f32 %v1212_v47, %v1169_v6  ;;  %v1126_v5 = vpop.f32.mrf.mxu0  ;;  %v6522_v46 = vsel %vm286_vm6, %v304_v7, %v307_v44 }
  0xa7   :  { %v1256_v13 = vpop.f32.mrf.mxu3  ;;  %v1127_v1 = vadd.f32 %v6474_v55, %v1126_v5  ;;  %v362_v5 = vunpack.c.l.b16 %v231_v24 }
  0xa8   :  { %v6486_v23 = vadd.f32 %v1256_v13, %v1213_v12  ;;  %v1170_v22 = vpop.f32.mrf.mxu1 }
  0xa9   :  { %v1171_v18 = vadd.f32 %v1170_v22, %v1127_v1  ;;  %v369_v22 = vunpack.c.l.b16 %v6510_v21 }
  0xab   :  { %v591_v42 = vpack.c.b16 %v369_v22, %v362_v5 }
  0xad   :  { %v1214_v36 = vpop.f32.mrf.mxu2 }
  0xae   :  { %v1215_v63 = vadd.f32 %v1214_v36, %v1171_v18  ;;  %v1129_v48 = vpop.f32.mrf.mxu0  ;;  %v364_v18 = vunpack.c.l.b16 %v277_v25  ;;  %v371_v36 = vunpack.c.l.b16 %v6513_v19  ;;  %v264_v25 = vrot.slane %v6283_v53, 3 }
  0xaf   :  { %v1258_v40 = vpop.f32.mrf.mxu3  ;;  %v1130_v62 = vadd.f32 %v6474_v55, %v1129_v48 }
  0xb0   :  { %v6501_v14 = vadd.f32 %v1258_v40, %v1215_v63  ;;  %v1173_v20 = vpop.f32.mrf.mxu1  ;;  %v372_v63 = vunpack.c.l.b16 %v6522_v46  ;;  %v593_v48 = vpack.c.b16 %v371_v36, %v364_v18  ;;  %v6540_v56 = vor.u32 %v264_v25, %v263_v33 }
  0xb1   :  { %v1174_v4 = vadd.f32 %v1173_v20, %v1130_v62  ;;  %1309 = vmatmul.bf16.gmra.mxu0 %v232_v37  ;;  %v363_v37 = vunpack.c.l.b16 %v254_v34  ;;  %v310_v20 = vrot.slane %v6283_v53, 4  ;;  %v5786_v53 = vld [vmem:[%s8843_s1 + $0x230] sm:$0xff]  ;;  %v268_v33 = vrot.slane %v6363_v9, 3 }
  0xb2   :  { %1397 = vmatmul.bf16.gmra.mxu2 %v278_v43  ;;  %v370_v43 = vunpack.c.l.b16 %v6519_v0  ;;  %1468 = vmatpush.bf16.msra.mxu0 %v5786_v53  ;;  %v313_v25 = vrot.slane %v6366_v10, 3 }
  0xb3   :  { %1353 = vmatmul.bf16.gmra.mxu1 %v255_v39  ;;  %v365_v39 = vunpack.c.l.b16 %v300_v35  ;;  %v309_v35 = vrot.slane %v6286_v54, 3 }
  0xb4   :  { %1441 = vmatmul.bf16.gmra.mxu3 %v301_v38  ;;  %v592_v32 = vpack.c.b16 %v370_v43, %v363_v37  ;;  %v378_v37 = vunpack.c.h.b16 %v6513_v19 }
  0xb5   :  { %v1217_v61 = vpop.f32.mrf.mxu2  ;;  %v594_v24 = vpack.c.b16 %v372_v63, %v365_v39  ;;  %v6542_v8 = vor.u32 %v310_v20, %v309_v35  ;;  %v238_v35 = vrot.slane %v6342_v52, 2  ;;  %v284_v20 = vrot.slane %v6342_v52, 3 }
  0xb6   :  { %v1218_v6 = vadd.f32 %v1217_v61, %v1174_v4  ;;  %v1131_v47 = vpop.f32.mrf.mxu0  ;;  %v282_v4 = vrot.slane %v6277_v31, 3 }
  0xb7   :  { %v1261_v58 = vpop.f32.mrf.mxu3  ;;  %v1132_v12 = vadd.f32 %v6474_v55, %v1131_v47  ;;  %v6566_v22 = vsel %vm286_vm6, %v307_v44, %v6542_v8  ;;  %v379_v44 = vunpack.c.h.b16 %v6522_v46 }
  0xb8   :  { %v6516_v13 = vadd.f32 %v1261_v58, %v1218_v6  ;;  %v1175_v50 = vpop.f32.mrf.mxu1  ;;  %v6550_v58 = vsel %vm225_vm3, %v234_v57, %v236_v3  ;;  %v6555_v47 = vsel %vm271_vm4, %v280_v30, %v282_v4  ;;  %v376_v57 = vunpack.c.h.b16 %v6510_v21  ;;  %v5785_v30 = vld [vmem:[%s8843_s1 + $0x228] sm:$0xff] }
  0xb9   :  { %v1176_v1 = vadd.f32 %v1175_v50, %v1132_v12  ;;  %v383_v36 = vunpack.c.l.b16 %v6550_v58  ;;  %v385_v43 = vunpack.c.l.b16 %v6555_v47  ;;  %v386_v63 = vunpack.c.l.b16 %v6566_v22  ;;  %1469 = vmatpush.bf16.msra.mxu0 %v5785_v30 }
  0xbb   :  { %v600_v19 = vpack.c.b16 %v383_v36, %v376_v57 }
  0xbd   :  { %v1219_v40 = vpop.f32.mrf.mxu2 }
  0xbe   :  { %v1220_v38 = vadd.f32 %v1219_v40, %v1176_v1  ;;  %v1134_v26 = vpop.f32.mrf.mxu0  ;;  %v6562_v1 = vsel %vm240_vm5, %v261_v11, %v6540_v56  ;;  %v377_v11 = vunpack.c.h.b16 %v6519_v0  ;;  %v5784_v40 = vld [vmem:[%s8843_s1 + $0x220] sm:$0xff] }
  0xbf   :  { %v1263_v41 = vpop.f32.mrf.mxu3  ;;  %v1135_v49 = vadd.f32 %v6474_v55, %v1134_v26  ;;  %v384_v39 = vunpack.c.l.b16 %v6562_v1  ;;  %v603_v26 = vpack.c.b16 %v386_v63, %v379_v44  ;;  %1470 = vmatpush.bf16.msra.mxu0 %v5784_v40  ;;  %v391_v44 = vunpack.c.h.b16 %v6562_v1 }
  0xc0   :  { %v6531_v34 = vadd.f32 %v1263_v41, %v1220_v38  ;;  %v1178_v62 = vpop.f32.mrf.mxu1 }
  0xc1   :  { %1314 = vmatmul.bf16.gmra.mxu0 %v591_v42  ;;  %v1179_v15 = vadd.f32 %v1178_v62, %v1135_v49  ;;  %v602_v42 = vpack.c.b16 %v385_v43, %v378_v37  ;;  %v601_v0 = vpack.c.b16 %v384_v39, %v377_v11  ;;  %v314_v49 = vrot.slane %v6363_v9, 4  ;;  %v5783_v62 = vld [vmem:[%s8843_s1 + $0x218] sm:$0xff] }
  0xc2   :  { %1402 = vmatmul.bf16.gmra.mxu2 %v593_v48  ;;  %v392_v37 = vunpack.c.h.b16 %v6555_v47 }
  0xc3   :  { %1358 = vmatmul.bf16.gmra.mxu1 %v592_v32  ;;  %v267_v32 = vrot.slane %v6366_v10, 2  ;;  %1471 = vmatpush.bf16.msra.mxu0 %v5783_v62  ;;  %v5782_v10 = vld [vmem:[%s8843_s1 + $0x210] sm:$0xff] }
  0xc4   :  { %1446 = vmatmul.bf16.gmra.mxu3 %v594_v24 }
  0xc5   :  { %v1222_v54 = vpop.f32.mrf.mxu2 }
  0xc6   :  { %v1223_v7 = vadd.f32 %v1222_v54, %v1179_v15  ;;  %v1136_v6 = vpop.f32.mrf.mxu0  ;;  %v6596_v15 = vor.u32 %v268_v33, %v267_v32  ;;  %v6598_v54 = vor.u32 %v314_v49, %v313_v25 }
  0xc7   :  { %v1266_v61 = vpop.f32.mrf.mxu3  ;;  %v1137_v12 = vadd.f32 %v6474_v55, %v1136_v6  ;;  %v239_v6 = vsel %vm225_vm3, %v236_v3, %v238_v35  ;;  %1472 = vmatpush.bf16.msra.mxu0 %v5782_v10  ;;  %v390_v3 = vunpack.c.h.b16 %v6550_v58  ;;  %v5780_v58 = vld [vmem:[%s8843_s1 + $0x200] sm:$0xff] }
  0xc8   :  { %v6558_v50 = vadd.f32 %v1266_v61, %v1223_v7  ;;  %v1180_v5 = vpop.f32.mrf.mxu1  ;;  %v316_v36 = vsel %vm286_vm6, %v6542_v8, %v6598_v54  ;;  %v397_v11 = vunpack.c.l.b16 %v239_v6  ;;  %vm2732_vm6 = vcmask 1043458  }
  0xc9   :  { %v1181_v18 = vadd.f32 %v1180_v5, %v1137_v12  ;;  %v285_v12 = vsel %vm271_vm4, %v282_v4, %v284_v20  ;;  %v5781_v4 = vld [vmem:[%s8843_s1 + $0x208] sm:$0xff]  ;;  %vm2719_vm4 = vcmask 1045508  }
  0xca   :  { %v399_v39 = vunpack.c.l.b16 %v285_v12  ;;  %v608_v47 = vpack.c.b16 %v397_v11, %v390_v3  ;;  %v407_v3 = vunpack.c.h.b16 %v316_v36 }
  0xcb   :  { %1473 = vmatpush.bf16.msra.mxu0 %v5781_v4  ;;  %v414_v4 = vunpack.c.l.b16 %v6598_v54 }
  0xcd   :  { %v1224_v21 = vpop.f32.mrf.mxu2 }
  0xce   :  { %v6582_v38 = vadd.f32 %v1224_v21, %v1181_v18  ;;  %v1139_v48 = vpop.f32.mrf.mxu0  ;;  %v270_v18 = vsel %vm240_vm5, %v6540_v56, %v6596_v15  ;;  %v393_v56 = vunpack.c.h.b16 %v6566_v22  ;;  %v400_v21 = vunpack.c.l.b16 %v316_v36 }
  0xcf   :  { %v6584_v41 = vpop.f32.mrf.mxu3  ;;  %v1140_v46 = vadd.f32 %v6474_v55, %v1139_v48  ;;  %v398_v63 = vunpack.c.l.b16 %v270_v18  ;;  %1474 = vmatpush.bf16.msra.mxu0 %v5780_v58  ;;  %vm2723_vm5 = vcmask 1043456  }
  0xd0   :  { %v1183_v24 = vpop.f32.mrf.mxu1 }
  0xd1   :  { %1319 = vmatmul.bf16.gmra.mxu0 %v600_v19  ;;  %v1184_v2 = vadd.f32 %v1183_v24, %v1140_v46 }
  0xd2   :  { %1407 = vmatmul.bf16.gmra.mxu2 %v602_v42  ;;  %v610_v42 = vpack.c.b16 %v399_v39, %v392_v37 }
  0xd3   :  { %1363 = vmatmul.bf16.gmra.mxu1 %v601_v0  ;;  %v609_v0 = vpack.c.b16 %v398_v63, %v391_v44 }
  0xd4   :  { %1451 = vmatmul.bf16.gmra.mxu3 %v603_v26  ;;  %v611_v26 = vpack.c.b16 %v400_v21, %v393_v56 }
  0xd5   :  { %v1227_v9 = vpop.f32.mrf.mxu2 }
  0xd6   :  { %v1228_v53 = vadd.f32 %v1227_v9, %v1184_v2  ;;  %v1141_v61 = vpop.f32.mrf.mxu0  ;;  %v404_v9 = vunpack.c.h.b16 %v239_v6  ;;  %v619_v6 = vpack.c.b16 %v414_v4, %v407_v3 }
  0xd7   :  { %v1271_v7 = vpop.f32.mrf.mxu3  ;;  %v1142_v5 = vadd.f32 %v6474_v55, %v1141_v61  ;;  %v413_v61 = vunpack.c.l.b16 %v284_v20 }
  0xd8   :  { %v6610_v57 = vadd.f32 %v1271_v7, %v1228_v53  ;;  %v1185_v30 = vpop.f32.mrf.mxu1  ;;  %v411_v53 = vunpack.c.l.b16 %v238_v35  ;;  %v406_v7 = vunpack.c.h.b16 %v285_v12 }
  0xd9   :  { %v1186_v43 = vadd.f32 %v1185_v30, %v1142_v5  ;;  %v405_v5 = vunpack.c.h.b16 %v270_v18  ;;  %v412_v30 = vunpack.c.l.b16 %v6596_v15 }
  0xda   :  { %v616_v39 = vpack.c.b16 %v411_v53, %v404_v9  ;;  %v618_v44 = vpack.c.b16 %v413_v61, %v406_v7 }
  0xdb   :  { %v617_v63 = vpack.c.b16 %v412_v30, %v405_v5 }
  0xdd   :  { %v1229_v8 = vpop.f32.mrf.mxu2 }
  0xde   :  { %v6628_v40 = vadd.f32 %v1229_v8, %v1186_v43  ;;  %v1144_v48 = vpop.f32.mrf.mxu0 }
  0xdf   :  { %v6630_v19 = vpop.f32.mrf.mxu3  ;;  %v1145_v1 = vadd.f32 %v6474_v55, %v1144_v48 }
  0xe0   :  { %v1188_v22 = vpop.f32.mrf.mxu1 }
  0xe1   :  { %1324 = vmatmul.bf16.gmra.mxu0 %v608_v47  ;;  %v1189_v32 = vadd.f32 %v1188_v22, %v1145_v1 }
  0xe2   :  { %1412 = vmatmul.bf16.gmra.mxu2 %v610_v42 }
  0xe3   :  { %1368 = vmatmul.bf16.gmra.mxu1 %v609_v0 }
  0xe4   :  { %1456 = vmatmul.bf16.gmra.mxu3 %v611_v26  ;;  %v570_v26 = vpack.c.b16 %v6070_v28, %v6068_v27  ;;  %v578_v28 = vpack.c.b16 %v6142_v59, %v6072_v29  ;;  %v586_v29 = vpack.c.b16 %v6177_v16, %v6144_v60  ;;  %v595_v60 = vpack.c.b16 %v6211_v45, %v6179_v17 }
  0xe5   :  { %v1232_v46 = vpop.f32.mrf.mxu2 }
  0xe6   :  { %v1233_v24 = vadd.f32 %v1232_v46, %v1189_v32  ;;  %v1146_v25 = vpop.f32.mrf.mxu0 }
  0xe7   :  { %v1276_v33 = vpop.f32.mrf.mxu3  ;;  %v1147_v49 = vadd.f32 %v6474_v55, %v1146_v25 }
  0xe8   :  { %v6634_v62 = vadd.f32 %v1276_v33, %v1233_v24  ;;  %v1190_v2 = vpop.f32.mrf.mxu1 }
  0xe9   :  { %v1191_v10 = vadd.f32 %v1190_v2, %v1147_v49 }
  0xed   :  { %v1234_v37 = vpop.f32.mrf.mxu2 }
  0xee   :  { %v6638_v43 = vadd.f32 %v1234_v37, %v1191_v10  ;;  %v1149_v56 = vpop.f32.mrf.mxu0 }
  0xef   :  { %v6640_v11 = vpop.f32.mrf.mxu3  ;;  %v1150_v35 = vadd.f32 %v6474_v55, %v1149_v56 }
  0xf0   :  { %v1193_v12 = vpop.f32.mrf.mxu1 }
  0xf1   :  { %1329 = vmatmul.bf16.gmra.mxu0 %v616_v39  ;;  %v1194_v20 = vadd.f32 %v1193_v12, %v1150_v35 }
  0xf2   :  { %1417 = vmatmul.bf16.gmra.mxu2 %v618_v44 }
  0xf3   :  { %1373 = vmatmul.bf16.gmra.mxu1 %v617_v63 }
  0xf4   :  { %1461 = vmatmul.bf16.gmra.mxu3 %v619_v6 }
  0xf5   :  { %v1237_v15 = vpop.f32.mrf.mxu2 }
  0xf6   :  { %v1238_v54 = vadd.f32 %v1237_v15, %v1194_v20  ;;  %v1151_v36 = vpop.f32.mrf.mxu0 }
  0xf7   :  { %v1281_v18 = vpop.f32.mrf.mxu3  ;;  %v1152_v21 = vadd.f32 %v6474_v55, %v1151_v36 }
  0xf8   :  { %v6644_v8 = vadd.f32 %v1281_v18, %v1238_v54  ;;  %v1195_v58 = vpop.f32.mrf.mxu1 }
  0xf9   :  { %v1196_v47 = vadd.f32 %v1195_v58, %v1152_v21 }
  0xfd   :  { %v1239_v42 = vpop.f32.mrf.mxu2 }
  0xfe   :  { %v6646_v48 = vadd.f32 %v1239_v42, %v1196_v47  ;;  %v1154_v1 = vpop.f32.mrf.mxu0 }
  0xff   :  { %v6648_v0 = vpop.f32.mrf.mxu3  ;;  %v1155_v22 = vadd.f32 %v6474_v55, %v1154_v1 }
 0x100   :  { %v1198_v32 = vpop.f32.mrf.mxu1 }
 0x101   :  { %1475 = vmatmul.bf16.vlgmr.msra.gmra.mxu0 %v570_v26  ;;  %v1199_v46 = vadd.f32 %v1198_v32, %v1155_v22 }
 0x105   :  { %v1242_v24 = vpop.f32.mrf.mxu2 }
 0x106   :  { %v1243_v33 = vadd.f32 %v1242_v24, %v1199_v46  ;;  %v1156_v49 = vpop.f32.mrf.mxu0 }
 0x107   :  { %v1286_v25 = vpop.f32.mrf.mxu3  ;;  %v1157_v2 = vadd.f32 %v6474_v55, %v1156_v49 }
 0x108   :  { %v6654_v9 = vadd.f32 %v1286_v25, %v1243_v33  ;;  %v1200_v10 = vpop.f32.mrf.mxu1  ;;  %v1269_v25 = vadd.f32 %v6584_v41, %v6582_v38 }
 0x109   :  { %v1201_v53 = vadd.f32 %v1200_v10, %v1157_v2 }
 0x10d   :  { %v1244_v7 = vpop.f32.mrf.mxu2 }
 0x10e   :  { %v6656_v61 = vadd.f32 %v1244_v7, %v1201_v53  ;;  %v1300_v5 = vpop.f32.mrf.mxu0 }
 0x10f   :  { %v6658_v27 = vpop.f32.mrf.mxu3  ;;  %v1301_v30 = vadd.f32 %v1300_v5, %v6486_v23 }
 0x110   :  { %v1344_v3 = vpop.f32.mrf.mxu1 }
 0x111   :  { %1480 = vmatmul.bf16.gmra.mxu0 %v578_v28  ;;  %v1345_v4 = vadd.f32 %v1344_v3, %v1301_v30 }
 0x115   :  { %v1388_v37 = vpop.f32.mrf.mxu2 }
 0x116   :  { %v1389_v55 = vadd.f32 %v1388_v37, %v1345_v4  ;;  %v1302_v44 = vpop.f32.mrf.mxu0 }
 0x117   :  { %v1432_v39 = vpop.f32.mrf.mxu3  ;;  %v1303_v56 = vadd.f32 %v1302_v44, %v6501_v14 }
 0x118   :  { %v6664_v63 = vadd.f32 %v1432_v39, %v1389_v55  ;;  %v1346_v6 = vpop.f32.mrf.mxu1 }
 0x119   :  { %v1347_v35 = vadd.f32 %v1346_v6, %v1303_v56 }
 0x11d   :  { %v1390_v12 = vpop.f32.mrf.mxu2 }
 0x11e   :  { %v1391_v20 = vadd.f32 %v1390_v12, %v1347_v35  ;;  %v1305_v59 = vpop.f32.mrf.mxu0 }
 0x11f   :  { %v1434_v15 = vpop.f32.mrf.mxu3  ;;  %v1306_v23 = vadd.f32 %v1305_v59, %v6516_v13 }
 0x120   :  { %v1349_v54 = vpop.f32.mrf.mxu1 }
 0x121   :  { %1485 = vmatmul.bf16.gmra.mxu0 %v586_v29  ;;  %v1350_v18 = vadd.f32 %v1349_v54, %v1306_v23  ;;  %v1435_v54 = vadd.f32 %v1434_v15, %v1391_v20 }
 0x125   :  { %v1393_v36 = vpop.f32.mrf.mxu2 }
 0x126   :  { %v1394_v21 = vadd.f32 %v1393_v36, %v1350_v18  ;;  %v1307_v14 = vpop.f32.mrf.mxu0 }
 0x127   :  { %v1437_v58 = vpop.f32.mrf.mxu3  ;;  %v1308_v47 = vadd.f32 %v1307_v14, %v6531_v34 }
 0x128   :  { %v1438_v42 = vadd.f32 %v1437_v58, %v1394_v21  ;;  %v1351_v26 = vpop.f32.mrf.mxu1 }
 0x129   :  { %v1352_v1 = vadd.f32 %v1351_v26, %v1308_v47 }
 0x12d   :  { %v1395_v22 = vpop.f32.mrf.mxu2 }
 0x12e   :  { %v1310_v16 = vpop.f32.mrf.mxu0 }
 0x12f   :  { %v1439_v32 = vpop.f32.mrf.mxu3  ;;  %v1311_v13 = vadd.f32 %v1310_v16, %v6558_v50 }
 0x130   :  { %v1354_v46 = vpop.f32.mrf.mxu1 }
 0x131   :  { %1490 = vmatmul.bf16.gmra.mxu0 %v595_v60  ;;  %v1355_v24 = vadd.f32 %v1354_v46, %v1311_v13 }
 0x135   :  { %v1398_v33 = vpop.f32.mrf.mxu2 }
 0x136   :  { %v1399_v49 = vadd.f32 %v1398_v33, %v1355_v24  ;;  %v1312_v2 = vpop.f32.mrf.mxu0 }
 0x137   :  { %v1442_v34 = vpop.f32.mrf.mxu3  ;;  %v1313_v10 = vadd.f32 %v1312_v2, %v1269_v25 }
 0x138   :  { %v1443_v53 = vadd.f32 %v1442_v34, %v1399_v49  ;;  %v1356_v7 = vpop.f32.mrf.mxu1 }
 0x139   :  { %v1357_v28 = vadd.f32 %v1356_v7, %v1313_v10 }
 0x13d   :  { %v1400_v5 = vpop.f32.mrf.mxu2 }
 0x13e   :  { %v1401_v30 = vadd.f32 %v1400_v5, %v1357_v28  ;;  %v1315_v45 = vpop.f32.mrf.mxu0 }
 0x13f   :  { %v1444_v17 = vpop.f32.mrf.mxu3  ;;  %v1316_v50 = vadd.f32 %v1315_v45, %v6610_v57 }
 0x140   :  { %v1359_v3 = vpop.f32.mrf.mxu1  ;;  %v1445_v60 = vadd.f32 %v1444_v17, %v1401_v30 }
 0x141   :  { %1495 = vmatmul.bf16.gmra.mxu0 %v6225_v51  ;;  %v1360_v4 = vadd.f32 %v1359_v3, %v1316_v50 }
 0x145   :  { %v1403_v37 = vpop.f32.mrf.mxu2 }
 0x146   :  { %v1404_v55 = vadd.f32 %v1403_v37, %v1360_v4  ;;  %v6677_v41 = vpop.f32.mrf.mxu0  ;;  %v1289_v4 = vadd.f32 %v6658_v27, %v6656_v61  ;;  %v1284_v37 = vadd.f32 %v6648_v0, %v6646_v48  ;;  %v1274_v61 = vadd.f32 %v6630_v19, %v6628_v40 }
 0x147   :  { %v1447_v38 = vpop.f32.mrf.mxu3 }
 0x148   :  { %v1448_v39 = vadd.f32 %v1447_v38, %v1404_v55  ;;  %v1361_v26 = vpop.f32.mrf.mxu1  ;;  %v1318_v0 = vadd.f32 %v6677_v41, %v1274_v61 }
 0x14e   :  { %v1320_v44 = vpop.f32.mrf.mxu0 }
 0x14f   :  { %v6680_v56 = vadd.f32 %v1320_v44, %v6634_v62  ;;  %v6696_v16 = vpop.f32.mrf.mxu3 }
 0x150   :  { %v1364_v13 = vpop.f32.mrf.mxu1 }
 0x151   :  { %1500 = vmatmul.bf16.gmra.mxu0 %v6277_v31  ;;  %v1396_v31 = vadd.f32 %v1395_v22, %v1352_v1 }
 0x153   :  { %v1440_v58 = vadd.f32 %v1439_v32, %v1396_v31 }
 0x156   :  { %v1322_v6 = vpop.f32.mrf.mxu0 }
 0x157   :  { %v1452_v1 = vpop.f32.mrf.mxu3 }
 0x158   :  { %v1366_v22 = vpop.f32.mrf.mxu1 }
 0x15e   :  { %v1325_v35 = vpop.f32.mrf.mxu0 }
 0x15f   :  { %v1326_v57 = vadd.f32 %v1325_v35, %v6644_v8  ;;  %v1454_v25 = vpop.f32.mrf.mxu3 }
 0x160   :  { %v1369_v49 = vpop.f32.mrf.mxu1 }
 0x161   :  { %1505 = vmatmul.bf16.gmra.mxu0 %v6342_v52 }
 0x166   :  { %v1327_v51 = vpop.f32.mrf.mxu0 }
 0x167   :  { %v1457_v10 = vpop.f32.mrf.mxu3 }
 0x168   :  { %v1371_v7 = vpop.f32.mrf.mxu1 }
 0x16e   :  { %v1330_v12 = vpop.f32.mrf.mxu0 }
 0x16f   :  { %v1331_v29 = vadd.f32 %v1330_v12, %v6654_v9  ;;  %v1405_v9 = vpop.f32.mrf.mxu2  ;;  %v1459_v5 = vpop.f32.mrf.mxu3  ;;  %v1279_v12 = vadd.f32 %v6640_v11, %v6638_v43  ;;  %v1365_v43 = vadd.f32 %v1364_v13, %v6680_v56 }
 0x170   :  { %v1374_v17 = vpop.f32.mrf.mxu1 }
 0x176   :  { %v1332_v59 = vpop.f32.mrf.mxu0 }
 0x177   :  { %v1408_v46 = vpop.f32.mrf.mxu2  ;;  %v1462_v3 = vpop.f32.mrf.mxu3  ;;  %v1333_v55 = vadd.f32 %v1332_v59, %v1289_v4 }
 0x178   :  { %v1376_v38 = vpop.f32.mrf.mxu1 }
 0x17e   :  { %v6686_v23 = vpop.f32.mrf.mxu0 }
 0x17f   :  { %v1410_v32 = vpop.f32.mrf.mxu2  ;;  %v1464_v27 = vpop.f32.mrf.mxu3 }
 0x186   :  { %v1478_v18 = vpop.f32.mrf.mxu0 }
 0x187   :  { %v6688_v36 = vadd.f32 %v1478_v18, %v1435_v54  ;;  %v1413_v2 = vpop.f32.mrf.mxu2  ;;  %v1375_v54 = vadd.f32 %v1374_v17, %v1331_v29  ;;  %v1377_v18 = vadd.f32 %v1376_v38, %v1333_v55  ;;  %v1362_v17 = vadd.f32 %v1361_v26, %v1318_v0 }
 0x18e   :  { %v1481_v62 = vpop.f32.mrf.mxu0 }
 0x18f   :  { %v6690_v21 = vadd.f32 %v1481_v62, %v1438_v42  ;;  %v1415_v28 = vpop.f32.mrf.mxu2  ;;  %v1323_v62 = vadd.f32 %v1322_v6, %v1279_v12 }
 0x196   :  { %v1483_v14 = vpop.f32.mrf.mxu0 }
 0x197   :  { %v6692_v8 = vadd.f32 %v1483_v14, %v1440_v58  ;;  %v1418_v45 = vpop.f32.mrf.mxu2 }
 0x198   :  { %v1419_v58 = vadd.f32 %v1418_v45, %v1375_v54  ;;  %v1409_v45 = vadd.f32 %v1408_v46, %v1365_v43 }
 0x19e   :  { %v1486_v52 = vpop.f32.mrf.mxu0 }
 0x19f   :  { %v6694_v47 = vadd.f32 %v1486_v52, %v1443_v53  ;;  %v1420_v44 = vpop.f32.mrf.mxu2  ;;  %v1370_v52 = vadd.f32 %v1369_v49, %v1326_v57  ;;  %v1406_v57 = vadd.f32 %v1405_v9, %v1362_v17 }
 0x1a0   :  { %v1421_v14 = vadd.f32 %v1420_v44, %v1377_v18 }
 0x1a1   :  { %v1414_v59 = vadd.f32 %v1413_v2, %v1370_v52  ;;  %v1450_v56 = vadd.f32 %v6696_v16, %v1406_v57  ;;  %v1514_v16 = vmax.f32 %v6692_v8, 0.0 }
 0x1a3   :  { %v1458_v4 = vadd.f32 %v1457_v10, %v1414_v59 }
 0x1a6   :  { %v1488_v20 = vpop.f32.mrf.mxu0 }
 0x1a7   :  { %v6698_v15 = vadd.f32 %v1488_v20, %v1445_v60  ;;  %v1463_v60 = vadd.f32 %v1462_v3, %v1419_v58  ;;  %v1465_v20 = vadd.f32 %v1464_v27, %v1421_v14 }
 0x1ae   :  { %v1491_v42 = vpop.f32.mrf.mxu0 }
 0x1af   :  { %v6700_v24 = vadd.f32 %v1491_v42, %v1448_v39  ;;  %v1328_v39 = vadd.f32 %v1327_v51, %v1284_v37  ;;  %v1367_v51 = vadd.f32 %v1366_v22, %v1323_v62  ;;  %v1453_v22 = vadd.f32 %v1452_v1, %v1409_v45 }
 0x1b0   :  { %v1516_v1 = vmax.f32 %v6698_v15, 0.0  ;;  %v8857_v15 = vmov 1.0  }
 0x1b1   :  { %v1372_v31 = vadd.f32 %v1371_v7, %v1328_v39  ;;  %v1411_v29 = vadd.f32 %v1410_v32, %v1367_v51  ;;  %v1517_v9 = vmax.f32 %v6700_v24, 0.0 }
 0x1b3   :  { %v1416_v48 = vadd.f32 %v1415_v28, %v1372_v31  ;;  %v1455_v49 = vadd.f32 %v1454_v25, %v1411_v29  ;;  %v1515_v25 = vmax.f32 %v6694_v47, 0.0 }
 0x1b5   :  { %v1460_v6 = vadd.f32 %v1459_v5, %v1416_v48 }
 0x1b6   :  { %v1493_v33 = vpop.f32.mrf.mxu0 }
 0x1b7   :  { %v1494_v5 = vadd.f32 %v1493_v33, %v1450_v56  ;;  %v1477_v33 = vadd.f32 %v6686_v23, %v6664_v63 }
 0x1b9   :  { %v1518_v10 = vmax.f32 %v1494_v5, 0.0  ;;  %v1511_v24 = vmax.f32 %v1477_v33, 0.0 }
 0x1be   :  { %v1496_v34 = vpop.f32.mrf.mxu0 }
 0x1bf   :  { %v1497_v13 = vadd.f32 %v1496_v34, %v1453_v22  ;;  %v1513_v34 = vmax.f32 %v6690_v21, 0.0 }
 0x1c1   :  { %v1519_v46 = vmax.f32 %v1497_v13, 0.0 }
 0x1c6   :  { %v1498_v53 = vpop.f32.mrf.mxu0 }
 0x1c7   :  { %v1499_v2 = vadd.f32 %v1498_v53, %v1455_v49  ;;  %v1512_v53 = vmax.f32 %v6688_v36, 0.0 }
 0x1c9   :  { %v1520_v26 = vmax.f32 %v1499_v2, 0.0 }
 0x1ce   :  { %v1501_v30 = vpop.f32.mrf.mxu0 }
 0x1cf   :  { %v1502_v28 = vadd.f32 %v1501_v30, %v1458_v4 }
 0x1d1   :  { %v1521_v32 = vmax.f32 %v1502_v28, 0.0 }
 0x1d6   :  { %v1503_v50 = vpop.f32.mrf.mxu0 }
 0x1d7   :  { %v1504_v40 = vadd.f32 %v1503_v50, %v1460_v6 }
 0x1d9   :  { %v1522_v3 = vmax.f32 %v1504_v40, 0.0  ;;  %v1600_v40 = vld [vmem:[%s8847_s3] sm:$0x1] }
 0x1de   :  { %v1506_v35 = vpop.f32.mrf.mxu0 }
 0x1df   :  { %v1507_v42 = vadd.f32 %v1506_v35, %v1463_v60 }
 0x1e1   :  { %v1523_v41 = vmax.f32 %v1507_v42, 0.0 }
 0x1e6   :  { %v1508_v11 = vpop.f32.mrf.mxu0 }
 0x1e7   :  { %v1509_v7 = vadd.f32 %v1508_v11, %v1465_v20 }
 0x1e9   :  { %v1524_v19 = vmax.f32 %v1509_v7, 0.0 }
 0x1eb   :  { %1531 = vmatpush.msra.mxu1 %v1524_v19 }
 0x1ed   :  { %1532 = vmatpush.msra.mxu1 %v1523_v41 }
 0x1ef   :  { %1533 = vmatpush.msra.mxu1 %v1522_v3 }
 0x1f1   :  { %1534 = vmatpush.msra.mxu1 %v1521_v32 }
 0x1f3   :  { %1535 = vmatpush.msra.mxu1 %v1520_v26 }
 0x1f5   :  { %1536 = vmatpush.msra.mxu1 %v1519_v46 }
 0x1f7   :  { %1537 = vmatpush.msra.mxu1 %v1518_v10 }
 0x1f9   :  { %1538 = vmatpush.msra.mxu1 %v1517_v9 }
 0x1fb   :  { %1539 = vmatpush.msra.mxu1 %v1516_v1 }
 0x1fd   :  { %1540 = vmatpush.msra.mxu1 %v1515_v25 }
 0x1ff   :  { %1541 = vmatpush.msra.mxu1 %v1514_v16 }
 0x201   :  { %1542 = vmatpush.msra.mxu1 %v1513_v34 }
 0x203   :  { %1543 = vmatpush.msra.mxu1 %v1512_v53 }
 0x205   :  { %1544 = vmatpush.msra.mxu1 %v1511_v24 }
 0x206   :  { %5200 = vmatmul.msk.f32.vlgmr.msra.gmra.mxu1 %vm1525_vm7, %v8857_v15 }
 0x283   :  { %v1546_v47 = vpop.f32.mrf.mxu1 }
 0x284   :  { %v1549_v8 = vmul.f32 0.008928572, %v1546_v47 }
 0x286   :  { %v1550_v30 = vperm.slane %v1549_v8, 0 }
 0x288   :  { %v6723_v50 = vsub.f32 %v1524_v19, %v1550_v30  ;;  %v6725_v63 = vsub.f32 %v1523_v41, %v1550_v30  ;;  %v6729_v36 = vsub.f32 %v1522_v3, %v1550_v30  ;;  %v6733_v37 = vsub.f32 %v1521_v32, %v1550_v30  ;;  %v6761_v41 = vld [vmem:[%s8846_s4] ss:$0 sm:$0xff] }
 0x289   :  { %v1560_v38 = vsub.f32 %v1520_v26, %v1550_v30  ;;  %v6739_v44 = vsub.f32 %v1519_v46, %v1550_v30  ;;  %v6741_v12 = vsub.f32 %v1518_v10, %v1550_v30  ;;  %v6745_v18 = vsub.f32 %v1517_v9, %v1550_v30 }
 0x28a   :  { %v1578_v23 = vmul.f32 %v6723_v50, %v6723_v50  ;;  %v1577_v21 = vmul.f32 %v6725_v63, %v6725_v63  ;;  %v1576_v55 = vmul.f32 %v6729_v36, %v6729_v36  ;;  %v1575_v39 = vmul.f32 %v6733_v37, %v6733_v37 }
 0x28b   :  { %v1574_v35 = vmul.f32 %v1560_v38, %v1560_v38  ;;  %v1573_v54 = vmul.f32 %v6739_v44, %v6739_v44  ;;  %v1572_v62 = vmul.f32 %v6741_v12, %v6741_v12  ;;  %v1556_v31 = vsub.f32 %v1516_v1, %v1550_v30 }
 0x28c   :  { %1581 = vmatpush.msra.mxu2 %v1578_v23  ;;  %v1571_v58 = vmul.f32 %v6745_v18, %v6745_v18  ;;  %v1555_v14 = vsub.f32 %v1515_v25, %v1550_v30  ;;  %v1554_v27 = vsub.f32 %v1514_v16, %v1550_v30  ;;  %v1553_v48 = vsub.f32 %v1513_v34, %v1550_v30 }
 0x28d   :  { %v1570_v61 = vmul.f32 %v1556_v31, %v1556_v31  ;;  %v1552_v51 = vsub.f32 %v1512_v53, %v1550_v30  ;;  %v1551_v60 = vsub.f32 %v1511_v24, %v1550_v30 }
 0x28e   :  { %1582 = vmatpush.msra.mxu2 %v1577_v21  ;;  %v1569_v52 = vmul.f32 %v1555_v14, %v1555_v14  ;;  %v1568_v0 = vmul.f32 %v1554_v27, %v1554_v27  ;;  %v1567_v59 = vmul.f32 %v1553_v48, %v1553_v48 }
 0x28f   :  { %v1566_v20 = vmul.f32 %v1552_v51, %v1552_v51  ;;  %v1565_v43 = vmul.f32 %v1551_v60, %v1551_v60 }
 0x290   :  { %1583 = vmatpush.msra.mxu2 %v1576_v55 }
 0x292   :  { %1584 = vmatpush.msra.mxu2 %v1575_v39 }
 0x294   :  { %1585 = vmatpush.msra.mxu2 %v1574_v35 }
 0x296   :  { %1586 = vmatpush.msra.mxu2 %v1573_v54 }
 0x298   :  { %1587 = vmatpush.msra.mxu2 %v1572_v62 }
 0x29a   :  { %1588 = vmatpush.msra.mxu2 %v1571_v58 }
 0x29c   :  { %1589 = vmatpush.msra.mxu2 %v1570_v61 }
 0x29e   :  { %1590 = vmatpush.msra.mxu2 %v1569_v52 }
 0x2a0   :  { %1591 = vmatpush.msra.mxu2 %v1568_v0 }
 0x2a2   :  { %1592 = vmatpush.msra.mxu2 %v1567_v59 }
 0x2a4   :  { %1593 = vmatpush.msra.mxu2 %v1566_v20 }
 0x2a6   :  { %1594 = vmatpush.msra.mxu2 %v1565_v43 }
 0x2a7   :  { %5201 = vmatmul.msk.f32.vlgmr.msra.gmra.mxu2 %vm1525_vm7, %v8857_v15  ;;  %vm2736_vm7 = vcmask 1045506  }
 0x32a   :  { %v1596_v11 = vpop.f32.mrf.mxu2 }
 0x32b   :  { %v1599_v29 = vmul.f32 0.008928572, %v1596_v11 }
 0x32d   :  { %v1601_v6 = vadd.f32 1e-05, %v1599_v29 }
 0x32f   :  { %5924 = vrsqrt.f32 %v1601_v6  ;;  %vm1608_vm9 = vweird.f32 %v1601_v6 }
 0x335   :  { %v5925_v42 = vpop.eup %5924 }
 0x336   :  { %v1603_v7 = vmul.f32 %v5925_v42, %v1601_v6  ;;  %vm1609_vm8 = vweird.f32 %v5925_v42 }
 0x337   :  { %vm1610_vm10 = vmor %vm1608_vm9, %vm1609_vm8 }
 0x338   :  { %v1604_v17 = vmul.f32 %v5925_v42, %v1603_v7 }
 0x33a   :  { %v1605_v45 = vmul.f32 0.5, %v1604_v17 }
 0x33c   :  { %v1606_v4 = vsub.f32 1.5, %v1605_v45 }
 0x33e   :  { %v1607_v19 = vmul.f32 %v5925_v42, %v1606_v4 }
 0x340   :  { %v1611_v57 = vsel %vm1610_vm10, %v5925_v42, %v1607_v19 }
 0x341   :  { %v1612_v49 = vmul.f32 %v1611_v57, %v1600_v40 }
 0x343   :  { %v6756_v28 = vperm.slane %v1612_v49, 0 }
 0x345   :  { %v1616_v22 = vmul.f32 %v6756_v28, %v1551_v60  ;;  %v1617_v2 = vmul.f32 %v6756_v28, %v1552_v51  ;;  %v1618_v3 = vmul.f32 %v6756_v28, %v1553_v48  ;;  %v1619_v56 = vmul.f32 %v6756_v28, %v1554_v27 }
 0x346   :  { %v1620_v13 = vmul.f32 %v6756_v28, %v1555_v14  ;;  %v1621_v32 = vmul.f32 %v6756_v28, %v1556_v31  ;;  %v1625_v5 = vmul.f32 %v6756_v28, %v1560_v38  ;;  %v1627_v26 = vmul.f32 %v6756_v28, %v6729_v36 }
 0x347   :  { %v1634_v46 = vadd.f32 %v6761_v41, %v1616_v22  ;;  %v1635_v10 = vadd.f32 %v6761_v41, %v1617_v2  ;;  %v6775_v9 = vadd.f32 %v6761_v41, %v1618_v3  ;;  %v6779_v1 = vmul.f32 %v6756_v28, %v6733_v37 }
 0x348   :  { %v6782_v25 = vadd.f32 %v6761_v41, %v1619_v56  ;;  %v6785_v16 = vadd.f32 %v6761_v41, %v1620_v13  ;;  %v6788_v33 = vadd.f32 %v6761_v41, %v1621_v32  ;;  %v6791_v34 = vadd.f32 %v6761_v41, %v1625_v5 }
 0x349   :  { %v6794_v53 = vadd.f32 %v6761_v41, %v1627_v26  ;;  %v1662_v24 = vrot.slane %v1634_v46, 2  ;;  %v1663_v47 = vrot.slane %v1634_v46, 4  ;;  %v1664_v8 = vrot.slane %v1634_v46, 6 }
 0x34a   :  { %v1665_v30 = vrot.slane %v1635_v10, 2  ;;  %v1666_v23 = vrot.slane %v1635_v10, 4  ;;  %v1667_v36 = vrot.slane %v1635_v10, 6  ;;  %v1668_v21 = vrot.slane %v6775_v9, 2 }
 0x34b   :  { %v1669_v37 = vrot.slane %v6775_v9, 4  ;;  %v1670_v55 = vrot.slane %v6775_v9, 6  ;;  %v1671_v38 = vrot.slane %v6782_v25, 2  ;;  %v1672_v39 = vrot.slane %v6782_v25, 4 }
 0x34c   :  { %v1673_v35 = vrot.slane %v6782_v25, 6  ;;  %v1674_v54 = vrot.slane %v6785_v16, 2  ;;  %v1675_v62 = vrot.slane %v6785_v16, 4  ;;  %v1676_v31 = vrot.slane %v6785_v16, 6 }
 0x34d   :  { %v1747_v58 = vsel %vm1746_vm11, %v1634_v46, -inf  ;;  %v1754_v14 = vsel %vm1746_vm11, %v1662_v24, -inf  ;;  %v1761_v52 = vsel %vm1746_vm11, %v1663_v47, -inf  ;;  %v1768_v48 = vsel %vm1746_vm11, %v1664_v8, -inf }
 0x34e   :  { %v1748_v61 = vrot.slane %v1747_v58, 4  ;;  %v1755_v27 = vrot.slane %v1754_v14, 4  ;;  %v1762_v0 = vrot.slane %v1761_v52, 4  ;;  %v1769_v51 = vrot.slane %v1768_v48, 4 }
 0x34f   :  { %v1775_v59 = vsel %vm1746_vm11, %v1635_v10, -inf  ;;  %v1782_v60 = vsel %vm1746_vm11, %v1665_v30, -inf  ;;  %v1789_v7 = vsel %vm1746_vm11, %v1666_v23, -inf  ;;  %v1796_v17 = vsel %vm1746_vm11, %v1667_v36, -inf  ;;  %v5795_v23 = vld [vmem:[%s8848_s5 + $0x38] sm:$0xff] }
 0x350   :  { %v1749_v20 = vmax.f32 %v1747_v58, %v1748_v61  ;;  %v1756_v43 = vmax.f32 %v1754_v14, %v1755_v27  ;;  %v1776_v11 = vrot.slane %v1775_v59, 4  ;;  %v1783_v29 = vrot.slane %v1782_v60, 4  ;;  %v5803_v36 = vld [vmem:[%s8848_s5 + $0x78] sm:$0xff]  ;;  %3536 = vmatpush.bf16.msra.mxu3 %v5795_v23 }
 0x351   :  { %v1763_v6 = vmax.f32 %v1761_v52, %v1762_v0  ;;  %v1770_v42 = vmax.f32 %v1768_v48, %v1769_v51  ;;  %v1790_v22 = vrot.slane %v1789_v7, 4  ;;  %v1797_v2 = vrot.slane %v1796_v17, 4  ;;  %v5811_v58 = vld [vmem:[%s8848_s5 + $0xb8] sm:$0xff]  ;;  %3559 = vmatpush.bf16.msrb.mxu1 %v5803_v36 }
 0x352   :  { %v1750_v45 = vrot.slane %v1749_v20, 2  ;;  %v1757_v4 = vrot.slane %v1756_v43, 2  ;;  %v1777_v40 = vmax.f32 %v1775_v59, %v1776_v11  ;;  %v1784_v19 = vmax.f32 %v1782_v60, %v1783_v29  ;;  %v5851_v48 = vld [vmem:[%s8848_s5 + $0x1f8] sm:$0xff]  ;;  %3582 = vmatpush.bf16.msrb.mxu2 %v5811_v58 }
 0x353   :  { %v1764_v57 = vrot.slane %v1763_v6, 2  ;;  %v1771_v49 = vrot.slane %v1770_v42, 2  ;;  %v1791_v46 = vmax.f32 %v1789_v7, %v1790_v22  ;;  %v1798_v10 = vmax.f32 %v1796_v17, %v1797_v2  ;;  %3697 = vmatpush.bf16.msrb.mxu0 %v5851_v48  ;;  %v5850_v22 = vld [vmem:[%s8848_s5 + $0x1f0] sm:$0xff] }
 0x354   :  { %v1751_v3 = vmax.f32 %v1749_v20, %v1750_v45  ;;  %v1758_v56 = vmax.f32 %v1756_v43, %v1757_v4  ;;  %v1778_v13 = vrot.slane %v1777_v40, 2  ;;  %v1785_v32 = vrot.slane %v1784_v19, 2  ;;  %v5794_v45 = vld [vmem:[%s8848_s5 + $0x30] sm:$0xff] }
 0x355   :  { %v6813_v5 = vmax.f32 %v1763_v6, %v1764_v57  ;;  %v1772_v26 = vmax.f32 %v1770_v42, %v1771_v49  ;;  %v1677_v14 = vrot.slane %v6788_v33, 2  ;;  %v1792_v27 = vrot.slane %v1791_v46, 2  ;;  %v5802_v4 = vld [vmem:[%s8848_s5 + $0x70] sm:$0xff]  ;;  %3537 = vmatpush.bf16.msra.mxu3 %v5794_v45 }
 0x356   :  { %v1752_v24 = vrot.slane %v1751_v3, 1  ;;  %v1759_v47 = vrot.slane %v1758_v56, 1  ;;  %v1779_v8 = vmax.f32 %v1777_v40, %v1778_v13  ;;  %v1786_v30 = vmax.f32 %v1784_v19, %v1785_v32  ;;  %v5810_v40 = vld [vmem:[%s8848_s5 + $0xb0] sm:$0xff]  ;;  %3560 = vmatpush.bf16.msrb.mxu1 %v5802_v4  ;;  %v5793_v32 = vld [vmem:[%s8848_s5 + $0x28] sm:$0xff]  ;;  %v5808_v4 = vld [vmem:[%s8848_s5 + $0xa0] sm:$0xff] }
 0x357   :  { %v1773_v61 = vrot.slane %v1772_v26, 1  ;;  %v1799_v52 = vrot.slane %v1798_v10, 2  ;;  %v1697_v0 = vrot.slane %v6794_v53, 6  ;;  %v1766_v51 = vrot.slane %v6813_v5, 1  ;;  %3583 = vmatpush.bf16.msrb.mxu2 %v5810_v40  ;;  %3698 = vmatpush.bf16.msrb.mxu0 %v5850_v22  ;;  %v5848_v40 = vld [vmem:[%s8848_s5 + $0x1e0] sm:$0xff] }
 0x358   :  { %v1780_v59 = vrot.slane %v1779_v8, 1  ;;  %v1787_v60 = vrot.slane %v1786_v30, 1  ;;  %v6830_v20 = vmax.f32 %v1751_v3, %v1752_v24  ;;  %v6832_v43 = vmax.f32 %v1791_v46, %v1792_v27  ;;  %v5849_v24 = vld [vmem:[%s8848_s5 + $0x1e8] sm:$0xff] }
 0x359   :  { %v6834_v11 = vmax.f32 %v1798_v10, %v1799_v52  ;;  %v1803_v29 = vsel %vm1746_vm11, %v6775_v9, -inf  ;;  %v6838_v6 = vmax.f32 %v1758_v56, %v1759_v47  ;;  %v6840_v42 = vmax.f32 %v1772_v26, %v1773_v61  ;;  %3538 = vmatpush.bf16.msra.mxu3 %v5793_v32 }
 0x35a   :  { %v1804_v7 = vrot.slane %v1803_v29, 4  ;;  %v1810_v17 = vsel %vm1746_vm11, %v1668_v21, -inf  ;;  %v6854_v19 = vmax.f32 %v1779_v8, %v1780_v59  ;;  %v6856_v57 = vmax.f32 %v1786_v30, %v1787_v60 }
 0x35b   :  { %v1811_v49 = vrot.slane %v1810_v17, 4  ;;  %v1817_v21 = vsel %vm1746_vm11, %v1669_v37, -inf  ;;  %v1824_v56 = vsel %vm1746_vm11, %v1670_v55, -inf  ;;  %v1831_v13 = vsel %vm1746_vm11, %v6782_v25, -inf  ;;  %v5801_v37 = vld [vmem:[%s8848_s5 + $0x68] sm:$0xff]  ;;  %3699 = vmatpush.bf16.msrb.mxu0 %v5849_v24 }
 0x35c   :  { %v1805_v2 = vmax.f32 %v1803_v29, %v1804_v7  ;;  %v1818_v3 = vrot.slane %v1817_v21, 4  ;;  %v1794_v26 = vrot.slane %v6832_v43, 1  ;;  %v1801_v46 = vrot.slane %v6834_v11, 1  ;;  %v5809_v55 = vld [vmem:[%s8848_s5 + $0xa8] sm:$0xff]  ;;  %3561 = vmatpush.bf16.msrb.mxu1 %v5801_v37  ;;  %v5792_v29 = vld [vmem:[%s8848_s5 + $0x20] sm:$0xff] }
 0x35d   :  { %v1812_v9 = vmax.f32 %v1810_v17, %v1811_v49  ;;  %v1825_v10 = vrot.slane %v1824_v56, 4  ;;  %v1832_v30 = vrot.slane %v1831_v13, 4  ;;  %v1838_v23 = vsel %vm1746_vm11, %v1671_v38, -inf  ;;  %v5800_v38 = vld [vmem:[%s8848_s5 + $0x60] sm:$0xff]  ;;  %3584 = vmatpush.bf16.msrb.mxu2 %v5809_v55  ;;  %3539 = vmatpush.bf16.msra.mxu3 %v5792_v29  ;;  %v5799_v55 = vld [vmem:[%s8848_s5 + $0x58] sm:$0xff] }
 0x35e   :  { %v1806_v47 = vrot.slane %v1805_v2, 2  ;;  %v1819_v8 = vmax.f32 %v1817_v21, %v1818_v3  ;;  %v1839_v61 = vrot.slane %v1838_v23, 4  ;;  %v1845_v27 = vsel %vm1746_vm11, %v1672_v39, -inf }
 0x35f   :  { %v1813_v36 = vrot.slane %v1812_v9, 2  ;;  %v1826_v58 = vmax.f32 %v1824_v56, %v1825_v10  ;;  %v1833_v59 = vmax.f32 %v1831_v13, %v1832_v30  ;;  %v1846_v60 = vrot.slane %v1845_v27, 4  ;;  %v5791_v10 = vld [vmem:[%s8848_s5 + $0x18] sm:$0xff]  ;;  %3700 = vmatpush.bf16.msrb.mxu0 %v5848_v40 }
 0x360   :  { %v1807_v52 = vmax.f32 %v1805_v2, %v1806_v47  ;;  %v1820_v48 = vrot.slane %v1819_v8, 2  ;;  %v1840_v45 = vmax.f32 %v1838_v23, %v1839_v61  ;;  %v1852_v39 = vsel %vm1746_vm11, %v1673_v35, -inf  ;;  %3562 = vmatpush.bf16.msrb.mxu1 %v5800_v38  ;;  %v5847_v30 = vld [vmem:[%s8848_s5 + $0x1d8] sm:$0xff]  ;;  %v5790_v38 = vld [vmem:[%s8848_s5 + $0x10] sm:$0xff] }
 0x361   :  { %v1814_v7 = vmax.f32 %v1812_v9, %v1813_v36  ;;  %v1827_v17 = vrot.slane %v1826_v58, 2  ;;  %v1834_v22 = vrot.slane %v1833_v59, 2  ;;  %v1847_v2 = vmax.f32 %v1845_v27, %v1846_v60  ;;  %3585 = vmatpush.bf16.msrb.mxu2 %v5808_v4  ;;  %3540 = vmatpush.bf16.msra.mxu3 %v5791_v10 }
 0x362   :  { %v1808_v49 = vrot.slane %v1807_v52, 1  ;;  %v1821_v21 = vmax.f32 %v1819_v8, %v1820_v48  ;;  %v1841_v13 = vrot.slane %v1840_v45, 2  ;;  %v1853_v25 = vrot.slane %v1852_v39, 4 }
 0x363   :  { %v1815_v3 = vrot.slane %v1814_v7, 1  ;;  %v1828_v56 = vmax.f32 %v1826_v58, %v1827_v17  ;;  %v6905_v35 = vmax.f32 %v6832_v43, %v1794_v26  ;;  %v1835_v37 = vmax.f32 %v1833_v59, %v1834_v22  ;;  %v5807_v26 = vld [vmem:[%s8848_s5 + $0x98] sm:$0xff]  ;;  %3701 = vmatpush.bf16.msrb.mxu0 %v5847_v30 }
 0x364   :  { %v1822_v32 = vrot.slane %v1821_v21, 1  ;;  %v1848_v9 = vrot.slane %v1847_v2, 2  ;;  %v6914_v24 = vmax.f32 %v6834_v11, %v1801_v46  ;;  %v1842_v8 = vmax.f32 %v1840_v45, %v1841_v13  ;;  %3563 = vmatpush.bf16.msrb.mxu1 %v5799_v55 }
 0x365   :  { %v1829_v47 = vrot.slane %v1828_v56, 1  ;;  %v1854_v43 = vmax.f32 %v1852_v39, %v1853_v25  ;;  %v6922_v23 = vmax.f32 %v1807_v52, %v1808_v49  ;;  %v1836_v36 = vrot.slane %v1835_v37, 1  ;;  %3586 = vmatpush.bf16.msrb.mxu2 %v5807_v26  ;;  %3541 = vmatpush.bf16.msra.mxu3 %v5790_v38  ;;  %v5845_v26 = vld [vmem:[%s8848_s5 + $0x1c8] sm:$0xff] }
 0x366   :  { %v1849_v58 = vmax.f32 %v1847_v2, %v1848_v9  ;;  %v1859_v11 = vsel %vm1746_vm11, %v6785_v16, -inf  ;;  %v6926_v46 = vmax.f32 %v1814_v7, %v1815_v3  ;;  %v6928_v61 = vmax.f32 %v1821_v21, %v1822_v32  ;;  %v5798_v7 = vld [vmem:[%s8848_s5 + $0x50] sm:$0xff]  ;;  %v5789_v16 = vld [vmem:[%s8848_s5 + $0x8] sm:$0xff] }
 0x367   :  { %v1855_v27 = vrot.slane %v1854_v43, 2  ;;  %v1860_v48 = vrot.slane %v1859_v11, 4  ;;  %v1843_v59 = vrot.slane %v1842_v8, 1  ;;  %v1866_v29 = vsel %vm1746_vm11, %v1674_v54, -inf  ;;  %v5806_v54 = vld [vmem:[%s8848_s5 + $0x90] sm:$0xff] }
 0x368   :  { %v1850_v60 = vrot.slane %v1849_v58, 1  ;;  %v1873_v52 = vsel %vm1746_vm11, %v1675_v62, -inf  ;;  %v6942_v17 = vmax.f32 %v1828_v56, %v1829_v47  ;;  %v1867_v4 = vrot.slane %v1866_v29, 4  ;;  %v5846_v62 = vld [vmem:[%s8848_s5 + $0x1d0] sm:$0xff]  ;;  %3564 = vmatpush.bf16.msrb.mxu1 %v5798_v7  ;;  %v5788_v7 = vld [vmem:[%s8848_s5] sm:$0xff] }
 0x369   :  { %v1856_v45 = vmax.f32 %v1854_v43, %v1855_v27  ;;  %v1861_v39 = vmax.f32 %v1859_v11, %v1860_v48  ;;  %v6950_v40 = vmax.f32 %v1835_v37, %v1836_v36  ;;  %v1874_v49 = vrot.slane %v1873_v52, 4  ;;  %3587 = vmatpush.bf16.msrb.mxu2 %v5806_v54  ;;  %3702 = vmatpush.bf16.msrb.mxu0 %v5846_v62  ;;  %v5805_v43 = vld [vmem:[%s8848_s5 + $0x88] sm:$0xff] }
 0x36a   :  { %v1880_v21 = vsel %vm1746_vm11, %v1676_v31, -inf  ;;  %v1887_v22 = vsel %vm1746_vm11, %v6788_v33, -inf  ;;  %v1868_v56 = vmax.f32 %v1866_v29, %v1867_v4  ;;  %v6957_v25 = vmax.f32 %v1842_v8, %v1843_v59  ;;  %v5797_v31 = vld [vmem:[%s8848_s5 + $0x48] sm:$0xff]  ;;  %3542 = vmatpush.bf16.msra.mxu3 %v5789_v16  ;;  %v5844_v4 = vld [vmem:[%s8848_s5 + $0x1c0] sm:$0xff] }
 0x36b   :  { %v1857_v2 = vrot.slane %v1856_v45, 1  ;;  %v1862_v3 = vrot.slane %v1861_v39, 2  ;;  %v1881_v13 = vrot.slane %v1880_v21, 4  ;;  %v6959_v32 = vmax.f32 %v1849_v58, %v1850_v60 }
 0x36c   :  { %v1875_v9 = vmax.f32 %v1873_v52, %v1874_v49  ;;  %v1888_v10 = vrot.slane %v1887_v22, 4  ;;  %v1869_v47 = vrot.slane %v1868_v56, 2  ;;  %v2139_v8 = vpack.c.bf16 %v6830_v20, %v6830_v20  ;;  %3565 = vmatpush.bf16.msrb.mxu1 %v5797_v31 }
 0x36d   :  { %v1858_v37 = vmax.f32 %v1856_v45, %v1857_v2  ;;  %v1863_v55 = vmax.f32 %v1861_v39, %v1862_v3  ;;  %v6975_v36 = vmax.f32 %v1880_v21, %v1881_v13  ;;  %v2140_v11 = vpack.c.bf16 %v6838_v6, %v6838_v6  ;;  %3588 = vmatpush.bf16.msrb.mxu2 %v5805_v43 }
 0x36e   :  { %v1876_v30 = vrot.slane %v1875_v9, 2  ;;  %v6977_v58 = vmax.f32 %v1887_v22, %v1888_v10  ;;  %v1870_v20 = vmax.f32 %v1868_v56, %v1869_v47  ;;  %v2143_v48 = vpack.c.bf16 %v6854_v19, %v6854_v19  ;;  %v5796_v19 = vld [vmem:[%s8848_s5 + $0x40] sm:$0xff]  ;;  %3703 = vmatpush.bf16.msrb.mxu0 %v5845_v26  ;;  %3543 = vmatpush.bf16.msra.mxu3 %v5788_v7 }
 0x36f   :  { %v1864_v27 = vrot.slane %v1863_v55, 1  ;;  %v2144_v59 = vpack.c.bf16 %v6856_v57, %v6856_v57  ;;  %v2145_v52 = vpack.c.bf16 %v6905_v35, %v6905_v35  ;;  %v2146_v38 = vpack.c.bf16 %v6914_v24, %v6914_v24  ;;  %v5804_v24 = vld [vmem:[%s8848_s5 + $0x80] sm:$0xff] }
 0x370   :  { %v1877_v60 = vmax.f32 %v1875_v9, %v1876_v30  ;;  %v1890_v29 = vrot.slane %v6977_v58, 2  ;;  %v1871_v45 = vrot.slane %v1870_v20, 1  ;;  %v2147_v39 = vpack.c.bf16 %v6922_v23, %v6922_v23  ;;  %3566 = vmatpush.bf16.msrb.mxu1 %v5796_v19 }
 0x371   :  { %v1865_v57 = vmax.f32 %v1863_v55, %v1864_v27  ;;  %v2148_v35 = vpack.c.bf16 %v6926_v46, %v6926_v46  ;;  %v2149_v62 = vpack.c.bf16 %v6928_v61, %v6928_v61  ;;  %v2150_v23 = vpack.c.bf16 %v6942_v17, %v6942_v17  ;;  %3589 = vmatpush.bf16.msrb.mxu2 %v5804_v24 }
 0x372   :  { %v1878_v54 = vrot.slane %v1877_v60, 1  ;;  %v2151_v46 = vpack.c.bf16 %v6950_v40, %v6950_v40  ;;  %v1872_v49 = vmax.f32 %v1870_v20, %v1871_v45  ;;  %v2152_v21 = vpack.c.bf16 %v6957_v25, %v6957_v25  ;;  %3704 = vmatpush.bf16.msrb.mxu0 %v5844_v4 }
 0x373   :  { %v2153_v22 = vpack.c.bf16 %v6959_v32, %v6959_v32  ;;  %v2154_v2 = vpack.c.bf16 %v1858_v37, %v1858_v37  ;;  %v2155_v56 = vpack.c.bf16 %v1865_v57, %v1865_v57  ;;  %v2235_v13 = vperm.slane %v2139_v8, 0 }
 0x374   :  { %v1879_v3 = vmax.f32 %v1877_v60, %v1878_v54  ;;  %v2239_v9 = vperm.slane %v2143_v48, 0  ;;  %v2156_v61 = vpack.c.bf16 %v1872_v49, %v1872_v49  ;;  %v2240_v10 = vperm.slane %v2144_v59, 0 }
 0x375   :  { %v2241_v17 = vperm.slane %v2145_v52, 0  ;;  %v2242_v16 = vperm.slane %v2146_v38, 0  ;;  %v2243_v31 = vperm.slane %v2147_v39, 0  ;;  %v2244_v55 = vperm.slane %v2148_v35, 0 }
 0x376   :  { %v2157_v40 = vpack.c.bf16 %v1879_v3, %v1879_v3  ;;  %v2245_v25 = vperm.slane %v2149_v62, 0  ;;  %v2246_v47 = vperm.slane %v2150_v23, 0  ;;  %v2247_v43 = vperm.slane %v2151_v46, 0 }
 0x377   :  { %v2248_v32 = vperm.slane %v2152_v21, 0  ;;  %v2249_v37 = vperm.slane %v2153_v22, 0  ;;  %v2250_v26 = vperm.slane %v2154_v2, 0  ;;  %v2251_v30 = vperm.slane %v2155_v56, 0 }
 0x378   :  { %v2252_v8 = vperm.slane %v2156_v61, 0  ;;  %v2253_v27 = vperm.slane %v2157_v40, 0  ;;  %v2275_v20 = vunpack.c.l.b16 %v2235_v13  ;;  %v7016_v48 = vunpack.c.l.b16 %v2239_v9 }
 0x379   :  { %v7018_v59 = vunpack.c.l.b16 %v2240_v10  ;;  %v7020_v60 = vunpack.c.l.b16 %v2241_v17  ;;  %v7022_v52 = vunpack.c.l.b16 %v2242_v16  ;;  %v7024_v38 = vunpack.c.l.b16 %v2243_v31 }
 0x37a   :  { %v7026_v7 = vunpack.c.l.b16 %v2244_v55  ;;  %v7028_v19 = vunpack.c.l.b16 %v2245_v25  ;;  %v7030_v57 = vunpack.c.l.b16 %v2246_v47  ;;  %v7032_v45 = vunpack.c.l.b16 %v2247_v43 }
 0x37b   :  { %v7034_v39 = vunpack.c.l.b16 %v2248_v32  ;;  %v7036_v35 = vunpack.c.l.b16 %v2249_v37  ;;  %v7038_v24 = vunpack.c.l.b16 %v2250_v26  ;;  %v7040_v4 = vunpack.c.l.b16 %v2251_v30 }
 0x37c   :  { %v7042_v54 = vunpack.c.l.b16 %v2252_v8  ;;  %v7044_v62 = vunpack.c.l.b16 %v2253_v27  ;;  %v1767_v23 = vmax.f32 %v6813_v5, %v1766_v51  ;;  %v2142_v46 = vpack.c.bf16 %v6840_v42, %v6840_v42 }
 0x37d   :  { %v2236_v49 = vperm.slane %v2140_v11, 0  ;;  %v2329_v5 = vsel %vm2315_vm12, %v7026_v7, %v7024_v38  ;;  %v2373_v51 = vsel %vm2315_vm12, %v7028_v19, %v7026_v7  ;;  %v2417_v6 = vsel %vm2315_vm12, %v7030_v57, %v7028_v19 }
 0x37e   :  { %v2141_v21 = vpack.c.bf16 %v1767_v23, %v1767_v23  ;;  %v2238_v22 = vperm.slane %v2142_v46, 0  ;;  %v2330_v56 = vsel %vm2317_vm13, %v7028_v19, %v2329_v5  ;;  %v2374_v9 = vsel %vm2317_vm13, %v7030_v57, %v2373_v51 }
 0x37f   :  { %v2276_v2 = vunpack.c.l.b16 %v2236_v49  ;;  %v2331_v13 = vsel %vm2319_vm14, %v7030_v57, %v2330_v56  ;;  %v2418_v61 = vsel %vm2317_vm13, %v7032_v45, %v2417_v6  ;;  %v2461_v10 = vsel %vm2315_vm12, %v7032_v45, %v7030_v57 }
 0x380   :  { %v2237_v42 = vperm.slane %v2141_v21, 0  ;;  %v2278_v11 = vunpack.c.l.b16 %v2238_v22  ;;  %v2332_v16 = vsel %vm2321_vm15, %v7032_v45, %v2331_v13  ;;  %v2375_v40 = vsel %vm2319_vm14, %v7032_v45, %v2374_v9 }
 0x381   :  { %v2316_v3 = vsel %vm2315_vm12, %v2276_v2, %v2275_v20  ;;  %v2419_v31 = vsel %vm2319_vm14, %v7034_v39, %v2418_v61  ;;  %v2333_v55 = vsel %vm2323_vm0, %v7034_v39, %v2332_v16  ;;  %v2376_v25 = vsel %vm2321_vm15, %v7034_v39, %v2375_v40 }
 0x382   :  { %v2277_v17 = vunpack.c.l.b16 %v2237_v42  ;;  %v2420_v47 = vsel %vm2321_vm15, %v7036_v35, %v2419_v31  ;;  %v2454_v43 = vsel %vm2315_vm12, %v7016_v48, %v2278_v11  ;;  %v2334_v37 = vsel %vm2325_vm1, %v7036_v35, %v2333_v55 }
 0x383   :  { %v2377_v30 = vsel %vm2323_vm0, %v7036_v35, %v2376_v25  ;;  %v7098_v27 = vsel %vm2327_vm2, %v7038_v24, %v2334_v37  ;;  %v2421_v6 = vsel %vm2323_vm0, %v7038_v24, %v2420_v47  ;;  %v2455_v55 = vsel %vm2317_vm13, %v7018_v59, %v2454_v43 }
 0x384   :  { %v2318_v32 = vsel %vm2317_vm13, %v2277_v17, %v2316_v3  ;;  %v2366_v26 = vsel %vm2315_vm12, %v2277_v17, %v2276_v2  ;;  %v2378_v23 = vsel %vm2325_vm1, %v7038_v24, %v2377_v30  ;;  %v2410_v22 = vsel %vm2315_vm12, %v2278_v11, %v2277_v17 }
 0x385   :  { %v2320_v8 = vsel %vm2319_vm14, %v2278_v11, %v2318_v32  ;;  %v2367_v20 = vsel %vm2317_vm13, %v2278_v11, %v2366_v26  ;;  %v2379_v21 = vsel %vm2327_vm2, %v7040_v4, %v2378_v23  ;;  %v2411_v51 = vsel %vm2317_vm13, %v7016_v48, %v2410_v22 }
 0x386   :  { %v2322_v46 = vsel %vm2321_vm15, %v7016_v48, %v2320_v8  ;;  %v2368_v49 = vsel %vm2319_vm14, %v7016_v48, %v2367_v20  ;;  %v2412_v11 = vsel %vm2319_vm14, %v7018_v59, %v2411_v51  ;;  %v2422_v56 = vsel %vm2325_vm1, %v7040_v4, %v2421_v6 }
 0x387   :  { %v2324_v2 = vsel %vm2323_vm0, %v7018_v59, %v2322_v46  ;;  %v2369_v5 = vsel %vm2321_vm15, %v7018_v59, %v2368_v49  ;;  %v2413_v61 = vsel %vm2321_vm15, %v7020_v60, %v2412_v11  ;;  %v2423_v17 = vsel %vm2327_vm2, %v7042_v54, %v2422_v56 }
 0x388   :  { %v2326_v42 = vsel %vm2325_vm1, %v7020_v60, %v2324_v2  ;;  %v2370_v3 = vsel %vm2323_vm0, %v7020_v60, %v2369_v5  ;;  %v2414_v31 = vsel %vm2323_vm0, %v7022_v52, %v2413_v61  ;;  %v2456_v32 = vsel %vm2319_vm14, %v7020_v60, %v2455_v55 }
 0x389   :  { %v2328_v13 = vsel %vm2327_vm2, %v7022_v52, %v2326_v42  ;;  %v2371_v9 = vsel %vm2325_vm1, %v7022_v52, %v2370_v3  ;;  %v2415_v47 = vsel %vm2325_vm1, %v7024_v38, %v2414_v31  ;;  %v2462_v37 = vsel %vm2317_vm13, %v7034_v39, %v2461_v10 }
 0x38a   :  { %v2356_v16 = vpack.c.b16 %v7098_v27, %v2328_v13  ;;  %v2372_v40 = vsel %vm2327_vm2, %v7024_v38, %v2371_v9  ;;  %v2416_v26 = vsel %vm2327_vm2, %v7026_v7, %v2415_v47  ;;  %v2457_v30 = vsel %vm2321_vm15, %v7022_v52, %v2456_v32 }
 0x38b   :  { %v2400_v25 = vpack.c.b16 %v2379_v21, %v2372_v40  ;;  %v2463_v8 = vsel %vm2319_vm14, %v7036_v35, %v2462_v37  ;;  %v2444_v43 = vpack.c.b16 %v2423_v17, %v2416_v26  ;;  %v2458_v20 = vsel %vm2323_vm0, %v7024_v38, %v2457_v30 }
 0x38c   :  { %v2464_v23 = vsel %vm2321_vm15, %v7038_v24, %v2463_v8  ;;  %v2459_v10 = vsel %vm2325_vm1, %v7026_v7, %v2458_v20  ;;  %v1678_v56 = vrot.slane %v6788_v33, 4  ;;  %v1883_v13 = vrot.slane %v6975_v36, 2 }
 0x38d   :  { %v2692_v46 = vrot.slane %v2400_v25, 6  ;;  %v2465_v49 = vsel %vm2323_vm0, %v7040_v4, %v2464_v23  ;;  %v2460_v21 = vsel %vm2327_vm2, %v7028_v19, %v2459_v10  ;;  %v2693_v2 = vrot.slane %v2444_v43, 4 }
 0x38e   :  { %v2466_v22 = vsel %vm2325_vm1, %v7042_v54, %v2465_v49  ;;  %v1891_v9 = vmax.f32 %v6977_v58, %v1890_v29  ;;  %v1894_v61 = vsel %vm1746_vm11, %v1677_v14, -inf  ;;  %v2498_v17 = vsel %vm2315_vm12, %v7018_v59, %v7016_v48 }
 0x38f   :  { %v2718_v5 = vsel %vm1746_vm11, %v2356_v16, %v2692_v46  ;;  %v2467_v51 = vsel %vm2327_vm2, %v7044_v62, %v2466_v22  ;;  %v2733_v6 = vsel %vm2732_vm6, %v2356_v16, %v2692_v46  ;;  %v2746_v42 = vsel %vm2719_vm4, %v2356_v16, %v2692_v46 }
 0x390   :  { %v2488_v3 = vpack.c.b16 %v2467_v51, %v2460_v21  ;;  %v2757_v11 = vsel %vm225_vm3, %v2692_v46, %v2356_v16  ;;  %v2505_v16 = vsel %vm2315_vm12, %v7034_v39, %v7032_v45  ;;  %v1884_v31 = vmax.f32 %v6975_v36, %v1883_v13 }
 0x391   :  { %v1895_v55 = vrot.slane %v1894_v61, 4  ;;  %v1901_v25 = vsel %vm1746_vm11, %v1678_v56, -inf  ;;  %v1892_v47 = vrot.slane %v1891_v9, 1  ;;  %v2499_v29 = vsel %vm2317_vm13, %v7020_v60, %v2498_v17 }
 0x392   :  { %v2694_v40 = vrot.slane %v2488_v3, 2  ;;  %v1902_v58 = vrot.slane %v1901_v25, 4  ;;  %v2506_v14 = vsel %vm2317_vm13, %v7036_v35, %v2505_v16  ;;  %v1885_v10 = vrot.slane %v1884_v31, 1 }
 0x393   :  { %v1893_v49 = vmax.f32 %v1891_v9, %v1892_v47  ;;  %v1896_v21 = vmax.f32 %v1894_v61, %v1895_v55  ;;  %v2500_v51 = vsel %vm2319_vm14, %v7022_v52, %v2499_v29  ;;  %v7210_v3 = vmul.f32 %v6756_v28, %v6745_v18 }
 0x394   :  { %v2722_v48 = vsel %vm2719_vm4, %v2693_v2, %v2694_v40  ;;  %v2735_v32 = vsel %vm225_vm3, %v2694_v40, %v2693_v2  ;;  %v2747_v37 = vsel %vm1746_vm11, %v2693_v2, %v2694_v40  ;;  %v2758_v26 = vsel %vm2732_vm6, %v2693_v2, %v2694_v40 }
 0x395   :  { %v2724_v36 = vsel %vm2723_vm5, %v2718_v5, %v2722_v48  ;;  %v2737_v30 = vsel %vm2736_vm7, %v2733_v6, %v2735_v32  ;;  %v2748_v8 = vsel %vm2723_vm5, %v2747_v37, %v2746_v42  ;;  %v2759_v43 = vsel %vm2736_vm7, %v2758_v26, %v2757_v11 }
 0x396   :  { %v2739_v20 = vrot.slane %v2737_v30, 2  ;;  %v2750_v23 = vrot.slane %v2748_v8, 4  ;;  %v2761_v46 = vrot.slane %v2759_v43, 6  ;;  %2991 = vst [vmem:[#allocation1] ss:$4 sm:$0xff] %v2724_v36  ;;  %v1903_v22 = vmax.f32 %v1901_v25, %v1902_v58 }
 0x397   :  { %v1886_v2 = vmax.f32 %v1884_v31, %v1885_v10  ;;  %v2501_v5 = vsel %vm2321_vm15, %v7024_v38, %v2500_v51  ;;  %v2507_v6 = vsel %vm2319_vm14, %v7038_v24, %v2506_v14  ;;  %v2542_v42 = vsel %vm2315_vm12, %v7020_v60, %v7018_v59 }
 0x398   :  { %2994 = vst [vmem:[#allocation1 + $0x1] ss:$4 sm:$0xff] %v2739_v20  ;;  %v1897_v11 = vrot.slane %v1896_v21, 2  ;;  %v1904_v56 = vrot.slane %v1903_v22, 2  ;;  %v2502_v13 = vsel %vm2323_vm0, %v7026_v7, %v2501_v5  ;;  %v2159_v61 = vpack.c.bf16 %v1893_v49, %v1893_v49 }
 0x399   :  { %2997 = vst [vmem:[#allocation1 + $0x2] ss:$4 sm:$0xff] %v2750_v23  ;;  %v2158_v9 = vpack.c.bf16 %v1886_v2, %v1886_v2  ;;  %v2508_v17 = vsel %vm2321_vm15, %v7040_v4, %v2507_v6  ;;  %v2543_v16 = vsel %vm2317_vm13, %v7022_v52, %v2542_v42  ;;  %v7220_v59 = vadd.f32 %v6761_v41, %v6779_v1 }
 0x39a   :  { %3000 = vst [vmem:[#allocation1 + $0x3] ss:$4 sm:$0xff] %v2761_v46  ;;  %v1691_v18 = vrot.slane %v6791_v34, 6  ;;  %v1898_v40 = vmax.f32 %v1896_v21, %v1897_v11  ;;  %v1905_v31 = vmax.f32 %v1903_v22, %v1904_v56  ;;  %v7226_v55 = vsel %vm1746_vm11, %v1697_v0, -inf }
 0x39b   :  { %v2503_v25 = vsel %vm2325_vm1, %v7028_v19, %v2502_v13  ;;  %v2544_v47 = vsel %vm2319_vm14, %v7024_v38, %v2543_v16  ;;  %v2549_v1 = vsel %vm2315_vm12, %v7036_v35, %v7034_v39  ;;  %v2254_v14 = vperm.slane %v2158_v9, 0 }
 0x39c   :  { %v1899_v58 = vrot.slane %v1898_v40, 1  ;;  %v1906_v29 = vrot.slane %v1905_v31, 1  ;;  %v2509_v48 = vsel %vm2323_vm0, %v7042_v54, %v2508_v17  ;;  %v2362_v32 = vperm.slane %v2159_v61, 0 }
 0x39d   :  { %v2545_v0 = vsel %vm2321_vm15, %v7026_v7, %v2544_v47  ;;  %v2550_v37 = vsel %vm2317_vm13, %v7038_v24, %v2549_v1  ;;  %v2586_v26 = vsel %vm2315_vm12, %v7022_v52, %v7020_v60  ;;  %v2510_v20 = vsel %vm2325_vm1, %v7044_v62, %v2509_v48 }
 0x39e   :  { %v1900_v36 = vmax.f32 %v1898_v40, %v1899_v58  ;;  %v1907_v30 = vmax.f32 %v1905_v31, %v1906_v29  ;;  %v2546_v8 = vsel %vm2323_vm0, %v7028_v19, %v2545_v0  ;;  %v2551_v43 = vsel %vm2319_vm14, %v7040_v4, %v2550_v37 }
 0x39f   :  { %v2547_v23 = vsel %vm2325_vm1, %v7030_v57, %v2546_v8  ;;  %v2552_v46 = vsel %vm2321_vm15, %v7042_v54, %v2551_v43  ;;  %v2587_v60 = vsel %vm2317_vm13, %v7024_v38, %v2586_v26  ;;  %v7256_v51 = vunpack.c.l.b16 %v2254_v14 }
 0x3a0   :  { %v2160_v21 = vpack.c.bf16 %v1900_v36, %v1900_v36  ;;  %v2161_v22 = vpack.c.bf16 %v1907_v30, %v1907_v30  ;;  %v2548_v2 = vsel %vm2327_vm2, %v7032_v45, %v2547_v23  ;;  %v7260_v6 = vunpack.c.l.b16 %v2362_v32 }
 0x3a1   :  { %v3012_v10 = vld.sshfl [vmem:[#allocation1] sm:$0xff pattern:$0x73625140]  ;;  %v3013_v49 = vld.sshfl [vmem:[#allocation1 + $0x8] sm:$0xff pattern:$0x73625140]  ;;  %v2553_v42 = vsel %vm2323_vm0, %v7044_v62, %v2552_v46  ;;  %v2588_v11 = vsel %vm2319_vm14, %v7026_v7, %v2587_v60  ;;  %v2593_v56 = vsel %vm2315_vm12, %v7038_v24, %v7036_v35  ;;  %v2630_v47 = vsel %vm2315_vm12, %v7024_v38, %v7022_v52 }
 0x3a2   :  { %3544 = vmatmul.bf16.vlgmr.msra.gmra.mxu3 %v3012_v10  ;;  %3567 = vmatmul.bf16.vlgmr.msrb.gmra.mxu1 %v3013_v49  ;;  %v3014_v5 = vld.sshfl [vmem:[#allocation1 + $0x10] sm:$0xff pattern:$0x73625140]  ;;  %v2406_v13 = vperm.slane %v2160_v21, 0  ;;  %v2450_v9 = vperm.slane %v2161_v22, 0  ;;  %v2554_v61 = vsel %vm2325_vm1, %v7256_v51, %v2553_v42  ;;  %v2589_v17 = vsel %vm2321_vm15, %v7028_v19, %v2588_v11 }
 0x3a3   :  { %3590 = vmatmul.bf16.vlgmr.msrb.gmra.mxu2 %v3014_v5  ;;  %v2555_v16 = vsel %vm2327_vm2, %v7260_v6, %v2554_v61  ;;  %v2590_v40 = vsel %vm2323_vm0, %v7030_v57, %v2589_v17  ;;  %v2594_v31 = vsel %vm2317_vm13, %v7040_v4, %v2593_v56  ;;  %v2504_v58 = vsel %vm2327_vm2, %v7030_v57, %v2503_v25 }
 0x3a4   :  { %v7282_v1 = vunpack.c.l.b16 %v2406_v13  ;;  %v2511_v29 = vsel %vm2327_vm2, %v7256_v51, %v2510_v20  ;;  %v2591_v14 = vsel %vm2325_vm1, %v7032_v45, %v2590_v40  ;;  %v2576_v48 = vpack.c.b16 %v2555_v16, %v2548_v2 }
 0x3a5   :  { %v2595_v32 = vsel %vm2319_vm14, %v7042_v54, %v2594_v31  ;;  %v2631_v0 = vsel %vm2317_vm13, %v7026_v7, %v2630_v47  ;;  %v2637_v52 = vsel %vm2315_vm12, %v7040_v4, %v7038_v24  ;;  %v7297_v38 = vunpack.c.l.b16 %v2450_v9 }
 0x3a6   :  { %v2596_v25 = vsel %vm2321_vm15, %v7044_v62, %v2595_v32  ;;  %v2632_v37 = vsel %vm2319_vm14, %v7028_v19, %v2631_v0  ;;  %v2638_v26 = vsel %vm2317_vm13, %v7042_v54, %v2637_v52  ;;  %v2592_v36 = vsel %vm2327_vm2, %v7034_v39, %v2591_v14 }
 0x3a7   :  { %v2597_v7 = vsel %vm2323_vm0, %v7256_v51, %v2596_v25  ;;  %v2633_v24 = vsel %vm2321_vm15, %v7030_v57, %v2632_v37  ;;  %v2639_v30 = vsel %vm2319_vm14, %v7044_v62, %v2638_v26  ;;  %v1623_v20 = vmul.f32 %v6756_v28, %v6741_v12 }
 0x3a8   :  { %v2598_v8 = vsel %vm2325_vm1, %v7260_v6, %v2597_v7  ;;  %v2634_v19 = vsel %vm2323_vm0, %v7032_v45, %v2633_v24  ;;  %v2640_v43 = vsel %vm2321_vm15, %v7256_v51, %v2639_v30  ;;  %v2695_v60 = vrot.slane %v2576_v48, 6 }
 0x3a9   :  { %v2599_v23 = vsel %vm2327_vm2, %v7282_v1, %v2598_v8  ;;  %v2635_v57 = vsel %vm2325_vm1, %v7034_v39, %v2634_v19  ;;  %v2641_v46 = vsel %vm2323_vm0, %v7260_v6, %v2640_v43  ;;  %v2077_v10 = vrot.slane %v7226_v55, 4 }
 0x3aa   :  { %v2620_v49 = vpack.c.b16 %v2599_v23, %v2592_v36  ;;  %v2636_v45 = vsel %vm2327_vm2, %v7036_v35, %v2635_v57  ;;  %v2642_v21 = vsel %vm2325_vm1, %v7282_v1, %v2641_v46  ;;  %v2532_v12 = vpack.c.b16 %v2511_v29, %v2504_v58 }
 0x3ab   :  { %v2643_v22 = vsel %vm2327_vm2, %v7297_v38, %v2642_v21  ;;  %v1624_v39 = vmul.f32 %v6756_v28, %v6739_v44  ;;  %v1628_v2 = vmul.f32 %v6756_v28, %v6725_v63  ;;  %v1641_v11 = vadd.f32 %v6761_v41, %v1623_v20 }
 0x3ac   :  { %v2664_v5 = vpack.c.b16 %v2643_v22, %v2636_v45  ;;  %v2696_v42 = vrot.slane %v2620_v49, 4  ;;  %v1679_v56 = vrot.slane %v6788_v33, 6  ;;  %v2727_v35 = vsel %vm1746_vm11, %v2532_v12, %v2695_v60 }
 0x3ad   :  { %v2740_v13 = vsel %vm2732_vm6, %v2532_v12, %v2695_v60  ;;  %v2751_v9 = vsel %vm2719_vm4, %v2532_v12, %v2695_v60  ;;  %v2762_v61 = vsel %vm225_vm3, %v2695_v60, %v2532_v12  ;;  %v7345_v44 = vadd.f32 %v6761_v41, %v1624_v39 }
 0x3ae   :  { %v2697_v17 = vrot.slane %v2664_v5, 2  ;;  %v7348_v63 = vadd.f32 %v6761_v41, %v1628_v2  ;;  %v1689_v16 = vrot.slane %v6791_v34, 2  ;;  %v1683_v40 = vrot.slane %v1641_v11, 2 }
 0x3af   :  { %v1684_v31 = vrot.slane %v1641_v11, 4  ;;  %v1685_v33 = vrot.slane %v1641_v11, 6  ;;  %v1690_v47 = vrot.slane %v6791_v34, 4  ;;  %v1686_v36 = vrot.slane %v7345_v44, 2 }
 0x3b0   :  { %v2730_v58 = vsel %vm2719_vm4, %v2696_v42, %v2697_v17  ;;  %v2741_v29 = vsel %vm225_vm3, %v2697_v17, %v2696_v42  ;;  %v2752_v14 = vsel %vm1746_vm11, %v2696_v42, %v2697_v17  ;;  %v2763_v48 = vsel %vm2732_vm6, %v2696_v42, %v2697_v17 }
 0x3b1   :  { %v2731_v32 = vsel %vm2723_vm5, %v2727_v35, %v2730_v58  ;;  %v2742_v41 = vsel %vm2736_vm7, %v2740_v13, %v2741_v29  ;;  %v2753_v0 = vsel %vm2723_vm5, %v2752_v14, %v2751_v9  ;;  %v2764_v52 = vsel %vm2736_vm7, %v2763_v48, %v2762_v61 }
 0x3b2   :  { %v2744_v25 = vrot.slane %v2742_v41, 2  ;;  %v2755_v37 = vrot.slane %v2753_v0, 4  ;;  %v2766_v26 = vrot.slane %v2764_v52, 6  ;;  %3002 = vst [vmem:[#allocation1 + $0x20] ss:$4 sm:$0xff] %v2731_v32  ;;  %v1687_v7 = vrot.slane %v7345_v44, 4 }
 0x3b3   :  { %v1688_v24 = vrot.slane %v7345_v44, 6  ;;  %v1692_v30 = vrot.slane %v7220_v59, 2  ;;  %v1693_v8 = vrot.slane %v7220_v59, 4  ;;  %v1694_v19 = vrot.slane %v7220_v59, 6 }
 0x3b4   :  { %3005 = vst [vmem:[#allocation1 + $0x21] ss:$4 sm:$0xff] %v2744_v25  ;;  %v1908_v43 = vsel %vm1746_vm11, %v1679_v56, -inf  ;;  %v1943_v20 = vsel %vm1746_vm11, %v1641_v11, -inf  ;;  %v1950_v23 = vsel %vm1746_vm11, %v1683_v40, -inf  ;;  %v1957_v49 = vsel %vm1746_vm11, %v1684_v31, -inf }
 0x3b5   :  { %3008 = vst [vmem:[#allocation1 + $0x22] ss:$4 sm:$0xff] %v2755_v37  ;;  %v1909_v57 = vrot.slane %v1908_v43, 4  ;;  %v1944_v46 = vrot.slane %v1943_v20, 4  ;;  %v1951_v60 = vrot.slane %v1950_v23, 4  ;;  %v1958_v45 = vrot.slane %v1957_v49, 4 }
 0x3b6   :  { %3011 = vst [vmem:[#allocation1 + $0x23] ss:$4 sm:$0xff] %v2766_v26  ;;  %v1964_v21 = vsel %vm1746_vm11, %v1685_v33, -inf  ;;  %v1971_v12 = vsel %vm1746_vm11, %v7345_v44, -inf  ;;  %v1978_v22 = vsel %vm1746_vm11, %v1686_v36, -inf  ;;  %v1985_v13 = vsel %vm1746_vm11, %v1687_v7, -inf }
 0x3b7   :  { %v1910_v39 = vmax.f32 %v1908_v43, %v1909_v57  ;;  %v1945_v2 = vmax.f32 %v1943_v20, %v1944_v46  ;;  %v1952_v5 = vmax.f32 %v1950_v23, %v1951_v60  ;;  %v1965_v42 = vrot.slane %v1964_v21, 4  ;;  %v5928_v37 = vld [vmem:[%s8846_s4] ss:$0 sm:$0xff] }
 0x3b8   :  { %v1959_v11 = vmax.f32 %v1957_v49, %v1958_v45  ;;  %v1972_v56 = vrot.slane %v1971_v12, 4  ;;  %v1979_v35 = vrot.slane %v1978_v22, 4  ;;  %v1986_v29 = vrot.slane %v1985_v13, 4 }
 0x3b9   :  { %v1911_v9 = vrot.slane %v1910_v39, 2  ;;  %v1946_v61 = vrot.slane %v1945_v2, 2  ;;  %v1953_v17 = vrot.slane %v1952_v5, 2  ;;  %v1966_v40 = vmax.f32 %v1964_v21, %v1965_v42 }
 0x3ba   :  { %v1960_v31 = vrot.slane %v1959_v11, 2  ;;  %v1973_v33 = vmax.f32 %v1971_v12, %v1972_v56  ;;  %v1980_v58 = vmax.f32 %v1978_v22, %v1979_v35  ;;  %v1987_v25 = vmax.f32 %v1985_v13, %v1986_v29 }
 0x3bb   :  { %v1912_v44 = vmax.f32 %v1910_v39, %v1911_v9  ;;  %v1947_v14 = vmax.f32 %v1945_v2, %v1946_v61  ;;  %v7375_v48 = vmax.f32 %v1952_v5, %v1953_v17  ;;  %v1967_v32 = vrot.slane %v1966_v40, 2 }
 0x3bc   :  { %v7377_v41 = vmax.f32 %v1959_v11, %v1960_v31  ;;  %v1974_v0 = vrot.slane %v1973_v33, 2  ;;  %v1981_v52 = vrot.slane %v1980_v58, 2  ;;  %v7383_v26 = vadd.f32 %v5928_v37, %v7210_v3 }
 0x3bd   :  { %v3019_v36 = vld.sshfl [vmem:[#allocation1 + $0x38] sm:$0xff pattern:$0x73625140]  ;;  %v1695_v7 = vrot.slane %v6794_v53, 2  ;;  %v1913_v43 = vrot.slane %v1912_v44, 1  ;;  %v1948_v20 = vrot.slane %v1947_v14, 1  ;;  %v1968_v23 = vmax.f32 %v1966_v40, %v1967_v32 }
 0x3be   :  { %3705 = vmatmul.bf16.vlgmr.msrb.gmra.mxu0 %v3019_v36  ;;  %v1975_v57 = vmax.f32 %v1973_v33, %v1974_v0  ;;  %v1982_v46 = vmax.f32 %v1980_v58, %v1981_v52  ;;  %v1988_v60 = vrot.slane %v1987_v25, 2  ;;  %v1696_v49 = vrot.slane %v6794_v53, 4 }
 0x3bf   :  { %v1698_v45 = vrot.slane %v7348_v63, 2  ;;  %v7390_v3 = vmax.f32 %v1912_v44, %v1913_v43  ;;  %v1955_v22 = vrot.slane %v7375_v48, 1  ;;  %v1962_v39 = vrot.slane %v7377_v41, 1 }
 0x3c0   :  { %v1989_v2 = vmax.f32 %v1987_v25, %v1988_v60  ;;  %v7394_v5 = vmax.f32 %v1947_v14, %v1948_v20  ;;  %v1992_v42 = vsel %vm1746_vm11, %v1688_v24, -inf  ;;  %v1999_v11 = vsel %vm1746_vm11, %v6791_v34, -inf }
 0x3c1   :  { %v2006_v56 = vsel %vm1746_vm11, %v1689_v16, -inf  ;;  %v1969_v35 = vrot.slane %v1968_v23, 1  ;;  %v1976_v13 = vrot.slane %v1975_v57, 1  ;;  %v1983_v9 = vrot.slane %v1982_v46, 1 }
 0x3c2   :  { %v1993_v61 = vrot.slane %v1992_v42, 4  ;;  %v2000_v17 = vrot.slane %v1999_v11, 4  ;;  %v2007_v40 = vrot.slane %v2006_v56, 4  ;;  %v2013_v31 = vsel %vm1746_vm11, %v1690_v47, -inf }
 0x3c3   :  { %v2020_v24 = vsel %vm1746_vm11, %v1691_v18, -inf  ;;  %v1990_v33 = vrot.slane %v1989_v2, 1  ;;  %v2014_v29 = vrot.slane %v2013_v31, 4  ;;  %v2027_v32 = vsel %vm1746_vm11, %v7220_v59, -inf }
 0x3c4   :  { %v1994_v58 = vmax.f32 %v1992_v42, %v1993_v61  ;;  %v2021_v44 = vrot.slane %v2020_v24, 4  ;;  %v2001_v14 = vmax.f32 %v1999_v11, %v2000_v17  ;;  %v2008_v16 = vmax.f32 %v2006_v56, %v2007_v40 }
 0x3c5   :  { %v2034_v0 = vsel %vm1746_vm11, %v1692_v30, -inf  ;;  %v2015_v25 = vmax.f32 %v2013_v31, %v2014_v29  ;;  %v2028_v37 = vrot.slane %v2027_v32, 4  ;;  %v2041_v43 = vsel %vm1746_vm11, %v1693_v8, -inf }
 0x3c6   :  { %v1995_v52 = vrot.slane %v1994_v58, 2  ;;  %v2022_v47 = vmax.f32 %v2020_v24, %v2021_v44  ;;  %v2002_v34 = vrot.slane %v2001_v14, 2  ;;  %v2009_v36 = vrot.slane %v2008_v16, 2 }
 0x3c7   :  { %v2035_v18 = vrot.slane %v2034_v0, 4  ;;  %v2016_v60 = vrot.slane %v2015_v25, 2  ;;  %v2029_v11 = vmax.f32 %v2027_v32, %v2028_v37  ;;  %v2042_v40 = vrot.slane %v2041_v43, 4 }
 0x3c8   :  { %v1996_v20 = vmax.f32 %v1994_v58, %v1995_v52  ;;  %v2023_v42 = vrot.slane %v2022_v47, 2  ;;  %v2003_v56 = vmax.f32 %v2001_v14, %v2002_v34  ;;  %v2010_v61 = vmax.f32 %v2008_v16, %v2009_v36 }
 0x3c9   :  { %v2036_v17 = vmax.f32 %v2034_v0, %v2035_v18  ;;  %v2017_v15 = vmax.f32 %v2015_v25, %v2016_v60  ;;  %v2030_v24 = vrot.slane %v2029_v11, 2  ;;  %v7417_v29 = vmax.f32 %v7375_v48, %v1955_v22 }
 0x3ca   :  { %v1997_v30 = vrot.slane %v1996_v20, 1  ;;  %v2024_v31 = vmax.f32 %v2022_v47, %v2023_v42  ;;  %v2004_v44 = vrot.slane %v2003_v56, 1  ;;  %v2011_v12 = vrot.slane %v2010_v61, 1 }
 0x3cb   :  { %v2043_v21 = vmax.f32 %v2041_v43, %v2042_v40  ;;  %v7420_v8 = vmax.f32 %v7377_v41, %v1962_v39  ;;  %v7422_v58 = vmax.f32 %v1968_v23, %v1969_v35  ;;  %v7424_v32 = vmax.f32 %v1975_v57, %v1976_v13 }
 0x3cc   :  { %v2037_v14 = vrot.slane %v2036_v17, 2  ;;  %v7426_v16 = vmax.f32 %v1982_v46, %v1983_v9  ;;  %v7428_v0 = vmax.f32 %v1989_v2, %v1990_v33  ;;  %v2018_v52 = vrot.slane %v2017_v15, 1 }
 0x3cd   :  { %v2031_v25 = vmax.f32 %v2029_v11, %v2030_v24  ;;  %v7430_v47 = vmax.f32 %v1996_v20, %v1997_v30  ;;  %v7432_v48 = vmax.f32 %v2003_v56, %v2004_v44  ;;  %v2025_v22 = vrot.slane %v2024_v31, 1 }
 0x3ce   :  { %v2048_v41 = vsel %vm1746_vm11, %v1694_v19, -inf  ;;  %v7437_v23 = vmax.f32 %v2010_v61, %v2011_v12  ;;  %v2044_v57 = vrot.slane %v2043_v21, 2  ;;  %v2055_v46 = vsel %vm1746_vm11, %v6794_v53, -inf }
 0x3cf   :  { %v2049_v39 = vrot.slane %v2048_v41, 4  ;;  %v2038_v2 = vmax.f32 %v2036_v17, %v2037_v14  ;;  %v2056_v35 = vrot.slane %v2055_v46, 4  ;;  %v2062_v13 = vsel %vm1746_vm11, %v1695_v7, -inf }
 0x3d0   :  { %v2069_v9 = vsel %vm1746_vm11, %v1696_v49, -inf  ;;  %v7447_v59 = vmax.f32 %v2017_v15, %v2018_v52  ;;  %v2032_v19 = vrot.slane %v2031_v25, 1  ;;  %v2063_v33 = vrot.slane %v2062_v13, 4 }
 0x3d1   :  { %v2050_v12 = vmax.f32 %v2048_v41, %v2049_v39  ;;  %v2057_v37 = vmax.f32 %v2055_v46, %v2056_v35  ;;  %v2070_v34 = vrot.slane %v2069_v9, 4  ;;  %v2078_v36 = vmax.f32 %v7226_v55, %v2077_v10 }
 0x3d2   :  { %v2083_v18 = vsel %vm1746_vm11, %v7348_v63, -inf  ;;  %v2045_v43 = vmax.f32 %v2043_v21, %v2044_v57  ;;  %v2064_v20 = vmax.f32 %v2062_v13, %v2063_v33  ;;  %v2090_v42 = vsel %vm1746_vm11, %v1698_v45, -inf }
 0x3d3   :  { %v2051_v7 = vrot.slane %v2050_v12, 2  ;;  %v2084_v53 = vrot.slane %v2083_v18, 4  ;;  %v2058_v60 = vrot.slane %v2057_v37, 2  ;;  %v2071_v49 = vmax.f32 %v2069_v9, %v2070_v34 }
 0x3d4   :  { %v2079_v15 = vrot.slane %v2078_v36, 2  ;;  %v2065_v56 = vrot.slane %v2064_v20, 2  ;;  %v2091_v17 = vrot.slane %v2090_v42, 4  ;;  %v8859_v30 = vrot.slane %v7348_v63, 4 }
 0x3d5   :  { %v2052_v11 = vmax.f32 %v2050_v12, %v2051_v7  ;;  %v2085_v61 = vmax.f32 %v2083_v18, %v2084_v53  ;;  %v2059_v40 = vmax.f32 %v2057_v37, %v2058_v60  ;;  %v2072_v55 = vrot.slane %v2071_v49, 2 }
 0x3d6   :  { %v2080_v10 = vmax.f32 %v2078_v36, %v2079_v15  ;;  %v2097_v21 = vsel %vm1746_vm11, %v8859_v30, -inf  ;;  %v2039_v24 = vrot.slane %v2038_v2, 1  ;;  %v2066_v44 = vmax.f32 %v2064_v20, %v2065_v56 }
 0x3d7   :  { %v2086_v14 = vrot.slane %v2085_v61, 2  ;;  %v2092_v52 = vmax.f32 %v2090_v42, %v2091_v17  ;;  %v2046_v41 = vrot.slane %v2045_v43, 1  ;;  %v2053_v57 = vrot.slane %v2052_v11, 1 }
 0x3d8   :  { %v2073_v39 = vmax.f32 %v2071_v49, %v2072_v55  ;;  %v2098_v46 = vrot.slane %v2097_v21, 4  ;;  %v2060_v45 = vrot.slane %v2059_v40, 1  ;;  %v2081_v35 = vrot.slane %v2080_v10, 1 }
 0x3d9   :  { %v2087_v13 = vmax.f32 %v2085_v61, %v2086_v14  ;;  %v2093_v9 = vrot.slane %v2092_v52, 2  ;;  %v7460_v12 = vmax.f32 %v2024_v31, %v2025_v22  ;;  %v2067_v33 = vrot.slane %v2066_v44, 1 }
 0x3da   :  { %v2074_v37 = vrot.slane %v2073_v39, 1  ;;  %v2099_v34 = vmax.f32 %v2097_v21, %v2098_v46  ;;  %v2033_v36 = vmax.f32 %v2031_v25, %v2032_v19  ;;  %v8860_v20 = vrot.slane %v7348_v63, 6 }
 0x3db   :  { %v2088_v18 = vrot.slane %v2087_v13, 1  ;;  %v2094_v7 = vmax.f32 %v2092_v52, %v2093_v9  ;;  %v2040_v60 = vmax.f32 %v2038_v2, %v2039_v24  ;;  %v2047_v15 = vmax.f32 %v2045_v43, %v2046_v41 }
 0x3dc   :  { %v2104_v53 = vsel %vm1746_vm11, %v8860_v20, -inf  ;;  %v2100_v49 = vrot.slane %v2099_v34, 2  ;;  %v2054_v56 = vmax.f32 %v2052_v11, %v2053_v57  ;;  %v2061_v17 = vmax.f32 %v2059_v40, %v2060_v45 }
 0x3dd   :  { %v2105_v42 = vrot.slane %v2104_v53, 4  ;;  %v2082_v61 = vmax.f32 %v2080_v10, %v2081_v35  ;;  %v2095_v55 = vrot.slane %v2094_v7, 1  ;;  %v2068_v31 = vmax.f32 %v2066_v44, %v2067_v33 }
 0x3de   :  { %v2075_v22 = vmax.f32 %v2073_v39, %v2074_v37  ;;  %v2101_v30 = vmax.f32 %v2099_v34, %v2100_v49  ;;  %v7465_v21 = vmax.f32 %v2087_v13, %v2088_v18  ;;  %v2162_v25 = vpack.c.bf16 %v7390_v3, %v7390_v3 }
 0x3df   :  { %v2106_v14 = vmax.f32 %v2104_v53, %v2105_v42  ;;  %v2167_v63 = vpack.c.bf16 %v7394_v5, %v7394_v5  ;;  %v2168_v2 = vpack.c.bf16 %v7417_v29, %v7417_v29  ;;  %v2169_v11 = vpack.c.bf16 %v7420_v8, %v7420_v8 }
 0x3e0   :  { %v2102_v19 = vrot.slane %v2101_v30, 1  ;;  %v2170_v40 = vpack.c.bf16 %v7422_v58, %v7422_v58  ;;  %v7477_v10 = vmax.f32 %v2094_v7, %v2095_v55  ;;  %v2171_v24 = vpack.c.bf16 %v7424_v32, %v7424_v32 }
 0x3e1   :  { %v2107_v43 = vrot.slane %v2106_v14, 2  ;;  %v2172_v44 = vpack.c.bf16 %v7426_v16, %v7426_v16  ;;  %v2173_v5 = vpack.c.bf16 %v7428_v0, %v7428_v0  ;;  %v2174_v8 = vpack.c.bf16 %v7430_v47, %v7430_v47 }
 0x3e2   :  { %v7485_v29 = vmax.f32 %v2101_v30, %v2102_v19  ;;  %v2175_v58 = vpack.c.bf16 %v7432_v48, %v7432_v48  ;;  %v2176_v41 = vpack.c.bf16 %v7437_v23, %v7437_v23  ;;  %v2177_v32 = vpack.c.bf16 %v7447_v59, %v7447_v59 }
 0x3e3   :  { %v2108_v52 = vmax.f32 %v2106_v14, %v2107_v43  ;;  %v2178_v16 = vpack.c.bf16 %v7460_v12, %v7460_v12  ;;  %v2179_v57 = vpack.c.bf16 %v2033_v36, %v2033_v36  ;;  %v2180_v39 = vpack.c.bf16 %v2040_v60, %v2040_v60 }
 0x3e4   :  { %v2181_v46 = vpack.c.bf16 %v2047_v15, %v2047_v15  ;;  %v2182_v45 = vpack.c.bf16 %v2054_v56, %v2054_v56  ;;  %v2183_v35 = vpack.c.bf16 %v2061_v17, %v2061_v17  ;;  %v2184_v13 = vpack.c.bf16 %v2068_v31, %v2068_v31 }
 0x3e5   :  { %v2109_v0 = vrot.slane %v2108_v52, 1  ;;  %v2185_v47 = vpack.c.bf16 %v2075_v22, %v2075_v22  ;;  %v2186_v9 = vpack.c.bf16 %v2082_v61, %v2082_v61  ;;  %v2187_v48 = vpack.c.bf16 %v7465_v21, %v7465_v21 }
 0x3e6   :  { %v2188_v23 = vpack.c.bf16 %v7477_v10, %v7477_v10  ;;  %v2189_v59 = vpack.c.bf16 %v7485_v29, %v7485_v29  ;;  %v2255_v12 = vperm.slane %v2167_v63, 0  ;;  %v2256_v37 = vperm.slane %v2168_v2, 0 }
 0x3e7   :  { %v7497_v33 = vmax.f32 %v2108_v52, %v2109_v0  ;;  %v2257_v34 = vperm.slane %v2169_v11, 0  ;;  %v2258_v36 = vperm.slane %v2170_v40, 0  ;;  %v2259_v18 = vperm.slane %v2171_v24, 0 }
 0x3e8   :  { %v2260_v7 = vperm.slane %v2172_v44, 0  ;;  %v2261_v20 = vperm.slane %v2173_v5, 0  ;;  %v2262_v53 = vperm.slane %v2174_v8, 0  ;;  %v2263_v15 = vperm.slane %v2175_v58, 0 }
 0x3e9   :  { %v2190_v60 = vpack.c.bf16 %v7497_v33, %v7497_v33  ;;  %v2264_v49 = vperm.slane %v2176_v41, 0  ;;  %v2265_v42 = vperm.slane %v2177_v32, 0  ;;  %v2266_v56 = vperm.slane %v2178_v16, 0 }
 0x3ea   :  { %v2267_v17 = vperm.slane %v2179_v57, 0  ;;  %v2268_v61 = vperm.slane %v2180_v39, 0  ;;  %v2269_v55 = vperm.slane %v2181_v46, 0  ;;  %v2270_v31 = vperm.slane %v2182_v45, 0 }
 0x3eb   :  { %v2271_v22 = vperm.slane %v2183_v35, 0  ;;  %v2272_v30 = vperm.slane %v2184_v13, 0  ;;  %v2273_v14 = vperm.slane %v2185_v47, 0  ;;  %v2274_v63 = vperm.slane %v2186_v9, 0 }
 0x3ec   :  { %v2295_v2 = vunpack.c.l.b16 %v2255_v12  ;;  %v2296_v19 = vunpack.c.l.b16 %v2256_v37  ;;  %v2297_v43 = vunpack.c.l.b16 %v2257_v34  ;;  %v7507_v11 = vunpack.c.l.b16 %v2258_v36 }
 0x3ed   :  { %v7509_v40 = vunpack.c.l.b16 %v2259_v18  ;;  %v7511_v24 = vunpack.c.l.b16 %v2264_v49  ;;  %v7513_v44 = vunpack.c.l.b16 %v2265_v42  ;;  %v7515_v5 = vunpack.c.l.b16 %v2260_v7 }
 0x3ee   :  { %v7517_v52 = vunpack.c.l.b16 %v2261_v20  ;;  %v7519_v8 = vunpack.c.l.b16 %v2262_v53  ;;  %v7521_v58 = vunpack.c.l.b16 %v2263_v15  ;;  %v7523_v41 = vunpack.c.l.b16 %v2266_v56 }
 0x3ef   :  { %v7525_v32 = vunpack.c.l.b16 %v2267_v17  ;;  %v7527_v16 = vunpack.c.l.b16 %v2272_v30  ;;  %v2336_v57 = vsel %vm2315_vm12, %v7042_v54, %v7040_v4  ;;  %v7532_v0 = vunpack.c.l.b16 %v2268_v61 }
 0x3f0   :  { %v7534_v39 = vunpack.c.l.b16 %v2269_v55  ;;  %v2339_v46 = vsel %vm2315_vm12, %v2296_v19, %v2295_v2  ;;  %v2346_v45 = vsel %vm2315_vm12, %v7511_v24, %v7521_v58  ;;  %v7540_v35 = vunpack.c.l.b16 %v2270_v31 }
 0x3f1   :  { %v7542_v13 = vunpack.c.l.b16 %v2271_v22  ;;  %v2340_v47 = vsel %vm2317_vm13, %v2297_v43, %v2339_v46  ;;  %v2347_v9 = vsel %vm2317_vm13, %v7513_v44, %v2346_v45  ;;  %v7547_v4 = vunpack.c.l.b16 %v2273_v14 }
 0x3f2   :  { %v2337_v12 = vsel %vm2317_vm13, %v7044_v62, %v2336_v57  ;;  %v2341_v37 = vsel %vm2319_vm14, %v7507_v11, %v2340_v47  ;;  %v2348_v34 = vsel %vm2319_vm14, %v7523_v41, %v2347_v9  ;;  %v7555_v36 = vunpack.c.l.b16 %v2274_v63 }
 0x3f3   :  { %v2342_v18 = vsel %vm2321_vm15, %v7509_v40, %v2341_v37  ;;  %v2349_v7 = vsel %vm2321_vm15, %v7525_v32, %v2348_v34  ;;  %v2353_v20 = vsel %vm2315_vm12, %v7527_v16, %v7542_v13  ;;  %v2380_v49 = vsel %vm2315_vm12, %v7044_v62, %v7042_v54 }
 0x3f4   :  { %v2343_v53 = vsel %vm2323_vm0, %v7515_v5, %v2342_v18  ;;  %v2350_v15 = vsel %vm2323_vm0, %v7532_v0, %v2349_v7  ;;  %v2383_v42 = vsel %vm2315_vm12, %v2297_v43, %v2296_v19  ;;  %v7574_v56 = vsel %vm2319_vm14, %v7256_v51, %v2337_v12 }
 0x3f5   :  { %v2344_v17 = vsel %vm2325_vm1, %v7517_v52, %v2343_v53  ;;  %v2351_v61 = vsel %vm2325_vm1, %v7534_v39, %v2350_v15  ;;  %v2384_v55 = vsel %vm2317_vm13, %v7507_v11, %v2383_v42  ;;  %v2354_v31 = vsel %vm2317_vm13, %v7547_v4, %v2353_v20 }
 0x3f6   :  { %v2363_v54 = vperm.slane %v2187_v48, 0  ;;  %v2381_v22 = vsel %vm2317_vm13, %v7256_v51, %v2380_v49  ;;  %v2385_v30 = vsel %vm2319_vm14, %v7509_v40, %v2384_v55  ;;  %v2345_v14 = vsel %vm2327_vm2, %v7519_v8, %v2344_v17 }
 0x3f7   :  { %v7595_v63 = vsel %vm2327_vm2, %v7540_v35, %v2351_v61  ;;  %v2386_v2 = vsel %vm2321_vm15, %v7515_v5, %v2385_v30  ;;  %v2390_v21 = vsel %vm2315_vm12, %v7513_v44, %v7511_v24  ;;  %v2357_v48 = vpack.c.b16 %v7574_v56, %v7574_v56 }
 0x3f8   :  { %v2387_v19 = vsel %vm2323_vm0, %v7517_v52, %v2386_v2  ;;  %v2391_v57 = vsel %vm2317_vm13, %v7523_v41, %v2390_v21  ;;  %v2424_v46 = vsel %vm2315_vm12, %v7256_v51, %v7044_v62  ;;  %v7613_v45 = vsel %vm2319_vm14, %v7555_v36, %v2354_v31 }
 0x3f9   :  { %v2388_v47 = vsel %vm2325_vm1, %v7519_v8, %v2387_v19  ;;  %v2392_v9 = vsel %vm2319_vm14, %v7525_v32, %v2391_v57  ;;  %v2427_v12 = vsel %vm2315_vm12, %v7507_v11, %v2297_v43  ;;  %v7622_v37 = vpack.c.b16 %v7595_v63, %v2345_v14 }
 0x3fa   :  { %v7624_v34 = vunpack.c.l.b16 %v2363_v54  ;;  %v2382_v62 = vsel %vm2319_vm14, %v7260_v6, %v2381_v22  ;;  %v2393_v18 = vsel %vm2321_vm15, %v7532_v0, %v2392_v9  ;;  %v2425_v20 = vsel %vm2317_vm13, %v7260_v6, %v2424_v46 }
 0x3fb   :  { %v2394_v7 = vsel %vm2323_vm0, %v7534_v39, %v2393_v18  ;;  %v2428_v43 = vsel %vm2317_vm13, %v7509_v40, %v2427_v12  ;;  %v2434_v53 = vsel %vm2315_vm12, %v7523_v41, %v7513_v44  ;;  %v2389_v15 = vsel %vm2327_vm2, %v7521_v58, %v2388_v47 }
 0x3fc   :  { %v2407_v49 = vperm.slane %v2188_v23, 0  ;;  %v2429_v42 = vsel %vm2319_vm14, %v7515_v5, %v2428_v43  ;;  %v2435_v17 = vsel %vm2317_vm13, %v7525_v32, %v2434_v53  ;;  %v2395_v61 = vsel %vm2325_vm1, %v7540_v35, %v2394_v7 }
 0x3fd   :  { %v2430_v55 = vsel %vm2321_vm15, %v7517_v52, %v2429_v42  ;;  %v2436_v31 = vsel %vm2319_vm14, %v7532_v0, %v2435_v17  ;;  %v2468_v10 = vsel %vm2315_vm12, %v7260_v6, %v7256_v51  ;;  %v2426_v23 = vsel %vm2319_vm14, %v7282_v1, %v2425_v20 }
 0x3fe   :  { %v2431_v54 = vsel %vm2323_vm0, %v7519_v8, %v2430_v55  ;;  %v2437_v22 = vsel %vm2321_vm15, %v7534_v39, %v2436_v31  ;;  %v2451_v30 = vperm.slane %v2189_v59, 0  ;;  %v2469_v51 = vsel %vm2317_vm13, %v7282_v1, %v2468_v10 }
 0x3ff   :  { %v2432_v14 = vsel %vm2325_vm1, %v7521_v58, %v2431_v54  ;;  %v2438_v2 = vsel %vm2323_vm0, %v7540_v35, %v2437_v22  ;;  %v2471_v21 = vsel %vm2315_vm12, %v7509_v40, %v7507_v11  ;;  %v2396_v19 = vsel %vm2327_vm2, %v7542_v13, %v2395_v61 }
 0x400   :  { %v2439_v29 = vsel %vm2325_vm1, %v7542_v13, %v2438_v2  ;;  %v2470_v59 = vsel %vm2319_vm14, %v7297_v38, %v2469_v51  ;;  %v2472_v57 = vsel %vm2317_vm13, %v7515_v5, %v2471_v21  ;;  %v2433_v46 = vsel %vm2327_vm2, %v7511_v24, %v2432_v14  ;;  %v7723_v2 = vld.sshfl [vmem:[#allocation1 + $0x20] sm:$0xff pattern:$0x73625140] }
 0x401   :  { %v2440_v47 = vsel %vm2327_vm2, %v7527_v16, %v2439_v29  ;;  %v2473_v11 = vsel %vm2319_vm14, %v7517_v52, %v2472_v57  ;;  %v2478_v9 = vsel %vm2315_vm12, %v7525_v32, %v7523_v41  ;;  %v2401_v12 = vpack.c.b16 %v2382_v62, %v2382_v62 }
 0x402   :  { %v7692_v18 = vunpack.c.l.b16 %v2407_v49  ;;  %v2474_v7 = vsel %vm2321_vm15, %v7519_v8, %v2473_v11  ;;  %v2479_v20 = vsel %vm2317_vm13, %v7532_v0, %v2478_v9  ;;  %v2445_v43 = vpack.c.b16 %v2426_v23, %v2426_v23 }
 0x403   :  { %v2475_v53 = vsel %vm2323_vm0, %v7521_v58, %v2474_v7  ;;  %v2480_v42 = vsel %vm2319_vm14, %v7534_v39, %v2479_v20  ;;  %v2489_v17 = vpack.c.b16 %v2470_v59, %v2470_v59  ;;  %v2402_v61 = vpack.c.b16 %v2396_v19, %v2389_v15  ;;  %v7729_v19 = vld.sshfl [vmem:[#allocation1 + $0x28] sm:$0xff pattern:$0x73625140] }
 0x404   :  { %v2446_v55 = vpack.c.b16 %v2440_v47, %v2433_v46  ;;  %v2476_v62 = vsel %vm2325_vm1, %v7511_v24, %v2475_v53  ;;  %v2481_v49 = vsel %vm2321_vm15, %v7540_v35, %v2480_v42  ;;  %v7706_v31 = vunpack.c.l.b16 %v2451_v30  ;;  %v7737_v47 = vld.sshfl [vmem:[#allocation1 + $0x30] sm:$0xff pattern:$0x73625140] }
 0x405   :  { %v2477_v10 = vsel %vm2327_vm2, %v7513_v44, %v2476_v62  ;;  %v2482_v23 = vsel %vm2323_vm0, %v7542_v13, %v2481_v49  ;;  %v2495_v54 = vperm.slane %v2190_v60, 0  ;;  %v2674_v22 = vsel %vm2321_vm15, %v7260_v6, %v7574_v56 }
 0x406   :  { %v2483_v15 = vsel %vm2325_vm1, %v7527_v16, %v2482_v23  ;;  %v2681_v30 = vsel %vm2321_vm15, %v7624_v34, %v7613_v45  ;;  %v2698_v14 = vrot.slane %v2401_v12, 6  ;;  %v2699_v60 = vrot.slane %v2445_v43, 4 }
 0x407   :  { %v2484_v51 = vsel %vm2327_vm2, %v7547_v4, %v2483_v15  ;;  %v2682_v33 = vsel %vm2323_vm0, %v7692_v18, %v2681_v30  ;;  %v2700_v21 = vrot.slane %v2489_v17, 2  ;;  %v7733_v57 = vrot.slane %v2402_v61, 6 }
 0x408   :  { %v2490_v29 = vpack.c.b16 %v2484_v51, %v2477_v10  ;;  %v2683_v59 = vsel %vm2325_vm1, %v7706_v31, %v2682_v33  ;;  %v7735_v46 = vrot.slane %v2446_v55, 4  ;;  %v2494_v11 = vperm.slane %v2162_v25, 0 }
 0x409   :  { %v7742_v9 = vunpack.c.l.b16 %v2495_v54  ;;  %v2770_v12 = vsel %vm1746_vm11, %v2357_v48, %v2698_v14  ;;  %v2773_v7 = vsel %vm2719_vm4, %v2699_v60, %v2700_v21  ;;  %v2675_v20 = vsel %vm2323_vm0, %v7282_v1, %v2674_v22 }
 0x40a   :  { %v7751_v43 = vrot.slane %v2490_v29, 2  ;;  %v2774_v53 = vsel %vm2723_vm5, %v2770_v12, %v2773_v7  ;;  %v2784_v3 = vsel %vm1746_vm11, %v7622_v37, %v7733_v57  ;;  %v2796_v56 = vsel %vm2732_vm6, %v7622_v37, %v7733_v57 }
 0x40b   :  { %v2684_v25 = vsel %vm2327_vm2, %v7742_v9, %v2683_v59  ;;  %v2807_v48 = vsel %vm2719_vm4, %v7622_v37, %v7733_v57  ;;  %3028 = vst [vmem:[#allocation1 + $0x20] ss:$4 sm:$0xff] %v2774_v53  ;;  %v1680_v42 = vrot.slane %v7383_v26, 2  ;;  %v1681_v62 = vrot.slane %v7383_v26, 4 }
 0x40c   :  { %v2787_v17 = vsel %vm2719_vm4, %v7735_v46, %v7751_v43  ;;  %v2797_v61 = vsel %vm225_vm3, %v7751_v43, %v7735_v46  ;;  %v2808_v55 = vsel %vm1746_vm11, %v7735_v46, %v7751_v43  ;;  %v7779_v54 = vunpack.c.l.b16 %v2494_v11 }
 0x40d   :  { %v2788_v49 = vsel %vm2723_vm5, %v2784_v3, %v2787_v17  ;;  %v2798_v10 = vsel %vm2736_vm7, %v2796_v56, %v2797_v61  ;;  %v2809_v23 = vsel %vm2723_vm5, %v2808_v55, %v2807_v48  ;;  %v2676_v15 = vsel %vm2325_vm1, %v7297_v38, %v2675_v20 }
 0x40e   :  { %v7784_v22 = vpack.c.b16 %v2684_v25, %v7595_v63  ;;  %v2800_v30 = vrot.slane %v2798_v10, 2  ;;  %3029 = vst [vmem:[#allocation1 + $0x21] ss:$4 sm:$0xff] %v2788_v49  ;;  %v2811_v14 = vrot.slane %v2809_v23, 4  ;;  %v1682_v51 = vrot.slane %v7383_v26, 6 }
 0x40f   :  { %v1915_v33 = vsel %vm1746_vm11, %v7383_v26, -inf  ;;  %v1922_v60 = vsel %vm1746_vm11, %v1680_v42, -inf  ;;  %v1929_v59 = vsel %vm1746_vm11, %v1681_v62, -inf  ;;  %v7793_v11 = vsel %vm2327_vm2, %v7779_v54, %v2676_v15 }
 0x410   :  { %3031 = vst [vmem:[#allocation1 + $0x22] ss:$4 sm:$0xff] %v2800_v30  ;;  %v1916_v21 = vrot.slane %v1915_v33, 4  ;;  %v1923_v29 = vrot.slane %v1922_v60, 4  ;;  %v1930_v63 = vrot.slane %v1929_v59, 4  ;;  %v1936_v12 = vsel %vm1746_vm11, %v1682_v51, -inf }
 0x411   :  { %3033 = vst [vmem:[#allocation1 + $0x23] ss:$4 sm:$0xff] %v2811_v14  ;;  %v2515_v7 = vsel %vm2315_vm12, %v7515_v5, %v7509_v40  ;;  %v1937_v53 = vrot.slane %v1936_v12, 4  ;;  %v2512_v3 = vsel %vm2315_vm12, %v7282_v1, %v7260_v6  ;;  %v2806_v25 = vrot.slane %v7784_v22, 2 }
 0x412   :  { %v1917_v26 = vmax.f32 %v1915_v33, %v1916_v21  ;;  %v1924_v20 = vmax.f32 %v1922_v60, %v1923_v29  ;;  %v1931_v56 = vmax.f32 %v1929_v59, %v1930_v63  ;;  %v2516_v48 = vsel %vm2317_vm13, %v7517_v52, %v2515_v7 }
 0x413   :  { %v2522_v42 = vsel %vm2315_vm12, %v7532_v0, %v7525_v32  ;;  %v1938_v40 = vmax.f32 %v1936_v12, %v1937_v53  ;;  %v2517_v55 = vsel %vm2319_vm14, %v7519_v8, %v2516_v48  ;;  %v2513_v6 = vsel %vm2317_vm13, %v7297_v38, %v2512_v3 }
 0x414   :  { %v1918_v17 = vrot.slane %v1917_v26, 2  ;;  %v1925_v61 = vrot.slane %v1924_v20, 2  ;;  %v1932_v62 = vrot.slane %v1931_v56, 2  ;;  %v2518_v49 = vsel %vm2321_vm15, %v7521_v58, %v2517_v55 }
 0x415   :  { %v2523_v10 = vsel %vm2317_vm13, %v7534_v39, %v2522_v42  ;;  %v1939_v30 = vrot.slane %v1938_v40, 2  ;;  %v2519_v14 = vsel %vm2323_vm0, %v7511_v24, %v2518_v49  ;;  %v2817_v51 = vrot.slane %v7784_v22, 4 }
 0x416   :  { %v1919_v23 = vmax.f32 %v1917_v26, %v1918_v17  ;;  %v1926_v15 = vmax.f32 %v1924_v20, %v1925_v61  ;;  %v1933_v33 = vmax.f32 %v1931_v56, %v1932_v62  ;;  %v2520_v60 = vsel %vm2325_vm1, %v7513_v44, %v2519_v14 }
 0x417   :  { %v2524_v21 = vsel %vm2319_vm14, %v7540_v35, %v2523_v10  ;;  %v1940_v63 = vmax.f32 %v1938_v40, %v1939_v30  ;;  %v7825_v12 = vsel %vm2319_vm14, %v7779_v54, %v2513_v6  ;;  %v2556_v26 = vsel %vm2315_vm12, %v7297_v38, %v7282_v1 }
 0x418   :  { %v3035_v29 = vld.sshfl [vmem:[#allocation1 + $0x20] sm:$0xff pattern:$0x73625140]  ;;  %v3036_v59 = vld.sshfl [vmem:[#allocation1 + $0x28] sm:$0xff pattern:$0x73625140]  ;;  %v2525_v7 = vsel %vm2321_vm15, %v7542_v13, %v2524_v21  ;;  %v7838_v61 = vsel %vm2327_vm2, %v7523_v41, %v2520_v60  ;;  %v2559_v1 = vsel %vm2315_vm12, %v7517_v52, %v7515_v5  ;;  %v2566_v40 = vsel %vm2315_vm12, %v7534_v39, %v7532_v0 }
 0x419   :  { %3549 = vmatmul.bf16.gmra.mxu3 %v3035_v29  ;;  %3572 = vmatmul.bf16.gmra.mxu1 %v3036_v59  ;;  %v1920_v20 = vrot.slane %v1919_v23, 1  ;;  %v1927_v53 = vrot.slane %v1926_v15, 1  ;;  %v1934_v3 = vrot.slane %v1933_v33, 1  ;;  %v3037_v56 = vld.sshfl [vmem:[#allocation1 + $0x30] sm:$0xff pattern:$0x73625140]  ;;  %v2526_v48 = vsel %vm2323_vm0, %v7527_v16, %v2525_v7 }
 0x41a   :  { %v1941_v42 = vrot.slane %v1940_v63, 1  ;;  %v7834_v17 = vld.sshfl [vmem:[#allocation1 + $0x38] sm:$0xff pattern:$0x73625140]  ;;  %3595 = vmatmul.bf16.gmra.mxu2 %v3037_v56  ;;  %v2557_v49 = vsel %vm2317_vm13, %v7779_v54, %v2556_v26  ;;  %v7851_v30 = vsel %vm2325_vm1, %v7547_v4, %v2526_v48  ;;  %v2560_v5 = vsel %vm2317_vm13, %v7519_v8, %v2559_v1 }
 0x41b   :  { %v1921_v55 = vmax.f32 %v1919_v23, %v1920_v20  ;;  %v1928_v62 = vmax.f32 %v1926_v15, %v1927_v53  ;;  %v1935_v6 = vmax.f32 %v1933_v33, %v1934_v3  ;;  %3048 = vst [vmem:[#allocation1 + $0x21] ss:$4 sm:$0xff] %v7784_v22  ;;  %v2567_v14 = vsel %vm2317_vm13, %v7540_v35, %v2566_v40 }
 0x41c   :  { %v1942_v10 = vmax.f32 %v1940_v63, %v1941_v42  ;;  %3050 = vst [vmem:[#allocation1 + $0x22] ss:$4 sm:$0xff] %v2806_v25  ;;  %v2561_v60 = vsel %vm2319_vm14, %v7521_v58, %v2560_v5  ;;  %v2568_v29 = vsel %vm2319_vm14, %v7542_v13, %v2567_v14  ;;  %v2600_v59 = vsel %vm2315_vm12, %v7779_v54, %v7297_v38 }
 0x41d   :  { %v2163_v23 = vpack.c.bf16 %v1921_v55, %v1921_v55  ;;  %v2164_v15 = vpack.c.bf16 %v1928_v62, %v1928_v62  ;;  %v2165_v33 = vpack.c.bf16 %v1935_v6, %v1935_v6  ;;  %3052 = vst [vmem:[#allocation1 + $0x23] ss:$4 sm:$0xff] %v2817_v51  ;;  %v2562_v25 = vsel %vm2321_vm15, %v7511_v24, %v2561_v60 }
 0x41e   :  { %v2166_v21 = vpack.c.bf16 %v1942_v10, %v1942_v10  ;;  %v2563_v51 = vsel %vm2323_vm0, %v7513_v44, %v2562_v25  ;;  %v2569_v3 = vsel %vm2321_vm15, %v7527_v16, %v2568_v29  ;;  %v2603_v56 = vsel %vm2315_vm12, %v7519_v8, %v7517_v52 }
 0x41f   :  { %v2538_v63 = vperm.slane %v2163_v23, 0  ;;  %v2582_v7 = vperm.slane %v2164_v15, 0  ;;  %v2626_v26 = vperm.slane %v2165_v33, 0  ;;  %v2564_v53 = vsel %vm2325_vm1, %v7523_v41, %v2563_v51 }
 0x420   :  { %v2670_v20 = vperm.slane %v2166_v21, 0  ;;  %v2565_v1 = vsel %vm2327_vm2, %v7525_v32, %v2564_v53  ;;  %v2570_v55 = vsel %vm2323_vm0, %v7547_v4, %v2569_v3  ;;  %v2604_v62 = vsel %vm2317_vm13, %v7521_v58, %v2603_v56  ;;  %v5835_v53 = vld [vmem:[%s8848_s5 + $0x178] sm:$0xff] }
 0x421   :  { %v2540_v48 = vunpack.c.l.b16 %v2538_v63  ;;  %v2584_v42 = vunpack.c.l.b16 %v2582_v7  ;;  %v2628_v38 = vunpack.c.l.b16 %v2626_v26  ;;  %v2610_v6 = vsel %vm2315_vm12, %v7540_v35, %v7534_v39  ;;  %v5827_v63 = vld [vmem:[%s8848_s5 + $0x138] sm:$0xff]  ;;  %3651 = vmatpush.bf16.msra.mxu2 %v5835_v53 }
 0x422   :  { %v2672_v40 = vunpack.c.l.b16 %v2670_v20  ;;  %v2571_v5 = vsel %vm2325_vm1, %v7555_v36, %v2570_v55  ;;  %v2605_v29 = vsel %vm2319_vm14, %v7511_v24, %v2604_v62  ;;  %v5818_v55 = vld [vmem:[%s8848_s5 + $0xf0] sm:$0xff]  ;;  %3628 = vmatpush.bf16.msra.mxu1 %v5827_v63 }
 0x423   :  { %v2678_v10 = vsel %vm2315_vm12, %v2584_v42, %v2540_v48  ;;  %v2558_v52 = vsel %vm2319_vm14, %v2540_v48, %v2557_v49  ;;  %v2601_v14 = vsel %vm2317_vm13, %v2540_v48, %v2600_v59  ;;  %v2572_v15 = vsel %vm2327_vm2, %v7624_v34, %v2571_v5  ;;  %v5819_v59 = vld [vmem:[%s8848_s5 + $0xf8] sm:$0xff]  ;;  %v5826_v5 = vld [vmem:[%s8848_s5 + $0x130] sm:$0xff] }
 0x424   :  { %v2679_v23 = vsel %vm2317_vm13, %v2628_v38, %v2678_v10  ;;  %v2577_v33 = vpack.c.b16 %v2558_v52, %v2558_v52  ;;  %v2602_v60 = vsel %vm2319_vm14, %v2584_v42, %v2601_v14  ;;  %v2578_v25 = vpack.c.b16 %v2572_v15, %v2565_v1  ;;  %3605 = vmatpush.bf16.msrb.mxu3 %v5819_v59 }
 0x425   :  { %v2680_v21 = vsel %vm2319_vm14, %v2672_v40, %v2679_v23  ;;  %v2611_v49 = vsel %vm2317_vm13, %v7542_v13, %v2610_v6  ;;  %v2606_v26 = vsel %vm2321_vm15, %v7513_v44, %v2605_v29  ;;  %v2621_v20 = vpack.c.b16 %v2602_v60, %v2602_v60 }
 0x426   :  { %v2689_v7 = vpack.c.b16 %v2680_v21, %v2680_v21  ;;  %v2612_v51 = vsel %vm2319_vm14, %v7527_v16, %v2611_v49  ;;  %v2607_v3 = vsel %vm2323_vm0, %v7523_v41, %v2606_v26  ;;  %v2644_v1 = vsel %vm2315_vm12, %v2540_v48, %v7779_v54  ;;  %3629 = vmatpush.bf16.msra.mxu1 %v5826_v5 }
 0x427   :  { %v2613_v56 = vsel %vm2321_vm15, %v7547_v4, %v2612_v51  ;;  %v2647_v40 = vsel %vm2315_vm12, %v7521_v58, %v7519_v8  ;;  %v2608_v62 = vsel %vm2325_vm1, %v7525_v32, %v2607_v3  ;;  %v2645_v10 = vsel %vm2317_vm13, %v2584_v42, %v2644_v1 }
 0x428   :  { %3046 = vst [vmem:[#allocation1 + $0x20] ss:$4 sm:$0xff] %v2689_v7  ;;  %v2614_v6 = vsel %vm2323_vm0, %v7555_v36, %v2613_v56  ;;  %v2648_v54 = vsel %vm2317_vm13, %v7511_v24, %v2647_v40  ;;  %v2609_v8 = vsel %vm2327_vm2, %v7532_v0, %v2608_v62  ;;  %v2646_v48 = vsel %vm2319_vm14, %v2628_v38, %v2645_v10  ;;  %v7947_v38 = vld.sshfl [vmem:[#allocation1 + $0x18] sm:$0xff pattern:$0x73625140]  ;;  %v5824_v62 = vld [vmem:[%s8848_s5 + $0x120] sm:$0xff] }
 0x429   :  { %v2615_v58 = vsel %vm2325_vm1, %v7624_v34, %v2614_v6  ;;  %v2649_v52 = vsel %vm2319_vm14, %v7513_v44, %v2648_v54  ;;  %v2654_v14 = vsel %vm2315_vm12, %v7542_v13, %v7540_v35  ;;  %v2665_v23 = vpack.c.b16 %v2646_v48, %v2646_v48  ;;  %v5834_v44 = vld [vmem:[%s8848_s5 + $0x170] sm:$0xff]  ;;  %3606 = vmatpush.bf16.msrb.mxu3 %v5818_v55  ;;  %v5817_v13 = vld [vmem:[%s8848_s5 + $0xe8] sm:$0xff]  ;;  %v5832_v10 = vld [vmem:[%s8848_s5 + $0x160] sm:$0xff] }
 0x42a   :  { %v2616_v42 = vsel %vm2327_vm2, %v7692_v18, %v2615_v58  ;;  %v2650_v24 = vsel %vm2321_vm15, %v7523_v41, %v2649_v52  ;;  %v2528_v15 = vsel %vm2327_vm2, %v7555_v36, %v7851_v30  ;;  %v2655_v41 = vsel %vm2317_vm13, %v7527_v16, %v2654_v14  ;;  %3652 = vmatpush.bf16.msra.mxu2 %v5834_v44 }
 0x42b   :  { %v2651_v60 = vsel %vm2323_vm0, %v7525_v32, %v2650_v24  ;;  %v2688_v35 = vpack.c.b16 %v7793_v11, %v7098_v27  ;;  %v2622_v21 = vpack.c.b16 %v2616_v42, %v2609_v8  ;;  %v2656_v30 = vsel %vm2319_vm14, %v7547_v4, %v2655_v41  ;;  %v5825_v27 = vld [vmem:[%s8848_s5 + $0x128] sm:$0xff] }
 0x42c   :  { %v2652_v29 = vsel %vm2325_vm1, %v7532_v0, %v2651_v60  ;;  %v2701_v49 = vrot.slane %v2577_v33, 6  ;;  %v2657_v32 = vsel %vm2321_vm15, %v7555_v36, %v2656_v30  ;;  %v2702_v59 = vrot.slane %v2621_v20, 4  ;;  %3630 = vmatpush.bf16.msra.mxu1 %v5825_v27 }
 0x42d   :  { %v2703_v63 = vrot.slane %v2665_v23, 2  ;;  %v2707_v7 = vrot.slane %v2578_v25, 6  ;;  %3021 = vst [vmem:[#allocation1] ss:$4 sm:$0xff] %v2688_v35  ;;  %v2533_v11 = vpack.c.b16 %v7825_v12, %v7825_v12  ;;  %v2653_v0 = vsel %vm2327_vm2, %v7534_v39, %v2652_v29  ;;  %v5833_v25 = vld [vmem:[%s8848_s5 + $0x168] sm:$0xff]  ;;  %3607 = vmatpush.bf16.msrb.mxu3 %v5817_v13  ;;  %v5816_v39 = vld [vmem:[%s8848_s5 + $0xe0] sm:$0xff] }
 0x42e   :  { %v2658_v33 = vsel %vm2323_vm0, %v7624_v34, %v2657_v32  ;;  %v2745_v26 = vrot.slane %v2688_v35, 2  ;;  %v2534_v51 = vpack.c.b16 %v2528_v15, %v7838_v61  ;;  %v2756_v53 = vrot.slane %v2688_v35, 4  ;;  %3653 = vmatpush.bf16.msra.mxu2 %v5833_v25  ;;  %v5929_v29 = vld [vmem:[%s8846_s4] ss:$0 sm:$0xff] }
 0x42f   :  { %v2659_v20 = vsel %vm2325_vm1, %v7692_v18, %v2658_v33  ;;  %v2767_v3 = vrot.slane %v2688_v35, 6  ;;  %v2777_v56 = vsel %vm1746_vm11, %v2533_v11, %v2701_v49  ;;  %v2708_v40 = vrot.slane %v2622_v21, 4  ;;  %v8036_v49 = vld.sshfl [vmem:[#allocation1 + $0x20] sm:$0xff pattern:$0x73625140] }
 0x430   :  { %v2660_v12 = vsel %vm2327_vm2, %v7706_v31, %v2659_v20  ;;  %3023 = vst [vmem:[#allocation1 + $0x1] ss:$4 sm:$0xff] %v2745_v26  ;;  %v2780_v61 = vsel %vm2719_vm4, %v2702_v59, %v2703_v63  ;;  %v2801_v55 = vsel %vm2732_vm6, %v2534_v51, %v2707_v7  ;;  %v2823_v6 = vsel %vm225_vm3, %v2707_v7, %v2534_v51 }
 0x431   :  { %v2666_v1 = vpack.c.b16 %v2660_v12, %v2653_v0  ;;  %3025 = vst [vmem:[#allocation1 + $0x2] ss:$4 sm:$0xff] %v2756_v53  ;;  %v2397_v54 = vsel %vm2315_vm12, %v7547_v4, %v7527_v16  ;;  %v2441_v8 = vsel %vm2315_vm12, %v7555_v36, %v7547_v4  ;;  %3608 = vmatpush.bf16.msrb.mxu3 %v5816_v39 }
 0x432   :  { %3027 = vst [vmem:[#allocation1 + $0x3] ss:$4 sm:$0xff] %v2767_v3  ;;  %v2398_v48 = vsel %vm2317_vm13, %v7555_v36, %v2397_v54  ;;  %v2442_v52 = vsel %vm2317_vm13, %v7624_v34, %v2441_v8  ;;  %v2485_v5 = vsel %vm2315_vm12, %v7624_v34, %v7555_v36  ;;  %v2791_v42 = vsel %vm1746_vm11, %v2534_v51, %v2707_v7 }
 0x433   :  { %v2709_v58 = vrot.slane %v2666_v1, 2  ;;  %v2812_v16 = vsel %vm2719_vm4, %v2534_v51, %v2707_v7  ;;  %v2399_v24 = vsel %vm2319_vm14, %v7624_v34, %v2398_v48  ;;  %v1629_v4 = vmul.f32 %v6756_v28, %v6723_v50  ;;  %3631 = vmatpush.bf16.msra.mxu1 %v5824_v62  ;;  %3654 = vmatpush.bf16.msra.mxu2 %v5832_v10 }
 0x434   :  { %v2486_v36 = vsel %vm2317_vm13, %v7692_v18, %v2485_v5  ;;  %v2443_v50 = vsel %vm2319_vm14, %v7692_v18, %v2442_v52  ;;  %v2781_v35 = vsel %vm2723_vm5, %v2777_v56, %v2780_v61  ;;  %v2403_v7 = vpack.c.b16 %v2399_v24, %v2399_v24 }
 0x435   :  { %v2802_v14 = vsel %vm225_vm3, %v2709_v58, %v2708_v40  ;;  %v2813_v23 = vsel %vm1746_vm11, %v2708_v40, %v2709_v58  ;;  %v2824_v44 = vsel %vm2732_vm6, %v2708_v40, %v2709_v58  ;;  %v2794_v15 = vsel %vm2719_vm4, %v2708_v40, %v2709_v58 }
 0x436   :  { %v2803_v60 = vsel %vm2736_vm7, %v2801_v55, %v2802_v14  ;;  %v2825_v41 = vsel %vm2736_vm7, %v2824_v44, %v2823_v6  ;;  %v2814_v13 = vsel %vm2723_vm5, %v2813_v23, %v2812_v16  ;;  %v2487_v21 = vsel %vm2319_vm14, %v7706_v31, %v2486_v36  ;;  %v5831_v16 = vld [vmem:[%s8848_s5 + $0x158] sm:$0xff] }
 0x437   :  { %v2827_v28 = vrot.slane %v2825_v41, 6  ;;  %v1647_v30 = vadd.f32 %v5929_v29, %v1629_v4  ;;  %v2795_v32 = vsel %vm2723_vm5, %v2791_v42, %v2794_v15  ;;  %v2805_v59 = vrot.slane %v2803_v60, 2  ;;  %v5823_v42 = vld [vmem:[%s8848_s5 + $0x118] sm:$0xff]  ;;  %v5814_v15 = vld [vmem:[%s8848_s5 + $0xd0] sm:$0xff]  ;;  %3655 = vmatpush.bf16.msra.mxu2 %v5831_v16 }
 0x438   :  { %v2447_v27 = vpack.c.b16 %v2443_v50, %v2443_v50  ;;  %v2491_v11 = vpack.c.b16 %v2487_v21, %v2487_v21  ;;  %v2818_v25 = vsel %vm225_vm3, %v7733_v57, %v7622_v37  ;;  %v2816_v51 = vrot.slane %v2814_v13, 4  ;;  %3632 = vmatpush.bf16.msra.mxu1 %v5823_v42  ;;  %v5822_v60 = vld [vmem:[%s8848_s5 + $0x110] sm:$0xff] }
 0x439   :  { %v8039_v63 = vld.sshfl [vmem:[#allocation1] sm:$0xff pattern:$0x73625140]  ;;  %3062 = vst [vmem:[#allocation1 + $0x20] ss:$4 sm:$0xff] %v2827_v28  ;;  %v1701_v0 = vrot.slane %v1647_v30, 2  ;;  %v2819_v56 = vsel %vm2732_vm6, %v7735_v46, %v7751_v43  ;;  %v2359_v58 = vpack.c.b16 %v7613_v45, %v7613_v45 }
 0x43a   :  { %3039 = vst [vmem:[#allocation1] ss:$4 sm:$0xff] %v2781_v35  ;;  %v1702_v33 = vrot.slane %v1647_v30, 4  ;;  %v1703_v26 = vrot.slane %v1647_v30, 6  ;;  %v2111_v20 = vsel %vm1746_vm11, %v1647_v30, -inf  ;;  %v2710_v57 = vrot.slane %v2403_v7, 6 }
 0x43b   :  { %3040 = vst [vmem:[#allocation1 + $0x1] ss:$4 sm:$0xff] %v2795_v32  ;;  %v2112_v53 = vrot.slane %v2111_v20, 4  ;;  %v2118_v39 = vsel %vm1746_vm11, %v1701_v0, -inf  ;;  %v2711_v61 = vrot.slane %v2447_v27, 4  ;;  %v2712_v55 = vrot.slane %v2491_v11, 2 }
 0x43c   :  { %3042 = vst [vmem:[#allocation1 + $0x2] ss:$4 sm:$0xff] %v2805_v59  ;;  %v2125_v12 = vsel %vm1746_vm11, %v1702_v33, -inf  ;;  %v2132_v3 = vsel %vm1746_vm11, %v1703_v26, -inf  ;;  %v2119_v1 = vrot.slane %v2118_v39, 4  ;;  %v2820_v8 = vsel %vm2736_vm7, %v2819_v56, %v2818_v25  ;;  %v5815_v43 = vld [vmem:[%s8848_s5 + $0xd8] sm:$0xff]  ;;  %3633 = vmatpush.bf16.msra.mxu1 %v5822_v60 }
 0x43d   :  { %3044 = vst [vmem:[#allocation1 + $0x3] ss:$4 sm:$0xff] %v2816_v51  ;;  %v2126_v40 = vrot.slane %v2125_v12, 4  ;;  %v2133_v37 = vrot.slane %v2132_v3, 4  ;;  %v2113_v62 = vmax.f32 %v2111_v20, %v2112_v53  ;;  %v2831_v24 = vsel %vm1746_vm11, %v2359_v58, %v2710_v57  ;;  %3609 = vmatpush.bf16.msrb.mxu3 %v5815_v43  ;;  %v5830_v41 = vld [vmem:[%s8848_s5 + $0x150] sm:$0xff]  ;;  %v5821_v11 = vld [vmem:[%s8848_s5 + $0x108] sm:$0xff] }
 0x43e   :  { %v2120_v6 = vmax.f32 %v2118_v39, %v2119_v1  ;;  %v2834_v45 = vsel %vm2719_vm4, %v2711_v61, %v2712_v55  ;;  %v2822_v14 = vrot.slane %v2820_v8, 6  ;;  %v2529_v35 = vsel %vm2315_vm12, %v7692_v18, %v7624_v34  ;;  %v5813_v34 = vld [vmem:[%s8848_s5 + $0xc8] sm:$0xff]  ;;  %3656 = vmatpush.bf16.msra.mxu2 %v5830_v41  ;;  %v5812_v55 = vld [vmem:[%s8848_s5 + $0xc0] sm:$0xff] }
 0x43f   :  { %v2127_v10 = vmax.f32 %v2125_v12, %v2126_v40  ;;  %v2134_v54 = vmax.f32 %v2132_v3, %v2133_v37  ;;  %v2114_v48 = vrot.slane %v2113_v62, 2  ;;  %v2835_v13 = vsel %vm2723_vm5, %v2831_v24, %v2834_v45  ;;  %v5829_v51 = vld [vmem:[%s8848_s5 + $0x148] sm:$0xff]  ;;  %v5843_v45 = vld [vmem:[%s8848_s5 + $0x1b8] sm:$0xff] }
 0x440   :  { %v2121_v52 = vrot.slane %v2120_v6, 2  ;;  %v2530_v27 = vsel %vm2317_vm13, %v7706_v31, %v2529_v35  ;;  %v2573_v20 = vsel %vm2315_vm12, %v7706_v31, %v7692_v18  ;;  %3634 = vmatpush.bf16.msra.mxu1 %v5821_v11  ;;  %v2617_v18 = vsel %vm2315_vm12, %v7742_v9, %v7706_v31  ;;  %v5857_v11 = vld [vmem:[%s8848_s5 + $0x228] sm:$0xff] }
 0x441   :  { %v2128_v5 = vrot.slane %v2127_v10, 2  ;;  %v2135_v46 = vrot.slane %v2134_v54, 2  ;;  %v2115_v4 = vmax.f32 %v2113_v62, %v2114_v48  ;;  %3610 = vmatpush.bf16.msrb.mxu3 %v5814_v15  ;;  %v2531_v56 = vsel %vm2319_vm14, %v7742_v9, %v2530_v27  ;;  %v5820_v62 = vld [vmem:[%s8848_s5 + $0x100] sm:$0xff] }
 0x442   :  { %v2122_v23 = vmax.f32 %v2120_v6, %v2121_v52  ;;  %3657 = vmatpush.bf16.msra.mxu2 %v5829_v51  ;;  %v2574_v61 = vsel %vm2317_vm13, %v7742_v9, %v2573_v20  ;;  %v5828_v6 = vld [vmem:[%s8848_s5 + $0x140] sm:$0xff]  ;;  %v2828_v52 = vrot.slane %v7784_v22, 6  ;;  %v5859_v22 = vld [vmem:[%s8848_s5 + $0x238] sm:$0xff]  ;;  %vm3748_vm3 = vcmask 326656  }
 0x443   :  { %v2129_v44 = vmax.f32 %v2127_v10, %v2128_v5  ;;  %v2136_v36 = vmax.f32 %v2134_v54, %v2135_v46  ;;  %v2116_v30 = vrot.slane %v2115_v4, 1  ;;  %v2535_v5 = vpack.c.b16 %v2531_v56, %v2531_v56  ;;  %v5839_v51 = vld [vmem:[%s8848_s5 + $0x198] sm:$0xff] }
 0x444   :  { %v3056_v50 = vld.sshfl [vmem:[#allocation1 + $0x18] sm:$0xff pattern:$0x73625140]  ;;  %v8074_v28 = vld.sshfl [vmem:[#allocation1] sm:$0xff pattern:$0x73625140]  ;;  %3635 = vmatpush.bf16.msra.mxu1 %v5820_v62 }
 0x445   :  { %3710 = vmatmul.bf16.gmra.mxu0 %v3056_v50  ;;  %v8080_v21 = vld.sshfl [vmem:[#allocation1 + $0x8] sm:$0xff pattern:$0x73625140]  ;;  %v8082_v29 = vld.sshfl [vmem:[#allocation1 + $0x10] sm:$0xff pattern:$0x73625140]  ;;  %v2117_v0 = vmax.f32 %v2115_v4, %v2116_v30  ;;  %3611 = vmatpush.bf16.msrb.mxu3 %v5813_v34 }
 0x446   :  { %3059 = vst [vmem:[#allocation1] ss:$4 sm:$0xff] %v2822_v14  ;;  %v2123_v32 = vrot.slane %v2122_v23, 1  ;;  %v2130_v59 = vrot.slane %v2129_v44, 1  ;;  %v2137_v7 = vrot.slane %v2136_v36, 1  ;;  %3658 = vmatpush.bf16.msra.mxu2 %v5828_v6  ;;  %v5858_v30 = vld [vmem:[%s8848_s5 + $0x230] sm:$0xff] }
 0x447   :  { %3060 = vst [vmem:[#allocation1 + $0x1] ss:$4 sm:$0xff] %v2835_v13  ;;  %v2191_v53 = vpack.c.bf16 %v2117_v0, %v2117_v0  ;;  %v5842_v13 = vld [vmem:[%s8848_s5 + $0x1b0] sm:$0xff]  ;;  %v5841_v34 = vld [vmem:[%s8848_s5 + $0x1a8] sm:$0xff]  ;;  %v5855_v20 = vld [vmem:[%s8848_s5 + $0x218] sm:$0xff] }
 0x448   :  { %v2124_v33 = vmax.f32 %v2122_v23, %v2123_v32  ;;  %v2131_v26 = vmax.f32 %v2129_v44, %v2130_v59  ;;  %v2138_v25 = vmax.f32 %v2136_v36, %v2137_v7  ;;  %3720 = vmatpush.bf16.msrb.mxu1 %v5859_v22 }
 0x449   :  { %v2539_v1 = vperm.slane %v2191_v53, 0  ;;  %3612 = vmatpush.bf16.msrb.mxu3 %v5812_v55  ;;  %v5853_v53 = vld [vmem:[%s8848_s5 + $0x208] sm:$0xff] }
 0x44a   :  { %v2192_v39 = vpack.c.bf16 %v2124_v33, %v2124_v33  ;;  %v2193_v12 = vpack.c.bf16 %v2131_v26, %v2131_v26  ;;  %v2194_v3 = vpack.c.bf16 %v2138_v25, %v2138_v25  ;;  %v5840_v33 = vld [vmem:[%s8848_s5 + $0x1a0] sm:$0xff] }
 0x44b   :  { %v2541_v8 = vunpack.c.l.b16 %v2539_v1  ;;  %v5856_v26 = vld [vmem:[%s8848_s5 + $0x220] sm:$0xff]  ;;  %v3568_v1 = vpop.f32.mrf.mxu1 }
 0x44c   :  { %v2583_v40 = vperm.slane %v2192_v39, 0  ;;  %v2627_v37 = vperm.slane %v2193_v12, 0  ;;  %v2671_v57 = vperm.slane %v2194_v3, 0  ;;  %3721 = vmatpush.bf16.msrb.mxu1 %v5858_v30  ;;  %v5836_v39 = vld [vmem:[%s8848_s5 + $0x180] sm:$0xff] }
 0x44d   :  { %v2575_v43 = vsel %vm2319_vm14, %v2541_v8, %v2574_v61  ;;  %v2618_v42 = vsel %vm2317_vm13, %v2541_v8, %v2617_v18  ;;  %v2661_v16 = vsel %vm2315_vm12, %v2541_v8, %v7742_v9  ;;  %3674 = vmatpush.bf16.msra.mxu3 %v5843_v45  ;;  %v5852_v12 = vld [vmem:[%s8848_s5 + $0x200] sm:$0xff]  ;;  %v8189_v45 = vpop.f32.mrf.mxu0 }
 0x44e   :  { %v3064_v10 = vld.sshfl [vmem:[#allocation1] sm:$0xff pattern:$0x73625140]  ;;  %v3065_v54 = vld.sshfl [vmem:[#allocation1 + $0x8] sm:$0xff pattern:$0x73625140]  ;;  %v2585_v58 = vunpack.c.l.b16 %v2583_v40  ;;  %v2629_v48 = vunpack.c.l.b16 %v2627_v37  ;;  %v2673_v46 = vunpack.c.l.b16 %v2671_v57  ;;  %v2579_v4 = vpack.c.b16 %v2575_v43, %v2575_v43  ;;  %v3545_v40 = vpop.f32.mrf.mxu3 }
 0x44f   :  { %3554 = vmatmul.bf16.gmra.mxu3 %v3064_v10  ;;  %3577 = vmatmul.bf16.gmra.mxu1 %v3065_v54  ;;  %v3066_v31 = vld.sshfl [vmem:[#allocation1 + $0x10] sm:$0xff pattern:$0x73625140]  ;;  %v3067_v60 = vld.sshfl [vmem:[#allocation1 + $0x18] sm:$0xff pattern:$0x73625140] }
 0x450   :  { %3600 = vmatmul.bf16.gmra.mxu2 %v3066_v31  ;;  %v2685_v24 = vsel %vm2315_vm12, %v2585_v58, %v2541_v8  ;;  %v2619_v14 = vsel %vm2319_vm14, %v2585_v58, %v2618_v42  ;;  %v2662_v23 = vsel %vm2317_vm13, %v2585_v58, %v2661_v16  ;;  %v2713_v35 = vrot.slane %v2579_v4, 6  ;;  %3073 = vst [vmem:[#allocation1] ss:$4 sm:$0xff] %v2828_v52 }
 0x451   :  { %v2686_v44 = vsel %vm2317_vm13, %v2629_v48, %v2685_v24  ;;  %v2623_v36 = vpack.c.b16 %v2619_v14, %v2619_v14  ;;  %v2663_v9 = vsel %vm2319_vm14, %v2629_v48, %v2662_v23  ;;  %3675 = vmatpush.bf16.msra.mxu3 %v5842_v13  ;;  %3722 = vmatpush.bf16.msrb.mxu1 %v5857_v11 }
 0x452   :  { %v2687_v15 = vsel %vm2319_vm14, %v2673_v46, %v2686_v44  ;;  %v2667_v41 = vpack.c.b16 %v2663_v9, %v2663_v9  ;;  %v2838_v7 = vsel %vm1746_vm11, %v2535_v5, %v2713_v35 }
 0x453   :  { %v2691_v50 = vpack.c.b16 %v2687_v15, %v2687_v15  ;;  %v2714_v32 = vrot.slane %v2623_v36, 4  ;;  %v3570_v18 = vpop.f32.mrf.mxu1 }
 0x454   :  { %v2715_v59 = vrot.slane %v2667_v41, 2 }
 0x455   :  { %3075 = vst [vmem:[#allocation1 + $0x1] ss:$4 sm:$0xff] %v2691_v50  ;;  %3676 = vmatpush.bf16.msra.mxu3 %v5841_v34  ;;  %3723 = vmatpush.bf16.msrb.mxu1 %v5856_v26 }
 0x456   :  { %v2841_v27 = vsel %vm2719_vm4, %v2714_v32, %v2715_v59  ;;  %v3547_v61 = vpop.f32.mrf.mxu3 }
 0x457   :  { %v2842_v0 = vsel %vm2723_vm5, %v2838_v7, %v2841_v27 }
 0x458   :  { %3063 = vst [vmem:[#allocation1 + $0x21] ss:$4 sm:$0xff] %v2842_v0 }
 0x459   :  { %3677 = vmatpush.bf16.msra.mxu3 %v5840_v33  ;;  %3724 = vmatpush.bf16.msrb.mxu1 %v5855_v20 }
 0x45c   :  { %v3076_v42 = vld.sshfl [vmem:[#allocation1] sm:$0xff pattern:$0x73625140] }
 0x45d   :  { %3678 = vmatpush.bf16.msra.mxu3 %v5839_v51 }
 0x45f   :  { %3613 = vmatmul.bf16.vlgmr.msrb.gmra.mxu3 %v7947_v38  ;;  %3636 = vmatmul.bf16.vlgmr.msra.gmra.mxu1 %v7723_v2  ;;  %v3071_v25 = vld.sshfl [vmem:[#allocation1 + $0x38] sm:$0xff pattern:$0x73625140]  ;;  %v5838_v38 = vld [vmem:[%s8848_s5 + $0x190] sm:$0xff] }
 0x460   :  { %3659 = vmatmul.bf16.vlgmr.msra.gmra.mxu2 %v7729_v19  ;;  %3715 = vmatmul.bf16.gmra.mxu0 %v3071_v25  ;;  %v5854_v2 = vld [vmem:[%s8848_s5 + $0x210] sm:$0xff]  ;;  %v5837_v19 = vld [vmem:[%s8848_s5 + $0x188] sm:$0xff]  ;;  %v3068_v3 = vld.sshfl [vmem:[#allocation1 + $0x20] sm:$0xff pattern:$0x73625140] }
 0x461   :  { %3679 = vmatpush.bf16.msra.mxu3 %v5838_v38  ;;  %3725 = vmatpush.bf16.msrb.mxu1 %v5854_v2  ;;  %v3069_v56 = vld.sshfl [vmem:[#allocation1 + $0x28] sm:$0xff pattern:$0x73625140]  ;;  %v3070_v43 = vld.sshfl [vmem:[#allocation1 + $0x30] sm:$0xff pattern:$0x73625140] }
 0x465   :  { %3680 = vmatpush.bf16.msra.mxu3 %v5837_v19  ;;  %3726 = vmatpush.bf16.msrb.mxu1 %v5853_v53 }
 0x469   :  { %3681 = vmatpush.bf16.msra.mxu3 %v5836_v39  ;;  %3727 = vmatpush.bf16.msrb.mxu1 %v5852_v12 }
 0x46f   :  { %3618 = vmatmul.bf16.gmra.mxu3 %v7834_v17  ;;  %3641 = vmatmul.bf16.gmra.mxu1 %v8074_v28  ;;  %v5920_v17 = vld [vmem:[%s8849_s6] ss:$0 sm:$0xff]  ;;  %v3591_v28 = vpop.f32.mrf.mxu2 }
 0x470   :  { %3664 = vmatmul.bf16.gmra.mxu2 %v8080_v21  ;;  %v3546_v37 = vadd.f32 %v5920_v17, %v3545_v40  ;;  %v3548_v55 = vadd.f32 %v5920_v17, %v3547_v61 }
 0x472   :  { %v3569_v21 = vadd.f32 %v3568_v1, %v3546_v37  ;;  %v3571_v62 = vadd.f32 %v3570_v18, %v3548_v55 }
 0x474   :  { %v3592_v57 = vadd.f32 %v3591_v28, %v3569_v21 }
 0x477   :  { %v3593_v6 = vpop.f32.mrf.mxu2 }
 0x478   :  { %v3594_v10 = vadd.f32 %v3593_v6, %v3571_v62 }
 0x47f   :  { %3623 = vmatmul.bf16.gmra.mxu3 %v3067_v60  ;;  %3646 = vmatmul.bf16.gmra.mxu1 %v3068_v3 }
 0x480   :  { %3669 = vmatmul.bf16.gmra.mxu2 %v3069_v56 }
 0x48f   :  { %3682 = vmatmul.bf16.vlgmr.msra.gmra.mxu3 %v7737_v47  ;;  %3728 = vmatmul.bf16.vlgmr.msrb.gmra.mxu1 %v8039_v63 }
 0x496   :  { %v3573_v47 = vpop.f32.mrf.mxu1 }
 0x49c   :  { %v3550_v63 = vpop.f32.mrf.mxu3 }
 0x49d   :  { %v3551_v54 = vadd.f32 %v5920_v17, %v3550_v63  ;;  %v3596_v8 = vpop.f32.mrf.mxu2 }
 0x49e   :  { %v3575_v5 = vpop.f32.mrf.mxu1 }
 0x49f   :  { %3687 = vmatmul.bf16.gmra.mxu3 %v8082_v29  ;;  %3733 = vmatmul.bf16.gmra.mxu1 %v8036_v49  ;;  %v3574_v58 = vadd.f32 %v3573_v47, %v3551_v54  ;;  %v8191_v29 = vpop.f32.mrf.mxu0 }
 0x4a1   :  { %v3597_v48 = vadd.f32 %v3596_v8, %v3574_v58 }
 0x4a4   :  { %v3552_v52 = vpop.f32.mrf.mxu3 }
 0x4a5   :  { %v3553_v31 = vadd.f32 %v5920_v17, %v3552_v52  ;;  %v3598_v16 = vpop.f32.mrf.mxu2 }
 0x4a7   :  { %v3576_v46 = vadd.f32 %v3575_v5, %v3553_v31 }
 0x4a9   :  { %v3599_v24 = vadd.f32 %v3598_v16, %v3576_v46 }
 0x4af   :  { %3692 = vmatmul.bf16.gmra.mxu3 %v3070_v43  ;;  %3738 = vmatmul.bf16.gmra.mxu1 %v3076_v42 }
 0x4c2   :  { %v8193_v49 = vpop.f32.mrf.mxu0 }
 0x4ca   :  { %v3713_v44 = vpop.f32.mrf.mxu0 }
 0x4cc   :  { %v3578_v22 = vpop.f32.mrf.mxu1 }
 0x4d2   :  { %v3555_v4 = vpop.f32.mrf.mxu3 }
 0x4d3   :  { %v3556_v14 = vadd.f32 %v5920_v17, %v3555_v4  ;;  %v3601_v23 = vpop.f32.mrf.mxu2 }
 0x4d4   :  { %v3580_v36 = vpop.f32.mrf.mxu1 }
 0x4d5   :  { %v3579_v9 = vadd.f32 %v3578_v22, %v3556_v14 }
 0x4d7   :  { %v3602_v15 = vadd.f32 %v3601_v23, %v3579_v9 }
 0x4da   :  { %v3557_v60 = vpop.f32.mrf.mxu3 }
 0x4db   :  { %v3603_v41 = vpop.f32.mrf.mxu2 }
 0x4dc   :  { %v3637_v50 = vpop.f32.mrf.mxu1 }
 0x4dd   :  { %v3716_v35 = vpop.f32.mrf.mxu0 }
 0x4e2   :  { %v3614_v13 = vpop.f32.mrf.mxu3 }
 0x4e3   :  { %v3615_v30 = vadd.f32 %v3614_v13, %v3592_v57  ;;  %v3660_v32 = vpop.f32.mrf.mxu2 }
 0x4e4   :  { %v3639_v59 = vpop.f32.mrf.mxu1 }
 0x4e5   :  { %v3638_v7 = vadd.f32 %v3637_v50, %v3615_v30  ;;  %v3718_v27 = vpop.f32.mrf.mxu0 }
 0x4e7   :  { %v3661_v34 = vadd.f32 %v3660_v32, %v3638_v7 }
 0x4ea   :  { %v3616_v11 = vpop.f32.mrf.mxu3 }
 0x4eb   :  { %v3617_v0 = vadd.f32 %v3616_v11, %v3594_v10  ;;  %v3662_v33 = vpop.f32.mrf.mxu2 }
 0x4ec   :  { %v3642_v26 = vpop.f32.mrf.mxu1 }
 0x4ed   :  { %v3640_v25 = vadd.f32 %v3639_v59, %v3617_v0 }
 0x4ef   :  { %v3663_v51 = vadd.f32 %v3662_v33, %v3640_v25 }
 0x4f2   :  { %v3619_v20 = vpop.f32.mrf.mxu3 }
 0x4f3   :  { %v3620_v38 = vadd.f32 %v3619_v20, %v3597_v48  ;;  %v3665_v2 = vpop.f32.mrf.mxu2 }
 0x4f4   :  { %v3644_v19 = vpop.f32.mrf.mxu1 }
 0x4f5   :  { %v3643_v53 = vadd.f32 %v3642_v26, %v3620_v38 }
 0x4f7   :  { %v3666_v39 = vadd.f32 %v3665_v2, %v3643_v53 }
 0x4fa   :  { %v3621_v12 = vpop.f32.mrf.mxu3 }
 0x4fb   :  { %v3667_v3 = vpop.f32.mrf.mxu2  ;;  %v3622_v10 = vadd.f32 %v3621_v12, %v3599_v24 }
 0x4fc   :  { %v3647_v56 = vpop.f32.mrf.mxu1 }
 0x4fd   :  { %v3645_v47 = vadd.f32 %v3644_v19, %v3622_v10 }
 0x4ff   :  { %v3668_v58 = vadd.f32 %v3667_v3, %v3645_v47 }
 0x502   :  { %v3624_v1 = vpop.f32.mrf.mxu3 }
 0x503   :  { %v3670_v17 = vpop.f32.mrf.mxu2  ;;  %v3625_v63 = vadd.f32 %v3624_v1, %v3602_v15 }
 0x504   :  { %v3649_v40 = vpop.f32.mrf.mxu1 }
 0x505   :  { %v3648_v48 = vadd.f32 %v3647_v56, %v3625_v63 }
 0x507   :  { %v3671_v31 = vadd.f32 %v3670_v17, %v3648_v48  ;;  %v3804_v17 = vld [vmem:[%s8851_s7] sm:$0x1] }
 0x50a   :  { %v3626_v28 = vpop.f32.mrf.mxu3 }
 0x50b   :  { %v3672_v37 = vpop.f32.mrf.mxu2 }
 0x50c   :  { %v3729_v21 = vpop.f32.mrf.mxu1 }
 0x512   :  { %v3683_v57 = vpop.f32.mrf.mxu3 }
 0x513   :  { %v3684_v4 = vadd.f32 %v3683_v57, %v3661_v34  ;;  %v5921_v57 = vld [vmem:[%s8850_s8] ss:$0 sm:$0xff] }
 0x514   :  { %v3731_v61 = vpop.f32.mrf.mxu1 }
 0x515   :  { %v3707_v15 = vadd.f32 %v8189_v45, %v3684_v4 }
 0x517   :  { %v3730_v32 = vadd.f32 %v3729_v21, %v3707_v15 }
 0x51a   :  { %v3685_v18 = vpop.f32.mrf.mxu3 }
 0x51b   :  { %v3686_v43 = vadd.f32 %v3685_v18, %v3663_v51 }
 0x51c   :  { %v3734_v55 = vpop.f32.mrf.mxu1 }
 0x51d   :  { %v3709_v24 = vadd.f32 %v8191_v29, %v3686_v43  ;;  %v8861_v29 = vmov 1.0  }
 0x51f   :  { %v3732_v30 = vadd.f32 %v3731_v61, %v3709_v24 }
 0x521   :  { %v3744_v59 = vmax.f32 %v3732_v30, 0.0 }
 0x522   :  { %v3688_v62 = vpop.f32.mrf.mxu3 }
 0x523   :  { %v3689_v5 = vadd.f32 %v3688_v62, %v3666_v39 }
 0x524   :  { %v3736_v6 = vpop.f32.mrf.mxu1 }
 0x525   :  { %v3712_v14 = vadd.f32 %v8193_v49, %v3689_v5  ;;  %v3743_v49 = vmax.f32 %v3730_v32, 0.0 }
 0x527   :  { %v3735_v41 = vadd.f32 %v3734_v55, %v3712_v14 }
 0x52a   :  { %v3690_v54 = vpop.f32.mrf.mxu3 }
 0x52b   :  { %v3691_v52 = vadd.f32 %v3690_v54, %v3668_v58 }
 0x52c   :  { %v3739_v8 = vpop.f32.mrf.mxu1 }
 0x52d   :  { %v3714_v42 = vadd.f32 %v3713_v44, %v3691_v52  ;;  %v3745_v44 = vmax.f32 %v3735_v41, 0.0 }
 0x52f   :  { %v3737_v9 = vadd.f32 %v3736_v6, %v3714_v42 }
 0x531   :  { %v3746_v13 = vmax.f32 %v3737_v9, 0.0 }
 0x532   :  { %v3693_v46 = vpop.f32.mrf.mxu3 }
 0x533   :  { %v3694_v16 = vadd.f32 %v3693_v46, %v3671_v31 }
 0x534   :  { %v3741_v22 = vpop.f32.mrf.mxu1 }
 0x535   :  { %v3717_v23 = vadd.f32 %v3716_v35, %v3694_v16 }
 0x537   :  { %v3740_v36 = vadd.f32 %v3739_v8, %v3717_v23 }
 0x539   :  { %v3747_v60 = vmax.f32 %v3740_v36, 0.0 }
 0x53a   :  { %v3695_v50 = vpop.f32.mrf.mxu3 }
 0x53b   :  { %3762 = vmatpush.msrb.mxu2 %v3747_v60 }
 0x53d   :  { %3763 = vmatpush.msrb.mxu2 %v3746_v13 }
 0x53f   :  { %3764 = vmatpush.msrb.mxu2 %v3745_v44 }
 0x541   :  { %3765 = vmatpush.msrb.mxu2 %v3744_v59 }
 0x543   :  { %3766 = vmatpush.msrb.mxu2 %v3743_v49 }
 0x544   :  { %5490 = vmatmul.msk.f32.vlgmr.msrb.gmra.mxu2 %vm3748_vm3, %v8861_v29 }
 0x5c7   :  { %v3768_v35 = vpop.f32.mrf.mxu2 }
 0x5c8   :  { %v3771_v45 = vmul.f32 0.025, %v3768_v35 }
 0x5ca   :  { %v3772_v7 = vperm.slane %v3771_v45, 0 }
 0x5cc   :  { %v3777_v27 = vsub.f32 %v3747_v60, %v3772_v7  ;;  %v3776_v34 = vsub.f32 %v3746_v13, %v3772_v7  ;;  %v3775_v0 = vsub.f32 %v3745_v44, %v3772_v7  ;;  %v3774_v26 = vsub.f32 %v3744_v59, %v3772_v7 }
 0x5cd   :  { %v3773_v51 = vsub.f32 %v3743_v49, %v3772_v7 }
 0x5ce   :  { %v3782_v11 = vmul.f32 %v3777_v27, %v3777_v27  ;;  %v3781_v33 = vmul.f32 %v3776_v34, %v3776_v34  ;;  %v3780_v25 = vmul.f32 %v3775_v0, %v3775_v0  ;;  %v3779_v20 = vmul.f32 %v3774_v26, %v3774_v26 }
 0x5cf   :  { %v3778_v38 = vmul.f32 %v3773_v51, %v3773_v51 }
 0x5d0   :  { %3794 = vmatpush.msra.mxu2 %v3782_v11 }
 0x5d2   :  { %3795 = vmatpush.msra.mxu2 %v3781_v33 }
 0x5d4   :  { %3796 = vmatpush.msra.mxu2 %v3780_v25 }
 0x5d6   :  { %3797 = vmatpush.msra.mxu2 %v3779_v20 }
 0x5d8   :  { %3798 = vmatpush.msra.mxu2 %v3778_v38 }
 0x5d9   :  { %5491 = vmatmul.msk.f32.vlgmr.msra.gmra.mxu2 %vm3748_vm3, %v8861_v29 }
 0x65c   :  { %v3800_v2 = vpop.f32.mrf.mxu2 }
 0x65d   :  { %v3803_v19 = vmul.f32 0.025, %v3800_v2 }
 0x65f   :  { %v3805_v53 = vadd.f32 1e-05, %v3803_v19 }
 0x661   :  { %5926 = vrsqrt.f32 %v3805_v53  ;;  %vm3812_vm9 = vweird.f32 %v3805_v53 }
 0x667   :  { %v5927_v39 = vpop.eup %5926 }
 0x668   :  { %v3807_v12 = vmul.f32 %v5927_v39, %v3805_v53  ;;  %vm3813_vm8 = vweird.f32 %v5927_v39 }
 0x669   :  { %vm3814_vm10 = vmor %vm3812_vm9, %vm3813_vm8 }
 0x66a   :  { %v3808_v3 = vmul.f32 %v5927_v39, %v3807_v12 }
 0x66c   :  { %v3809_v56 = vmul.f32 0.5, %v3808_v3 }
 0x66e   :  { %v3810_v1 = vsub.f32 1.5, %v3809_v56 }
 0x670   :  { %v3811_v40 = vmul.f32 %v5927_v39, %v3810_v1 }
 0x672   :  { %v3815_v28 = vsel %vm3814_vm10, %v5927_v39, %v3811_v40 }
 0x673   :  { %v3816_v37 = vmul.f32 %v3815_v28, %v3804_v17 }
 0x675   :  { %v3818_v21 = vperm.slane %v3816_v37, 0 }
 0x677   :  { %v3820_v61 = vmul.f32 %v3818_v21, %v3773_v51  ;;  %v3821_v18 = vmul.f32 %v3818_v21, %v3774_v26  ;;  %v3822_v55 = vmul.f32 %v3818_v21, %v3775_v0  ;;  %v3823_v62 = vmul.f32 %v3818_v21, %v3776_v34 }
 0x678   :  { %v3824_v6 = vmul.f32 %v3818_v21, %v3777_v27 }
 0x679   :  { %v3829_v10 = vadd.f32 %v5921_v57, %v3820_v61  ;;  %v3830_v47 = vadd.f32 %v5921_v57, %v3821_v18  ;;  %v8208_v63 = vadd.f32 %v5921_v57, %v3822_v55  ;;  %v8210_v54 = vadd.f32 %v5921_v57, %v3823_v62 }
 0x67a   :  { %v8212_v8 = vadd.f32 %v5921_v57, %v3824_v6 }
 0x67b   :  { %v3839_v58 = vrot.slane %v3829_v10, 2  ;;  %v3840_v48 = vrot.slane %v3829_v10, 4  ;;  %v3841_v52 = vrot.slane %v3829_v10, 6  ;;  %v3842_v31 = vrot.slane %v3830_v47, 2 }
 0x67c   :  { %v3843_v5 = vrot.slane %v3830_v47, 4  ;;  %v3844_v46 = vrot.slane %v3830_v47, 6  ;;  %v3845_v43 = vrot.slane %v8208_v63, 2  ;;  %v3846_v42 = vrot.slane %v8208_v63, 4 }
 0x67d   :  { %v3847_v16 = vrot.slane %v8208_v63, 6  ;;  %v3848_v22 = vrot.slane %v8210_v54, 2  ;;  %v3849_v4 = vrot.slane %v8210_v54, 4  ;;  %v3850_v14 = vrot.slane %v8210_v54, 6 }
 0x67e   :  { %v3851_v23 = vrot.slane %v8212_v8, 2  ;;  %v3852_v24 = vrot.slane %v8212_v8, 4  ;;  %v3853_v36 = vrot.slane %v8212_v8, 6  ;;  %v3869_v9 = vsel %vm1746_vm11, %v3829_v10, -inf }
 0x67f   :  { %v3870_v15 = vrot.slane %v3869_v9, 4  ;;  %v3876_v60 = vsel %vm1746_vm11, %v3839_v58, -inf  ;;  %v3883_v41 = vsel %vm1746_vm11, %v3840_v48, -inf  ;;  %v3890_v50 = vsel %vm1746_vm11, %v3841_v52, -inf }
 0x680   :  { %v3877_v13 = vrot.slane %v3876_v60, 4  ;;  %v3884_v30 = vrot.slane %v3883_v41, 4  ;;  %v3891_v44 = vrot.slane %v3890_v50, 4  ;;  %v3897_v32 = vsel %vm1746_vm11, %v3830_v47, -inf }
 0x681   :  { %v3871_v59 = vmax.f32 %v3869_v9, %v3870_v15  ;;  %v3898_v49 = vrot.slane %v3897_v32, 4  ;;  %v3904_v29 = vsel %vm1746_vm11, %v3842_v31, -inf  ;;  %v3911_v35 = vsel %vm1746_vm11, %v3843_v5, -inf }
 0x682   :  { %v3878_v45 = vmax.f32 %v3876_v60, %v3877_v13  ;;  %v3885_v7 = vmax.f32 %v3883_v41, %v3884_v30  ;;  %v3892_v27 = vmax.f32 %v3890_v50, %v3891_v44  ;;  %v3905_v34 = vrot.slane %v3904_v29, 4 }
 0x683   :  { %v3872_v11 = vrot.slane %v3871_v59, 2  ;;  %v3899_v0 = vmax.f32 %v3897_v32, %v3898_v49  ;;  %v3912_v33 = vrot.slane %v3911_v35, 4  ;;  %v3918_v26 = vsel %vm1746_vm11, %v3844_v46, -inf  ;;  %v5875_v49 = vld [vmem:[%s8852_s9 + $0x78] sm:$0xff] }
 0x684   :  { %v3879_v25 = vrot.slane %v3878_v45, 2  ;;  %v3886_v51 = vrot.slane %v3885_v7, 2  ;;  %v3893_v20 = vrot.slane %v3892_v27, 2  ;;  %v3906_v38 = vmax.f32 %v3904_v29, %v3905_v34  ;;  %4665 = vmatpush.bf16.msra.mxu0 %v5875_v49 }
 0x685   :  { %v3873_v2 = vmax.f32 %v3871_v59, %v3872_v11  ;;  %v3900_v19 = vrot.slane %v3899_v0, 2  ;;  %v3913_v53 = vmax.f32 %v3911_v35, %v3912_v33  ;;  %v3919_v39 = vrot.slane %v3918_v26, 4  ;;  %v5867_v59 = vld [vmem:[%s8852_s9 + $0x38] sm:$0xff] }
 0x686   :  { %v3880_v12 = vmax.f32 %v3878_v45, %v3879_v25  ;;  %v3887_v3 = vmax.f32 %v3885_v7, %v3886_v51  ;;  %v3894_v56 = vmax.f32 %v3892_v27, %v3893_v20  ;;  %v3907_v1 = vrot.slane %v3906_v38, 2  ;;  %4652 = vmatpush.bf16.msrb.mxu3 %v5867_v59 }
 0x687   :  { %v3874_v17 = vrot.slane %v3873_v2, 1  ;;  %v3901_v40 = vmax.f32 %v3899_v0, %v3900_v19  ;;  %v3914_v28 = vrot.slane %v3913_v53, 2  ;;  %v3920_v37 = vmax.f32 %v3918_v26, %v3919_v39 }
 0x688   :  { %v3881_v21 = vrot.slane %v3880_v12, 1  ;;  %v3888_v57 = vrot.slane %v3887_v3, 1  ;;  %v3895_v61 = vrot.slane %v3894_v56, 1  ;;  %v3908_v18 = vmax.f32 %v3906_v38, %v3907_v1  ;;  %v5874_v38 = vld [vmem:[%s8852_s9 + $0x70] sm:$0xff] }
 0x689   :  { %v8231_v55 = vmax.f32 %v3873_v2, %v3874_v17  ;;  %v3902_v62 = vrot.slane %v3901_v40, 1  ;;  %v3915_v6 = vmax.f32 %v3913_v53, %v3914_v28  ;;  %v3921_v10 = vrot.slane %v3920_v37, 2  ;;  %v5882_v2 = vld [vmem:[%s8852_s9 + $0xb0] sm:$0xff]  ;;  %4666 = vmatpush.bf16.msra.mxu0 %v5874_v38 }
 0x68a   :  { %v8233_v47 = vmax.f32 %v3880_v12, %v3881_v21  ;;  %v8235_v58 = vmax.f32 %v3887_v3, %v3888_v57  ;;  %v8237_v48 = vmax.f32 %v3894_v56, %v3895_v61  ;;  %v3909_v52 = vrot.slane %v3908_v18, 1 }
 0x68b   :  { %v8239_v31 = vmax.f32 %v3901_v40, %v3902_v62  ;;  %v3916_v5 = vrot.slane %v3915_v6, 1  ;;  %v3922_v46 = vmax.f32 %v3920_v37, %v3921_v10  ;;  %v3925_v9 = vsel %vm1746_vm11, %v8208_v63, -inf  ;;  %v5881_v62 = vld [vmem:[%s8852_s9 + $0xa8] sm:$0xff] }
 0x68c   :  { %v8243_v15 = vmax.f32 %v3908_v18, %v3909_v52  ;;  %v3926_v60 = vrot.slane %v3925_v9, 4  ;;  %v3932_v41 = vsel %vm1746_vm11, %v3845_v43, -inf  ;;  %v3939_v50 = vsel %vm1746_vm11, %v3846_v42, -inf  ;;  %v5883_v43 = vld [vmem:[%s8852_s9 + $0xb8] sm:$0xff] }
 0x68d   :  { %v8251_v13 = vmax.f32 %v3915_v6, %v3916_v5  ;;  %v3923_v30 = vrot.slane %v3922_v46, 1  ;;  %v3933_v44 = vrot.slane %v3932_v41, 4  ;;  %v3940_v32 = vrot.slane %v3939_v50, 4  ;;  %4678 = vmatpush.bf16.msrb.mxu2 %v5883_v43 }
 0x68e   :  { %v3927_v29 = vmax.f32 %v3925_v9, %v3926_v60  ;;  %v3946_v42 = vsel %vm1746_vm11, %v3847_v16, -inf  ;;  %v3953_v35 = vsel %vm1746_vm11, %v8210_v54, -inf  ;;  %v3960_v45 = vsel %vm1746_vm11, %v3848_v22, -inf  ;;  %v5866_v22 = vld [vmem:[%s8852_s9 + $0x30] sm:$0xff]  ;;  %v5865_v54 = vld [vmem:[%s8852_s9 + $0x28] sm:$0xff] }
 0x68f   :  { %v8270_v7 = vmax.f32 %v3922_v46, %v3923_v30  ;;  %v3934_v27 = vmax.f32 %v3932_v41, %v3933_v44  ;;  %v3941_v34 = vmax.f32 %v3939_v50, %v3940_v32  ;;  %v3947_v11 = vrot.slane %v3946_v42, 4  ;;  %4653 = vmatpush.bf16.msrb.mxu3 %v5866_v22 }
 0x690   :  { %v3928_v0 = vrot.slane %v3927_v29, 2  ;;  %v3954_v33 = vrot.slane %v3953_v35, 4  ;;  %v3961_v26 = vrot.slane %v3960_v45, 4  ;;  %v3967_v63 = vsel %vm1746_vm11, %v3849_v4, -inf }
 0x691   :  { %v3935_v16 = vrot.slane %v3934_v27, 2  ;;  %v3942_v25 = vrot.slane %v3941_v34, 2  ;;  %v3948_v51 = vmax.f32 %v3946_v42, %v3947_v11  ;;  %v3968_v20 = vrot.slane %v3967_v63, 4  ;;  %4679 = vmatpush.bf16.msrb.mxu2 %v5882_v2  ;;  %v5864_v42 = vld [vmem:[%s8852_s9 + $0x20] sm:$0xff] }
 0x692   :  { %v3929_v19 = vmax.f32 %v3927_v29, %v3928_v0  ;;  %v3955_v53 = vmax.f32 %v3953_v35, %v3954_v33  ;;  %v3962_v4 = vmax.f32 %v3960_v45, %v3961_v26  ;;  %v3974_v39 = vsel %vm1746_vm11, %v3850_v14, -inf  ;;  %v5873_v14 = vld [vmem:[%s8852_s9 + $0x68] sm:$0xff]  ;;  %v5872_v35 = vld [vmem:[%s8852_s9 + $0x60] sm:$0xff] }
 0x693   :  { %v3936_v12 = vmax.f32 %v3934_v27, %v3935_v16  ;;  %v3943_v3 = vmax.f32 %v3941_v34, %v3942_v25  ;;  %v3949_v56 = vrot.slane %v3948_v51, 2  ;;  %v3969_v1 = vmax.f32 %v3967_v63, %v3968_v20  ;;  %4654 = vmatpush.bf16.msrb.mxu3 %v5865_v54  ;;  %4667 = vmatpush.bf16.msra.mxu0 %v5873_v14  ;;  %v5880_v45 = vld [vmem:[%s8852_s9 + $0xa0] sm:$0xff]  ;;  %v5870_v54 = vld [vmem:[%s8852_s9 + $0x50] sm:$0xff] }
 0x694   :  { %v3930_v17 = vrot.slane %v3929_v19, 1  ;;  %v3956_v40 = vrot.slane %v3955_v53, 2  ;;  %v3963_v28 = vrot.slane %v3962_v4, 2  ;;  %v3975_v37 = vrot.slane %v3974_v39, 4  ;;  %v5878_v14 = vld [vmem:[%s8852_s9 + $0x90] sm:$0xff] }
 0x695   :  { %v3937_v21 = vrot.slane %v3936_v12, 1  ;;  %v3944_v57 = vrot.slane %v3943_v3, 1  ;;  %v3950_v61 = vmax.f32 %v3948_v51, %v3949_v56  ;;  %v3970_v18 = vrot.slane %v3969_v1, 2  ;;  %4680 = vmatpush.bf16.msrb.mxu2 %v5881_v62 }
 0x696   :  { %v8296_v6 = vmax.f32 %v3929_v19, %v3930_v17  ;;  %v3957_v10 = vmax.f32 %v3955_v53, %v3956_v40  ;;  %v3964_v52 = vmax.f32 %v3962_v4, %v3963_v28  ;;  %v3976_v5 = vmax.f32 %v3974_v39, %v3975_v37  ;;  %v5879_v53 = vld [vmem:[%s8852_s9 + $0x98] sm:$0xff] }
 0x697   :  { %v8298_v46 = vmax.f32 %v3936_v12, %v3937_v21  ;;  %v8300_v9 = vmax.f32 %v3943_v3, %v3944_v57  ;;  %v3951_v60 = vrot.slane %v3950_v61, 1  ;;  %v3971_v41 = vmax.f32 %v3969_v1, %v3970_v18  ;;  %4655 = vmatpush.bf16.msrb.mxu3 %v5864_v42  ;;  %4668 = vmatpush.bf16.msra.mxu0 %v5872_v35  ;;  %v5862_v18 = vld [vmem:[%s8852_s9 + $0x10] sm:$0xff] }
 0x698   :  { %v3958_v50 = vrot.slane %v3957_v10, 1  ;;  %v3965_v30 = vrot.slane %v3964_v52, 1  ;;  %v3977_v44 = vrot.slane %v3976_v5, 2  ;;  %v3981_v32 = vsel %vm1746_vm11, %v8212_v8, -inf }
 0x699   :  { %v8304_v59 = vmax.f32 %v3950_v61, %v3951_v60  ;;  %v3972_v49 = vrot.slane %v3971_v41, 1  ;;  %v3982_v43 = vrot.slane %v3981_v32, 4  ;;  %v3988_v29 = vsel %vm1746_vm11, %v3851_v23, -inf  ;;  %v5891_v23 = vld [vmem:[%s8852_s9 + $0xf8] sm:$0xff]  ;;  %4681 = vmatpush.bf16.msrb.mxu2 %v5880_v45  ;;  %v5889_v60 = vld [vmem:[%s8852_s9 + $0xe8] sm:$0xff] }
 0x69a   :  { %v8318_v27 = vmax.f32 %v3957_v10, %v3958_v50  ;;  %v8320_v34 = vmax.f32 %v3964_v52, %v3965_v30  ;;  %v3978_v11 = vmax.f32 %v3976_v5, %v3977_v44  ;;  %v3989_v0 = vrot.slane %v3988_v29, 4  ;;  %4691 = vmatpush.bf16.msra.mxu1 %v5891_v23  ;;  %v5861_v45 = vld [vmem:[%s8852_s9 + $0x8] sm:$0xff] }
 0x69b   :  { %v8325_v33 = vmax.f32 %v3971_v41, %v3972_v49  ;;  %v3983_v26 = vmax.f32 %v3981_v32, %v3982_v43  ;;  %v3995_v63 = vsel %vm1746_vm11, %v3852_v24, -inf  ;;  %v4002_v16 = vsel %vm1746_vm11, %v3853_v36, -inf  ;;  %v5863_v24 = vld [vmem:[%s8852_s9 + $0x18] sm:$0xff] }
 0x69c   :  { %v3979_v25 = vrot.slane %v3978_v11, 1  ;;  %v3990_v51 = vmax.f32 %v3988_v29, %v3989_v0  ;;  %v3996_v20 = vrot.slane %v3995_v63, 4  ;;  %v4003_v22 = vrot.slane %v4002_v16, 4  ;;  %v5871_v36 = vld [vmem:[%s8852_s9 + $0x58] sm:$0xff]  ;;  %4656 = vmatpush.bf16.msrb.mxu3 %v5863_v24  ;;  %v5876_v24 = vld [vmem:[%s8852_s9 + $0x80] sm:$0xff] }
 0x69d   :  { %v3984_v38 = vrot.slane %v3983_v26, 2  ;;  %v4009_v2 = vpack.c.bf16 %v8231_v55, %v8231_v55  ;;  %v4010_v19 = vpack.c.bf16 %v8233_v47, %v8233_v47  ;;  %v4011_v8 = vpack.c.bf16 %v8235_v58, %v8235_v58  ;;  %v5890_v58 = vld [vmem:[%s8852_s9 + $0xf0] sm:$0xff]  ;;  %4669 = vmatpush.bf16.msra.mxu0 %v5871_v36  ;;  %4682 = vmatpush.bf16.msrb.mxu2 %v5879_v53 }
 0x69e   :  { %v8348_v4 = vmax.f32 %v3978_v11, %v3979_v25  ;;  %v3991_v55 = vrot.slane %v3990_v51, 2  ;;  %v3997_v39 = vmax.f32 %v3995_v63, %v3996_v20  ;;  %v4004_v47 = vmax.f32 %v4002_v16, %v4003_v22  ;;  %4692 = vmatpush.bf16.msra.mxu1 %v5890_v58  ;;  %v5860_v20 = vld [vmem:[%s8852_s9] sm:$0xff]  ;;  %v5899_v58 = vld [vmem:[%s8852_s9 + $0x138] sm:$0xff] }
 0x69f   :  { %v3985_v12 = vmax.f32 %v3983_v26, %v3984_v38  ;;  %v4012_v3 = vpack.c.bf16 %v8237_v48, %v8237_v48  ;;  %v4013_v56 = vpack.c.bf16 %v8239_v31, %v8239_v31  ;;  %v4014_v1 = vpack.c.bf16 %v8243_v15, %v8243_v15  ;;  %v5888_v26 = vld [vmem:[%s8852_s9 + $0xe0] sm:$0xff] }
 0x6a0   :  { %v3992_v17 = vmax.f32 %v3990_v51, %v3991_v55  ;;  %v3998_v40 = vrot.slane %v3997_v39, 2  ;;  %v4005_v28 = vrot.slane %v4004_v47, 2  ;;  %v4015_v37 = vpack.c.bf16 %v8251_v13, %v8251_v13  ;;  %4657 = vmatpush.bf16.msrb.mxu3 %v5862_v18 }
 0x6a1   :  { %v3986_v21 = vrot.slane %v3985_v12, 1  ;;  %v4016_v57 = vpack.c.bf16 %v8270_v7, %v8270_v7  ;;  %v4017_v48 = vpack.c.bf16 %v8296_v6, %v8296_v6  ;;  %v4018_v61 = vpack.c.bf16 %v8298_v46, %v8298_v46  ;;  %4670 = vmatpush.bf16.msra.mxu0 %v5870_v54  ;;  %4683 = vmatpush.bf16.msrb.mxu2 %v5878_v14  ;;  %v5896_v7 = vld [vmem:[%s8852_s9 + $0x120] sm:$0xff]  ;;  %v5911_v46 = vld [vmem:[%s8852_s9 + $0x198] sm:$0xff] }
 0x6a2   :  { %v3993_v62 = vrot.slane %v3992_v17, 1  ;;  %v3999_v10 = vmax.f32 %v3997_v39, %v3998_v40  ;;  %v4006_v52 = vmax.f32 %v4004_v47, %v4005_v28  ;;  %v4019_v5 = vpack.c.bf16 %v8300_v9, %v8300_v9  ;;  %4693 = vmatpush.bf16.msra.mxu1 %v5889_v60  ;;  %v5887_v47 = vld [vmem:[%s8852_s9 + $0xd8] sm:$0xff] }
 0x6a3   :  { %v8381_v41 = vmax.f32 %v3985_v12, %v3986_v21  ;;  %v4020_v50 = vpack.c.bf16 %v8304_v59, %v8304_v59  ;;  %v4021_v30 = vpack.c.bf16 %v8318_v27, %v8318_v27  ;;  %v4022_v44 = vpack.c.bf16 %v8320_v34, %v8320_v34  ;;  %v5869_v27 = vld [vmem:[%s8852_s9 + $0x48] sm:$0xff]  ;;  %v5907_v28 = vld [vmem:[%s8852_s9 + $0x178] sm:$0xff] }
 0x6a4   :  { %v8389_v32 = vmax.f32 %v3992_v17, %v3993_v62  ;;  %v4000_v49 = vrot.slane %v3999_v10, 1  ;;  %v4007_v9 = vrot.slane %v4006_v52, 1  ;;  %v4023_v43 = vpack.c.bf16 %v8325_v33, %v8325_v33  ;;  %v5877_v34 = vld [vmem:[%s8852_s9 + $0x88] sm:$0xff]  ;;  %4658 = vmatpush.bf16.msrb.mxu3 %v5861_v45  ;;  %v5915_v62 = vld [vmem:[%s8852_s9 + $0x1b8] sm:$0xff] }
 0x6a5   :  { %v4024_v29 = vpack.c.bf16 %v8348_v4, %v8348_v4  ;;  %v4025_v59 = vpack.c.bf16 %v8381_v41, %v8381_v41  ;;  %v4037_v42 = vperm.slane %v4009_v2, 0  ;;  %v4038_v35 = vperm.slane %v4010_v19, 0  ;;  %4671 = vmatpush.bf16.msra.mxu0 %v5869_v27  ;;  %4684 = vmatpush.bf16.msrb.mxu2 %v5877_v34  ;;  %v5913_v41 = vld [vmem:[%s8852_s9 + $0x1a8] sm:$0xff] }
 0x6a6   :  { %v8406_v11 = vmax.f32 %v3999_v10, %v4000_v49  ;;  %v8408_v0 = vmax.f32 %v4006_v52, %v4007_v9  ;;  %v4026_v23 = vpack.c.bf16 %v8389_v32, %v8389_v32  ;;  %v4039_v33 = vperm.slane %v4011_v8, 0  ;;  %v5868_v8 = vld [vmem:[%s8852_s9 + $0x40] sm:$0xff]  ;;  %4694 = vmatpush.bf16.msra.mxu1 %v5888_v26 }
 0x6a7   :  { %v4040_v63 = vperm.slane %v4012_v3, 0  ;;  %v4041_v16 = vperm.slane %v4019_v5, 0  ;;  %v4042_v25 = vperm.slane %v4020_v50, 0  ;;  %v4043_v51 = vperm.slane %v4021_v30, 0  ;;  %v5886_v50 = vld [vmem:[%s8852_s9 + $0xd0] sm:$0xff] }
 0x6a8   :  { %v4027_v22 = vpack.c.bf16 %v8406_v11, %v8406_v11  ;;  %v4028_v38 = vpack.c.bf16 %v8408_v0, %v8408_v0  ;;  %v4044_v2 = vperm.slane %v4022_v44, 0  ;;  %v4045_v19 = vunpack.c.l.b16 %v4037_v42  ;;  %4659 = vmatpush.bf16.msrb.mxu3 %v5860_v20  ;;  %v5898_v30 = vld [vmem:[%s8852_s9 + $0x130] sm:$0xff] }
 0x6a9   :  { %v4046_v36 = vunpack.c.l.b16 %v4038_v35  ;;  %v4047_v53 = vunpack.c.l.b16 %v4039_v33  ;;  %v4048_v55 = vunpack.c.l.b16 %v4040_v63  ;;  %v4049_v39 = vunpack.c.l.b16 %v4041_v16  ;;  %4672 = vmatpush.bf16.msra.mxu0 %v5868_v8  ;;  %4685 = vmatpush.bf16.msrb.mxu2 %v5876_v24  ;;  %v5906_v42 = vld [vmem:[%s8852_s9 + $0x170] sm:$0xff] }
 0x6aa   :  { %v4050_v12 = vunpack.c.l.b16 %v4042_v25  ;;  %v4051_v3 = vunpack.c.l.b16 %v4043_v51  ;;  %v4052_v17 = vunpack.c.l.b16 %v4044_v2  ;;  %v4063_v40 = vperm.slane %v4013_v56, 0  ;;  %4695 = vmatpush.bf16.msra.mxu1 %v5887_v47  ;;  %v5914_v33 = vld [vmem:[%s8852_s9 + $0x1b0] sm:$0xff] }
 0x6ab   :  { %v4053_v21 = vsel %vm2315_vm12, %v4046_v36, %v4045_v19  ;;  %v4064_v18 = vperm.slane %v4023_v43, 0  ;;  %v4067_v54 = vsel %vm2315_vm12, %v4047_v53, %v4046_v36  ;;  %v4077_v14 = vperm.slane %v4014_v1, 0  ;;  %v5897_v19 = vld [vmem:[%s8852_s9 + $0x128] sm:$0xff] }
 0x6ac   :  { %v4054_v31 = vsel %vm2317_vm13, %v4047_v53, %v4053_v21  ;;  %v4056_v56 = vsel %vm2315_vm12, %v4050_v12, %v4049_v39  ;;  %v4065_v10 = vunpack.c.l.b16 %v4063_v40  ;;  %v4068_v52 = vsel %vm2317_vm13, %v4048_v55, %v4067_v54  ;;  %4704 = vmatpush.bf16.msra.mxu3 %v5899_v58  ;;  %v5905_v36 = vld [vmem:[%s8852_s9 + $0x168] sm:$0xff] }
 0x6ad   :  { %v8452_v5 = vsel %vm2319_vm14, %v4048_v55, %v4054_v31  ;;  %v4057_v15 = vsel %vm2317_vm13, %v4051_v3, %v4056_v56  ;;  %v4066_v1 = vunpack.c.l.b16 %v4064_v18  ;;  %v4070_v60 = vsel %vm2315_vm12, %v4051_v3, %v4050_v12  ;;  %4717 = vmatpush.bf16.msrb.mxu0 %v5907_v28  ;;  %4730 = vmatpush.bf16.msra.mxu2 %v5915_v62  ;;  %v5884_v18 = vld [vmem:[%s8852_s9 + $0xc0] sm:$0xff] }
 0x6ae   :  { %v8463_v44 = vsel %vm2319_vm14, %v4052_v17, %v4057_v15  ;;  %v4059_v49 = vpack.c.b16 %v8452_v5, %v8452_v5  ;;  %v8468_v9 = vsel %vm2319_vm14, %v4065_v10, %v4068_v52  ;;  %v4071_v43 = vsel %vm2317_vm13, %v4052_v17, %v4070_v60  ;;  %4696 = vmatpush.bf16.msra.mxu1 %v5886_v50  ;;  %v5912_v52 = vld [vmem:[%s8852_s9 + $0x1a0] sm:$0xff] }
 0x6af   :  { %v4060_v35 = vpack.c.b16 %v8463_v44, %v8463_v44  ;;  %v8477_v45 = vsel %vm2319_vm14, %v4066_v1, %v4071_v43  ;;  %v4073_v27 = vpack.c.b16 %v8468_v9, %v8468_v9  ;;  %v4078_v34 = vperm.slane %v4024_v29, 0  ;;  %v5885_v29 = vld [vmem:[%s8852_s9 + $0xc8] sm:$0xff] }
 0x6b0   :  { %v4074_v26 = vpack.c.b16 %v8477_v45, %v8477_v45  ;;  %v4079_v63 = vunpack.c.l.b16 %v4077_v14  ;;  %v4081_v16 = vsel %vm2315_vm12, %v4048_v55, %v4047_v53  ;;  %v4084_v25 = vsel %vm2315_vm12, %v4052_v17, %v4051_v3  ;;  %4705 = vmatpush.bf16.msra.mxu3 %v5898_v30 }
 0x6b1   :  { %v4080_v51 = vunpack.c.l.b16 %v4078_v34  ;;  %v4082_v20 = vsel %vm2317_vm13, %v4065_v10, %v4081_v16  ;;  %v4085_v2 = vsel %vm2317_vm13, %v4066_v1, %v4084_v25  ;;  %v4091_v4 = vperm.slane %v4015_v37, 0  ;;  %4718 = vmatpush.bf16.msrb.mxu0 %v5906_v42  ;;  %4731 = vmatpush.bf16.msra.mxu2 %v5914_v33  ;;  %v5895_v42 = vld [vmem:[%s8852_s9 + $0x118] sm:$0xff] }
 0x6b2   :  { %v8503_v8 = vsel %vm2319_vm14, %v4079_v63, %v4082_v20  ;;  %v4092_v24 = vperm.slane %v4025_v59, 0  ;;  %v4095_v13 = vsel %vm2315_vm12, %v4065_v10, %v4048_v55  ;;  %v4098_v37 = vsel %vm2315_vm12, %v4066_v1, %v4052_v17  ;;  %4697 = vmatpush.bf16.msra.mxu1 %v5885_v29 }
 0x6b3   :  { %v8514_v53 = vsel %vm2319_vm14, %v4080_v51, %v4085_v2  ;;  %v4087_v39 = vpack.c.b16 %v8503_v8, %v8503_v8  ;;  %v4093_v47 = vunpack.c.l.b16 %v4091_v4  ;;  %v4096_v58 = vsel %vm2317_vm13, %v4079_v63, %v4095_v13  ;;  %v5894_v13 = vld [vmem:[%s8852_s9 + $0x110] sm:$0xff] }
 0x6b4   :  { %v4088_v59 = vpack.c.b16 %v8514_v53, %v8514_v53  ;;  %v4094_v55 = vunpack.c.l.b16 %v4092_v24  ;;  %v4099_v12 = vsel %vm2317_vm13, %v4080_v51, %v4098_v37  ;;  %v4105_v3 = vperm.slane %v4016_v57, 0  ;;  %4706 = vmatpush.bf16.msra.mxu3 %v5897_v19  ;;  %v5910_v8 = vld [vmem:[%s8852_s9 + $0x190] sm:$0xff] }
 0x6b5   :  { %v4097_v17 = vsel %vm2319_vm14, %v4093_v47, %v4096_v58  ;;  %v4106_v40 = vperm.slane %v4026_v23, 0  ;;  %v4109_v28 = vsel %vm2315_vm12, %v4079_v63, %v4065_v10  ;;  %v4112_v21 = vsel %vm2315_vm12, %v4080_v51, %v4066_v1  ;;  %4719 = vmatpush.bf16.msrb.mxu0 %v5905_v36  ;;  %v5904_v23 = vld [vmem:[%s8852_s9 + $0x160] sm:$0xff]  ;;  %4732 = vmatpush.bf16.msra.mxu2 %v5913_v41  ;;  %v5902_v41 = vld [vmem:[%s8852_s9 + $0x150] sm:$0xff] }
 0x6b6   :  { %v4100_v57 = vsel %vm2319_vm14, %v4094_v55, %v4099_v12  ;;  %v4101_v54 = vpack.c.b16 %v4097_v17, %v4097_v17  ;;  %v4107_v14 = vunpack.c.l.b16 %v4105_v3  ;;  %v4110_v32 = vsel %vm2317_vm13, %v4093_v47, %v4109_v28  ;;  %4698 = vmatpush.bf16.msra.mxu1 %v5884_v18 }
 0x6b7   :  { %v4102_v62 = vpack.c.b16 %v4100_v57, %v4100_v57  ;;  %v4108_v31 = vunpack.c.l.b16 %v4106_v40  ;;  %v4113_v56 = vsel %vm2317_vm13, %v4094_v55, %v4112_v21  ;;  %v4119_v10 = vperm.slane %v4017_v48, 0  ;;  %v5909_v57 = vld [vmem:[%s8852_s9 + $0x188] sm:$0xff] }
 0x6b8   :  { %v4111_v15 = vsel %vm2319_vm14, %v4107_v14, %v4110_v32  ;;  %v4120_v1 = vperm.slane %v4027_v22, 0  ;;  %v4123_v60 = vsel %vm2315_vm12, %v4093_v47, %v4079_v63  ;;  %v4126_v50 = vsel %vm2315_vm12, %v4094_v55, %v4080_v51  ;;  %4707 = vmatpush.bf16.msra.mxu3 %v5896_v7  ;;  %v5903_v63 = vld [vmem:[%s8852_s9 + $0x158] sm:$0xff]  ;;  %v5901_v7 = vld [vmem:[%s8852_s9 + $0x148] sm:$0xff]  ;;  %v5900_v32 = vld [vmem:[%s8852_s9 + $0x140] sm:$0xff] }
 0x6b9   :  { %v4114_v30 = vsel %vm2319_vm14, %v4108_v31, %v4113_v56  ;;  %v4115_v43 = vpack.c.b16 %v4111_v15, %v4111_v15  ;;  %v4121_v6 = vunpack.c.l.b16 %v4119_v10  ;;  %v4124_v48 = vsel %vm2317_vm13, %v4107_v14, %v4123_v60  ;;  %4720 = vmatpush.bf16.msrb.mxu0 %v5904_v23  ;;  %4733 = vmatpush.bf16.msra.mxu2 %v5912_v52  ;;  %v5908_v23 = vld [vmem:[%s8852_s9 + $0x180] sm:$0xff]  ;;  %v4763_v60 = vld [vmem:[%s8855_s11 + $0x78] sm:$0xff] }
 0x6ba   :  { %v4116_v34 = vpack.c.b16 %v4114_v30, %v4114_v30  ;;  %v4122_v33 = vunpack.c.l.b16 %v4120_v1  ;;  %v4127_v11 = vsel %vm2317_vm13, %v4108_v31, %v4126_v50  ;;  %v4133_v22 = vperm.slane %v4018_v61, 0  ;;  %v4779_v50 = vld [vmem:[%s8855_s11 + $0xf8] sm:$0xff]  ;;  %4826 = vmatpush.msrb.mxu1 %v4763_v60  ;;  %v4782_v60 = vld [vmem:[%s8855_s11 + $0x110] sm:$0xff] }
 0x6bb   :  { %v4125_v16 = vsel %vm2319_vm14, %v4121_v6, %v4124_v48  ;;  %v4134_v25 = vperm.slane %v4028_v38, 0  ;;  %v4137_v51 = vsel %vm2315_vm12, %v4107_v14, %v4093_v47  ;;  %v4140_v20 = vsel %vm2315_vm12, %v4108_v31, %v4094_v55  ;;  %v5892_v14 = vld [vmem:[%s8852_s9 + $0x100] sm:$0xff]  ;;  %v4795_v30 = vld [vmem:[%s8855_s11 + $0x178] sm:$0xff]  ;;  %v4778_v48 = vld [vmem:[%s8855_s11 + $0xf0] sm:$0xff] }
 0x6bc   :  { %v4128_v61 = vsel %vm2319_vm14, %v4122_v33, %v4127_v11  ;;  %v4129_v2 = vpack.c.b16 %v4125_v16, %v4125_v16  ;;  %v4135_v4 = vunpack.c.l.b16 %v4133_v22  ;;  %v4138_v29 = vsel %vm2317_vm13, %v4121_v6, %v4137_v51  ;;  %4708 = vmatpush.bf16.msra.mxu3 %v5895_v42  ;;  %v4762_v6 = vld [vmem:[%s8855_s11 + $0x70] sm:$0xff]  ;;  %v4777_v11 = vld [vmem:[%s8855_s11 + $0xe8] sm:$0xff]  ;;  %v4760_v16 = vld [vmem:[%s8855_s11 + $0x60] sm:$0xff] }
 0x6bd   :  { %v4130_v19 = vpack.c.b16 %v4128_v61, %v4128_v61  ;;  %v4136_v24 = vunpack.c.l.b16 %v4134_v25  ;;  %v4141_v0 = vsel %vm2317_vm13, %v4122_v33, %v4140_v20  ;;  %v4145_v38 = vrot.slane %v4073_v27, 6  ;;  %4721 = vmatpush.bf16.msrb.mxu0 %v5903_v63  ;;  %4734 = vmatpush.bf16.msra.mxu2 %v5911_v46  ;;  %v4794_v42 = vld [vmem:[%s8855_s11 + $0x170] sm:$0xff]  ;;  %v4761_v33 = vld [vmem:[%s8855_s11 + $0x68] sm:$0xff]  ;;  %v4776_v25 = vld [vmem:[%s8855_s11 + $0xe0] sm:$0xff] }
 0x6be   :  { %v4139_v37 = vsel %vm2319_vm14, %v4135_v4, %v4138_v29  ;;  %v4146_v36 = vrot.slane %v4087_v39, 4  ;;  %v4147_v47 = vrot.slane %v4101_v54, 2  ;;  %v4148_v58 = vrot.slane %v4129_v2, 6  ;;  %4827 = vmatpush.msrb.mxu1 %v4762_v6  ;;  %v4793_v22 = vld [vmem:[%s8855_s11 + $0x168] sm:$0xff]  ;;  %v4792_v51 = vld [vmem:[%s8855_s11 + $0x160] sm:$0xff]  ;;  %v4759_v46 = vld [vmem:[%s8855_s11 + $0x58] sm:$0xff] }
 0x6bf   :  { %v4142_v9 = vsel %vm2319_vm14, %v4136_v24, %v4141_v0  ;;  %v4143_v27 = vpack.c.b16 %v4139_v37, %v4139_v37  ;;  %v4150_v55 = vrot.slane %v4074_v26, 6  ;;  %v4151_v12 = vrot.slane %v4088_v59, 4  ;;  %v5893_v59 = vld [vmem:[%s8852_s9 + $0x108] sm:$0xff]  ;;  %v4808_v20 = vld [vmem:[%s8855_s11 + $0x1e0] sm:$0xff]  ;;  %v4775_v61 = vld [vmem:[%s8855_s11 + $0xd8] sm:$0xff] }
 0x6c0   :  { %v4144_v39 = vpack.c.b16 %v4142_v9, %v4142_v9  ;;  %v4152_v3 = vrot.slane %v4102_v62, 2  ;;  %v4153_v17 = vrot.slane %v4130_v19, 6  ;;  %v4157_v40 = vsel %vm1746_vm11, %v4059_v49, %v4145_v38  ;;  %4709 = vmatpush.bf16.msra.mxu3 %v5894_v13  ;;  %4828 = vmatpush.msrb.mxu1 %v4761_v33  ;;  %v4809_v63 = vld [vmem:[%s8855_s11 + $0x1e8] sm:$0xff]  ;;  %v4791_v2 = vld [vmem:[%s8855_s11 + $0x158] sm:$0xff]  ;;  %v4758_v29 = vld [vmem:[%s8855_s11 + $0x50] sm:$0xff] }
 0x6c1   :  { %v4149_v28 = vrot.slane %v4143_v27, 4  ;;  %v4160_v45 = vsel %vm2719_vm4, %v4146_v36, %v4147_v47  ;;  %v4164_v26 = vsel %vm1746_vm11, %v4115_v43, %v4148_v58  ;;  %v4169_v53 = vsel %vm1746_vm11, %v4060_v35, %v4150_v55  ;;  %4722 = vmatpush.bf16.msrb.mxu0 %v5902_v41  ;;  %4735 = vmatpush.bf16.msra.mxu2 %v5910_v8  ;;  %v4811_v43 = vld [vmem:[%s8855_s11 + $0x1f8] sm:$0xff]  ;;  %v4774_v19 = vld [vmem:[%s8855_s11 + $0xd0] sm:$0xff]  ;;  %v4757_v37 = vld [vmem:[%s8855_s11 + $0x48] sm:$0xff] }
 0x6c2   :  { %v4154_v21 = vrot.slane %v4144_v39, 4  ;;  %v4161_v5 = vsel %vm2723_vm5, %v4157_v40, %v4160_v45  ;;  %v4172_v49 = vsel %vm2719_vm4, %v4151_v12, %v4152_v3  ;;  %v4176_v18 = vsel %vm1746_vm11, %v4116_v34, %v4153_v17  ;;  %v4810_v34 = vld [vmem:[%s8855_s11 + $0x1f0] sm:$0xff]  ;;  %4829 = vmatpush.msrb.mxu1 %v4760_v16  ;;  %v4807_v4 = vld [vmem:[%s8855_s11 + $0x1d8] sm:$0xff]  ;;  %v4773_v36 = vld [vmem:[%s8855_s11 + $0xc8] sm:$0xff] }
 0x6c3   :  { %v4166_v44 = vsel %vm2723_vm5, %v4164_v26, %v4149_v28  ;;  %v4173_v35 = vsel %vm2723_vm5, %v4169_v53, %v4172_v49  ;;  %4295 = vst [vmem:[#allocation1] ss:$4 sm:$0xff] %v4161_v5  ;;  %v4790_v24 = vld [vmem:[%s8855_s11 + $0x150] sm:$0xff]  ;;  %v4789_v47 = vld [vmem:[%s8855_s11 + $0x148] sm:$0xff]  ;;  %v4756_v41 = vld [vmem:[%s8855_s11 + $0x40] sm:$0xff]  ;;  %vm4906_vm11 = vcmask 58368  }
 0x6c4   :  { %v4178_v54 = vsel %vm2723_vm5, %v4176_v18, %v4154_v21  ;;  %4297 = vst [vmem:[#allocation1 + $0x1] ss:$4 sm:$0xff] %v4173_v35  ;;  %4710 = vmatpush.bf16.msra.mxu3 %v5893_v59  ;;  %4830 = vmatpush.msrb.mxu1 %v4759_v46  ;;  %v4806_v0 = vld [vmem:[%s8855_s11 + $0x1d0] sm:$0xff]  ;;  %v4805_v58 = vld [vmem:[%s8855_s11 + $0x1c8] sm:$0xff]  ;;  %v4772_v9 = vld [vmem:[%s8855_s11 + $0xc0] sm:$0xff] }
 0x6c5   :  { %4299 = vst [vmem:[#allocation1 + $0x20] ss:$4 sm:$0xff] %v4166_v44  ;;  %4723 = vmatpush.bf16.msrb.mxu0 %v5901_v7  ;;  %4736 = vmatpush.bf16.msra.mxu2 %v5909_v57  ;;  %v4788_v27 = vld [vmem:[%s8855_s11 + $0x140] sm:$0xff]  ;;  %v4755_v12 = vld [vmem:[%s8855_s11 + $0x38] sm:$0xff]  ;;  %v4754_v40 = vld [vmem:[%s8855_s11 + $0x30] sm:$0xff] }
 0x6c6   :  { %4301 = vst [vmem:[#allocation1 + $0x21] ss:$4 sm:$0xff] %v4178_v54  ;;  %4831 = vmatpush.msrb.mxu1 %v4758_v29  ;;  %v4804_v55 = vld [vmem:[%s8855_s11 + $0x1c0] sm:$0xff]  ;;  %v4771_v8 = vld [vmem:[%s8855_s11 + $0xb8] sm:$0xff]  ;;  %v4770_v28 = vld [vmem:[%s8855_s11 + $0xb0] sm:$0xff] }
 0x6c7   :  { %v4787_v39 = vld [vmem:[%s8855_s11 + $0x138] sm:$0xff]  ;;  %v5922_v17 = vld [vmem:[%s8853_s10] ss:$0 sm:$0xff]  ;;  %v4786_v26 = vld [vmem:[%s8855_s11 + $0x130] sm:$0xff] }
 0x6c8   :  { %4711 = vmatpush.bf16.msra.mxu3 %v5892_v14  ;;  %4832 = vmatpush.msrb.mxu1 %v4757_v37  ;;  %v4803_v3 = vld [vmem:[%s8855_s11 + $0x1b8] sm:$0xff]  ;;  %v4802_v53 = vld [vmem:[%s8855_s11 + $0x1b0] sm:$0xff]  ;;  %v4753_v21 = vld [vmem:[%s8855_s11 + $0x28] sm:$0xff] }
 0x6c9   :  { %4724 = vmatpush.bf16.msrb.mxu0 %v5900_v32  ;;  %4737 = vmatpush.bf16.msra.mxu2 %v5908_v23  ;;  %v4769_v5 = vld [vmem:[%s8855_s11 + $0xa8] sm:$0xff]  ;;  %v4752_v57 = vld [vmem:[%s8855_s11 + $0x20] sm:$0xff]  ;;  %v4751_v23 = vld [vmem:[%s8855_s11 + $0x18] sm:$0xff] }
 0x6ca   :  { %4833 = vmatpush.msrb.mxu1 %v4756_v41  ;;  %v4785_v18 = vld [vmem:[%s8855_s11 + $0x128] sm:$0xff]  ;;  %v4768_v54 = vld [vmem:[%s8855_s11 + $0xa0] sm:$0xff] }
 0x6cb   :  { %v4302_v62 = vld.sshfl [vmem:[#allocation1] sm:$0xff pattern:$0x73625140]  ;;  %v4303_v31 = vld.sshfl [vmem:[#allocation1 + $0x8] sm:$0xff pattern:$0x73625140] }
 0x6cc   :  { %4660 = vmatmul.bf16.vlgmr.msrb.gmra.mxu3 %v4302_v62  ;;  %4673 = vmatmul.bf16.vlgmr.msra.gmra.mxu0 %v4303_v31  ;;  %v4304_v56 = vld.sshfl [vmem:[#allocation1 + $0x10] sm:$0xff pattern:$0x73625140]  ;;  %v4305_v10 = vld.sshfl [vmem:[#allocation1 + $0x18] sm:$0xff pattern:$0x73625140] }
 0x6cd   :  { %4686 = vmatmul.bf16.vlgmr.msrb.gmra.mxu2 %v4304_v56  ;;  %4699 = vmatmul.bf16.vlgmr.msra.gmra.mxu1 %v4305_v10  ;;  %v4306_v52 = vld.sshfl [vmem:[#allocation1 + $0x20] sm:$0xff pattern:$0x73625140]  ;;  %v4307_v15 = vld.sshfl [vmem:[#allocation1 + $0x28] sm:$0xff pattern:$0x73625140] }
 0x6ce   :  { %v4308_v1 = vld.sshfl [vmem:[#allocation1 + $0x30] sm:$0xff pattern:$0x73625140]  ;;  %4846 = vmatpush.msrb.mxu3 %v4779_v50  ;;  %4866 = vmatpush.msra.mxu0 %v4795_v30  ;;  %v4801_v7 = vld [vmem:[%s8855_s11 + $0x1a8] sm:$0xff]  ;;  %v4784_v14 = vld [vmem:[%s8855_s11 + $0x120] sm:$0xff] }
 0x6cf   :  { %4886 = vmatpush.msrb.mxu2 %v4811_v43  ;;  %4834 = vmatpush.msrb.mxu1 %v4755_v12  ;;  %v4800_v32 = vld [vmem:[%s8855_s11 + $0x1a0] sm:$0xff]  ;;  %v4767_v62 = vld [vmem:[%s8855_s11 + $0x98] sm:$0xff]  ;;  %v4798_v50 = vld [vmem:[%s8855_s11 + $0x190] sm:$0xff] }
 0x6d0   :  { %4847 = vmatpush.msrb.mxu3 %v4778_v48  ;;  %4867 = vmatpush.msra.mxu0 %v4794_v42  ;;  %v4783_v31 = vld [vmem:[%s8855_s11 + $0x118] sm:$0xff]  ;;  %v4749_v43 = vld [vmem:[%s8855_s11 + $0x8] sm:$0xff]  ;;  %v4796_v16 = vld [vmem:[%s8855_s11 + $0x180] sm:$0xff] }
 0x6d1   :  { %4887 = vmatpush.msrb.mxu2 %v4810_v34  ;;  %4835 = vmatpush.msrb.mxu1 %v4754_v40  ;;  %v4799_v56 = vld [vmem:[%s8855_s11 + $0x198] sm:$0xff]  ;;  %v4765_v6 = vld [vmem:[%s8855_s11 + $0x88] sm:$0xff] }
 0x6d2   :  { %4848 = vmatpush.msrb.mxu3 %v4777_v11  ;;  %4868 = vmatpush.msra.mxu0 %v4793_v22  ;;  %v4781_v42 = vld [vmem:[%s8855_s11 + $0x108] sm:$0xff]  ;;  %v4748_v11 = vld [vmem:[%s8855_s11] sm:$0xff] }
 0x6d3   :  { %4888 = vmatpush.msrb.mxu2 %v4809_v63  ;;  %4836 = vmatpush.msrb.mxu1 %v4753_v21  ;;  %v4797_v34 = vld [vmem:[%s8855_s11 + $0x188] sm:$0xff]  ;;  %v4764_v22 = vld [vmem:[%s8855_s11 + $0x80] sm:$0xff] }
 0x6d4   :  { %4849 = vmatpush.msrb.mxu3 %v4776_v25  ;;  %4869 = vmatpush.msra.mxu0 %v4792_v51  ;;  %v4780_v63 = vld [vmem:[%s8855_s11 + $0x100] sm:$0xff] }
 0x6d5   :  { %4889 = vmatpush.msrb.mxu2 %v4808_v20  ;;  %4837 = vmatpush.msrb.mxu1 %v4752_v57 }
 0x6d6   :  { %4850 = vmatpush.msrb.mxu3 %v4775_v61  ;;  %4870 = vmatpush.msra.mxu0 %v4791_v2  ;;  %v5931_v61 = vmov 1935823168  }
 0x6d7   :  { %4890 = vmatpush.msrb.mxu2 %v4807_v4  ;;  %4838 = vmatpush.msrb.mxu1 %v4751_v23  ;;  %v4745_v2 = vunpack.c.l.s4 %v5931_v61 }
 0x6d8   :  { %4851 = vmatpush.msrb.mxu3 %v4774_v19  ;;  %4871 = vmatpush.msra.mxu0 %v4790_v24 }
 0x6d9   :  { %4891 = vmatpush.msrb.mxu2 %v4806_v0  ;;  %v4746_v24 = vunpack.c.0.s8 %v4745_v2 }
 0x6da   :  { %4852 = vmatpush.msrb.mxu3 %v4773_v36  ;;  %4872 = vmatpush.msra.mxu0 %v4789_v47 }
 0x6db   :  { %4892 = vmatpush.msrb.mxu2 %v4805_v58 }
 0x6dc   :  { %4712 = vmatmul.bf16.vlgmr.msra.gmra.mxu3 %v4306_v52  ;;  %4725 = vmatmul.bf16.vlgmr.msrb.gmra.mxu0 %v4307_v15  ;;  %v4750_v52 = vld [vmem:[%s8855_s11 + $0x10] sm:$0xff] }
 0x6dd   :  { %4738 = vmatmul.bf16.vlgmr.msra.gmra.mxu2 %v4308_v1  ;;  %4853 = vmatpush.msrb.mxu3 %v4772_v9  ;;  %v4766_v15 = vld [vmem:[%s8855_s11 + $0x90] sm:$0xff]  ;;  %v5923_v9 = vld [vmem:[%s8854_s12] ss:$0 sm:$0xff] }
 0x6de   :  { %4873 = vmatpush.msra.mxu0 %v4788_v27  ;;  %4893 = vmatpush.msrb.mxu2 %v4804_v55 }
 0x6df   :  { %4854 = vmatpush.msrb.mxu3 %v4771_v8  ;;  %4839 = vmatpush.msrb.mxu1 %v4750_v52 }
 0x6e0   :  { %4874 = vmatpush.msra.mxu0 %v4787_v39  ;;  %4894 = vmatpush.msrb.mxu2 %v4803_v3 }
 0x6e1   :  { %4855 = vmatpush.msrb.mxu3 %v4770_v28  ;;  %4840 = vmatpush.msrb.mxu1 %v4749_v43 }
 0x6e2   :  { %4875 = vmatpush.msra.mxu0 %v4786_v26  ;;  %4895 = vmatpush.msrb.mxu2 %v4802_v53 }
 0x6e3   :  { %4856 = vmatpush.msrb.mxu3 %v4769_v5  ;;  %4841 = vmatpush.msrb.mxu1 %v4748_v11 }
 0x6e4   :  { %4876 = vmatpush.msra.mxu0 %v4785_v18  ;;  %4896 = vmatpush.msrb.mxu2 %v4801_v7 }
 0x6e5   :  { %4857 = vmatpush.msrb.mxu3 %v4768_v54 }
 0x6e6   :  { %4877 = vmatpush.msra.mxu0 %v4784_v14  ;;  %4897 = vmatpush.msrb.mxu2 %v4800_v32 }
 0x6e7   :  { %4858 = vmatpush.msrb.mxu3 %v4767_v62 }
 0x6e8   :  { %4878 = vmatpush.msra.mxu0 %v4783_v31  ;;  %4898 = vmatpush.msrb.mxu2 %v4799_v56 }
 0x6e9   :  { %4859 = vmatpush.msrb.mxu3 %v4766_v15 }
 0x6ea   :  { %4879 = vmatpush.msra.mxu0 %v4782_v60  ;;  %4899 = vmatpush.msrb.mxu2 %v4798_v50 }
 0x6eb   :  { %4860 = vmatpush.msrb.mxu3 %v4765_v6 }
 0x6ec   :  { %4880 = vmatpush.msra.mxu0 %v4781_v42  ;;  %4900 = vmatpush.msrb.mxu2 %v4797_v34 }
 0x6ed   :  { %4861 = vmatpush.msrb.mxu3 %v4764_v22 }
 0x6ee   :  { %4881 = vmatpush.msra.mxu0 %v4780_v63  ;;  %4901 = vmatpush.msrb.mxu2 %v4796_v16 }
 0x749   :  { %v4674_v38 = vpop.f32.mrf.mxu0 }
 0x74a   :  { %v8711_v13 = vpop.f32.mrf.mxu1 }
 0x74f   :  { %v4661_v45 = vpop.f32.mrf.mxu3 }
 0x750   :  { %v4687_v59 = vpop.f32.mrf.mxu2  ;;  %v4662_v44 = vadd.f32 %v5922_v17, %v4661_v45 }
 0x751   :  { %v4676_v49 = vpop.f32.mrf.mxu0 }
 0x752   :  { %v4702_v35 = vpop.f32.mrf.mxu1  ;;  %v4675_v10 = vadd.f32 %v4674_v38, %v4662_v44 }
 0x754   :  { %v4688_v33 = vadd.f32 %v4687_v59, %v4675_v10 }
 0x756   :  { %v4701_v25 = vadd.f32 %v8711_v13, %v4688_v33 }
 0x757   :  { %v4663_v1 = vpop.f32.mrf.mxu3 }
 0x758   :  { %v4689_v30 = vpop.f32.mrf.mxu2 }
 0x759   :  { %v4726_v48 = vpop.f32.mrf.mxu0 }
 0x75f   :  { %v4713_v51 = vpop.f32.mrf.mxu3 }
 0x760   :  { %v4714_v20 = vadd.f32 %v4713_v51, %v4701_v25  ;;  %v4739_v46 = vpop.f32.mrf.mxu2 }
 0x761   :  { %v4728_v4 = vpop.f32.mrf.mxu0 }
 0x762   :  { %v4727_v29 = vadd.f32 %v4726_v48, %v4714_v20 }
 0x764   :  { %v4740_v19 = vadd.f32 %v4739_v46, %v4727_v29 }
 0x766   :  { %v4743_v0 = vmax.f32 %v4740_v19, 0.0 }
 0x767   :  { %v4715_v38 = vpop.f32.mrf.mxu3 }
 0x768   :  { %v4747_v37 = vperm.slane %v4743_v0, %v4746_v24  ;;  %v4741_v36 = vpop.f32.mrf.mxu2 }
 0x76a   :  { %4817 = vst [vmem:[#allocation1] ss:$4 sm:$0xff] %v4747_v37 }
 0x771   :  { %v4818_v47 = vld.sshfl [vmem:[#allocation1] sm:$0xff pattern:$0x73625140]  ;;  %v4819_v58 = vld.sshfl [vmem:[#allocation1 + $0x8] sm:$0xff pattern:$0x73625140] }
 0x772   :  { %4842 = vmatmul.f32.vlgmr.msrb.gmra.mxu1 %v4818_v47  ;;  %4862 = vmatmul.f32.vlgmr.msrb.gmra.mxu3 %v4819_v58  ;;  %v4820_v13 = vld.sshfl [vmem:[#allocation1 + $0x10] sm:$0xff pattern:$0x73625140]  ;;  %v4821_v41 = vld.sshfl [vmem:[#allocation1 + $0x18] sm:$0xff pattern:$0x73625140] }
 0x773   :  { %4882 = vmatmul.f32.vlgmr.msra.gmra.mxu0 %v4820_v13  ;;  %4902 = vmatmul.f32.vlgmr.msrb.gmra.mxu2 %v4821_v41 }
 0x7ef   :  { %v4843_v27 = vpop.f32.mrf.mxu1 }
 0x7f0   :  { %v4844_v55 = vadd.f32 %v5923_v9, %v4843_v27  ;;  %v4883_v39 = vpop.f32.mrf.mxu0 }
 0x7f5   :  { %v4863_v12 = vpop.f32.mrf.mxu3 }
 0x7f6   :  { %v4864_v8 = vadd.f32 %v4863_v12, %v4844_v55  ;;  %v4903_v17 = vpop.f32.mrf.mxu2 }
 0x7f8   :  { %v4884_v3 = vadd.f32 %v4883_v39, %v4864_v8 }
 0x7fa   :  { %v4904_v40 = vadd.f32 %v4903_v17, %v4884_v3 }
 0x7fc   :  { %4907 = vst.msk [vmem:[%s8856_s13] sm:$0x3] %vm4906_vm11, %v4904_v40 }

</bundles_post_ra>
